<compile_context>
chip_gen: v7x
topology: tpu7x:2x2x1
jax: 0.10.0
libtpu: 0.0.40
codegen_flags: <defaults>
</compile_context>

<pallas_src>
import jax
import jax.numpy as jnp
from jax.experimental import pallas as pl
from jax.experimental.pallas import tpu as pltpu


def _mha1d_kernel(x_ref, y_ref, wq_ref, bq_ref, wk_ref, bk_ref, wv_ref,
                  bv_ref, o_ref):
    # x_ref, y_ref : (1, k, N, C)    position-major activations for one batch
    # wq_ref,wk_ref: (H, C, d)       head-major projection weights (resident)
    # wv_ref       : (H, C, dv)
    # bq_ref,bk_ref: (H, 1, d)       head-major biases (resident)
    # bv_ref       : (H, 1, dv)
    # o_ref        : (1, H, N, k*dv) final layout; lane-aligned slice stores
    k_groups = x_ref.shape[1]
    H = o_ref.shape[1]
    dv = wv_ref.shape[2]
    f32 = jnp.float32
    bf16 = jnp.bfloat16

    for j in range(k_groups):                  # static unroll over groups
        xg = x_ref[0, j]                       # (N, C)
        yg = y_ref[0, j]                       # (N, C)
        for h in range(H):                     # static unroll over heads
            # 1x1-conv projections: tiny f32 MXU matmuls + VALU bias add.
            q_h = jnp.dot(xg, wq_ref[h], preferred_element_type=f32) + bq_ref[h]  # (N, d)
            k_h = jnp.dot(yg, wk_ref[h], preferred_element_type=f32) + bk_ref[h]  # (N, d)
            v_h = jnp.dot(yg, wv_ref[h], preferred_element_type=f32) + bv_ref[h]  # (N, dv)

            # energy[i, m] = q_h[i] . k_h[m]  (no 1/sqrt(d) scale, matching the
            # PyTorch module which softmaxes the raw bmm output).
            # bf16 operands, f32 accumulation (bf16-native MXU).
            energy = jax.lax.dot_general(
                q_h.astype(bf16), k_h.astype(bf16),
                (((1,), (1,)), ((), ())),
                preferred_element_type=f32)                                   # (N, N)

            # Numerically stable softmax; normalization deferred to after the
            # PV matmul (N*dv multiplies instead of N*N, less vreg pressure).
            e = energy - jnp.max(energy, axis=-1, keepdims=True)
            p = jnp.exp(e)
            l = jnp.sum(p, axis=-1, keepdims=True)                            # (N, 1)
            pv = jnp.dot(p.astype(bf16), v_h.astype(bf16),
                         preferred_element_type=f32)                          # (N, dv)
            out_h = pv * (1.0 / l)                                            # exact norm

            # Lane-aligned (multiple-of-128) static slice store into the
            # final-layout output block: column block j of head h.
            o_ref[0, h, :, j * dv:(j + 1) * dv] = out_h.astype(o_ref.dtype)


def multi_head_attention_1d(x, y, params, n_heads):
    """Forward of MultiHeadAttention1d (residual=False, attention_type=0, no mask).

    x, y: (B, k, C, N) float32, with k == K and same N (no interpolation path).
    params: (wq, bq, wk, bk, wv, bv) of the three 1x1 convs.
    Returns (B, n_heads, N, k, y_out_channels // n_heads), matching the
    PyTorch module's `out.permute(1, 0, 3, 2, 4)` output.
    """
    wq, bq, wk, bk, wv, bv = params
    B, k, C, N = x.shape
    B2, K, Cy, N2 = y.shape
    # Guard the implemented configuration (see TODOs at the top of the file).
    assert B == B2 and k == K and N == N2, "attention_type=0 path requires k==K, n==N"
    assert Cy == C, "module applies key_conv(in_channels=C) to y, so Cy must equal C"

    H = n_heads
    d = wq.shape[0] // H        # out_channels // n_heads
    dv = wv.shape[0] // H       # y_out_channels // n_heads

    # Layout plumbing (tiny wrapper ops; activations are only B*k*C*N*4 bytes):
    #  - activations position-major so every in-kernel matmul is MXU-native,
    #  - weights/biases head-major so the kernel never lane-slices heads.
    x_t = jnp.transpose(x, (0, 1, 3, 2))                     # (B, k, N, C)
    y_t = jnp.transpose(y, (0, 1, 3, 2))                     # (B, k, N, C)
    wq_r = jnp.transpose(wq.reshape(H, d, C), (0, 2, 1))     # (H, C, d)
    wk_r = jnp.transpose(wk.reshape(H, d, C), (0, 2, 1))     # (H, C, d)
    wv_r = jnp.transpose(wv.reshape(H, dv, C), (0, 2, 1))    # (H, C, dv)
    bq_r = bq.reshape(H, 1, d)
    bk_r = bk.reshape(H, 1, d)
    bv_r = bv.reshape(H, 1, dv)

    out = pl.pallas_call(
        _mha1d_kernel,
        out_shape=jax.ShapeDtypeStruct((B, H, N, k * dv), jnp.float32),
        grid=(B,),
        in_specs=[
            pl.BlockSpec((1, k, N, C), lambda b: (b, 0, 0, 0)),   # x  (per batch)
            pl.BlockSpec((1, k, N, C), lambda b: (b, 0, 0, 0)),   # y  (per batch)
            pl.BlockSpec((H, C, d),  lambda b: (0, 0, 0)),        # Wq (resident)
            pl.BlockSpec((H, 1, d),  lambda b: (0, 0, 0)),        # bq (resident)
            pl.BlockSpec((H, C, d),  lambda b: (0, 0, 0)),        # Wk (resident)
            pl.BlockSpec((H, 1, d),  lambda b: (0, 0, 0)),        # bk (resident)
            pl.BlockSpec((H, C, dv), lambda b: (0, 0, 0)),        # Wv (resident)
            pl.BlockSpec((H, 1, dv), lambda b: (0, 0, 0)),        # bv (resident)
        ],
        out_specs=pl.BlockSpec((1, H, N, k * dv), lambda b: (b, 0, 0, 0)),
        compiler_params=pltpu.CompilerParams(
            dimension_semantics=("parallel",)),
    )(x_t, y_t, wq_r, bq_r, wk_r, bk_r, wv_r, bv_r)

    # Free reshape (pure minor-dim split, no data movement / no HBM pass) to
    # the module's (B, H, N, k, dv) output layout.
    return out.reshape(B, H, N, k, dv)


def _reference_forward(x, y, params, n_heads):
    """Pure-JAX f32 replica of the PyTorch graph (residual=False, xa=0, no mask)."""
    wq, bq, wk, bk, wv, bv = params
    B, k, C, N = x.shape
    H = n_heads
    d = wq.shape[0] // H
    dv = wv.shape[0] // H
    hi = jax.lax.Precision.HIGHEST
    x2 = x.reshape(B * k, C, N)
    y2 = y.reshape(B * k, C, N)

    def conv1x1(inp, w, b):
        return jnp.einsum("oc,gcn->gon", w, inp, precision=hi) + b[None, :, None]

    q = conv1x1(x2, wq, bq)     # (BK, H*d, N)
    kk = conv1x1(y2, wk, bk)
    v = conv1x1(y2, wv, bv)

    def to_heads(t, dh):
        t = t.reshape(B, k, H * dh, N).transpose(0, 1, 3, 2)      # (B,k,N,H*dh)
        t = jnp.stack(jnp.split(t, H, axis=-1), axis=0)           # (H,B,k,N,dh)
        return t.reshape(H * B * k, N, dh)

    qh = to_heads(q, d)
    kh = to_heads(kk, d)
    vh = to_heads(v, dv)

    energy = jnp.einsum("gnd,gmd->gnm", qh, kh, precision=hi)
    attn = jax.nn.softmax(energy, axis=-1)
    out = jnp.einsum("gnm,gmd->gnd", attn, vh, precision=hi)
    out = out.reshape(H, B, k, N, dv)
    return jnp.transpose(out, (1, 0, 3, 2, 4))                    # (B,H,N,k,dv)


if __name__ == "__main__":
    # Module config: in_channels=8, out_channels=None (-> 8), y_out_channels=128,
    # n_heads=2, residual=False, kernel_size=1, attention_type=0.
    # N=128 and dv=128 keep the big tiles lane-dense (full 128-lane stores).
    B, k, C, N = 2, 2, 8, 128
    n_heads = 2
    d_out = 8                    # out_channels per head
    d_vout = 128                 # y_out_channels per head

    key = jax.random.PRNGKey(0)
    ks = jax.random.split(key, 8)
    wq = 0.1 * jax.random.normal(ks[0], (n_heads * d_out, C), jnp.float32)
    bq = 0.1 * jax.random.normal(ks[1], (n_heads * d_out,), jnp.float32)
    wk = 0.1 * jax.random.normal(ks[2], (n_heads * d_out, C), jnp.float32)
    bk = 0.1 * jax.random.normal(ks[3], (n_heads * d_out,), jnp.float32)
    wv = 0.1 * jax.random.normal(ks[4], (n_heads * d_vout, C), jnp.float32)
    bv = 0.1 * jax.random.normal(ks[5], (n_heads * d_vout,), jnp.float32)
    params = (wq, bq, wk, bk, wv, bv)

    x = jax.random.normal(ks[6], (B, k, C, N), jnp.float32)
    y = jax.random.normal(ks[7], (B, k, C, N), jnp.float32)

    out = multi_head_attention_1d(x, y, params, n_heads)
    out = jax.block_until_ready(out)

    ref = _reference_forward(x, y, params, n_heads)
    assert out.shape == (B, n_heads, N, k, d_vout), out.shape
    # Tolerance sized for the intentional bf16 MXU-operand casts on the energy
    # and PV matmuls (f32 accumulation); logic errors would be O(1e-1..1).
    assert jnp.allclose(out, ref, atol=1e-2, rtol=1e-2), "mismatch vs reference"

    print("KERNEL_OK")
</pallas_src>

<mosaic_0001>
module attributes {stable_mosaic.version = 11 : i64} {
  func.func @_mha1d_kernel(%arg0: i32, %arg1: memref<1x2x128x8xf32, #tpu.memory_space<vmem>>, %arg2: memref<1x2x128x8xf32, #tpu.memory_space<vmem>>, %arg3: memref<2x8x8xf32, #tpu.memory_space<vmem>>, %arg4: memref<2x1x8xf32, #tpu.memory_space<vmem>>, %arg5: memref<2x8x8xf32, #tpu.memory_space<vmem>>, %arg6: memref<2x1x8xf32, #tpu.memory_space<vmem>>, %arg7: memref<2x8x128xf32, #tpu.memory_space<vmem>>, %arg8: memref<2x1x128xf32, #tpu.memory_space<vmem>>, %arg9: memref<1x2x128x256xf32, #tpu.memory_space<vmem>>) attributes {dimension_semantics = [#tpu.dimension_semantics<parallel>], iteration_bounds = array<i64: 2>, scalar_prefetch = 0 : i64, scratch_operands = 0 : i64, tpu.core_type = #tpu.core_type<tc>, window_params = [{transform_indices = @transform_0, window_bounds = array<i64: 1, 2, 128, 8>}, {transform_indices = @transform_1, window_bounds = array<i64: 1, 2, 128, 8>}, {pipeline_mode = #tpu.pipeline_mode<synchronous>, transform_indices = @transform_2, window_bounds = array<i64: 2, 8, 8>}, {pipeline_mode = #tpu.pipeline_mode<synchronous>, transform_indices = @transform_3, window_bounds = array<i64: 2, 1, 8>}, {pipeline_mode = #tpu.pipeline_mode<synchronous>, transform_indices = @transform_4, window_bounds = array<i64: 2, 8, 8>}, {pipeline_mode = #tpu.pipeline_mode<synchronous>, transform_indices = @transform_5, window_bounds = array<i64: 2, 1, 8>}, {pipeline_mode = #tpu.pipeline_mode<synchronous>, transform_indices = @transform_6, window_bounds = array<i64: 2, 8, 128>}, {pipeline_mode = #tpu.pipeline_mode<synchronous>, transform_indices = @transform_7, window_bounds = array<i64: 2, 1, 128>}, {transform_indices = @transform_8, window_bounds = array<i64: 1, 2, 128, 256>}]} {
    %c0 = arith.constant 0 : index
    %c0_0 = arith.constant 0 : index
    %c0_1 = arith.constant 0 : index
    %c0_2 = arith.constant 0 : index
    %0 = vector.load %arg1[%c0, %c0_0, %c0_1, %c0_2] : memref<1x2x128x8xf32, #tpu.memory_space<vmem>>, vector<1x1x128x8xf32>
    %1 = vector.shape_cast %0 : vector<1x1x128x8xf32> to vector<128x8xf32>
    %c0_3 = arith.constant 0 : index
    %c0_4 = arith.constant 0 : index
    %c0_5 = arith.constant 0 : index
    %c0_6 = arith.constant 0 : index
    %2 = vector.load %arg2[%c0_3, %c0_4, %c0_5, %c0_6] : memref<1x2x128x8xf32, #tpu.memory_space<vmem>>, vector<1x1x128x8xf32>
    %3 = vector.shape_cast %2 : vector<1x1x128x8xf32> to vector<128x8xf32>
    %c0_7 = arith.constant 0 : index
    %c0_8 = arith.constant 0 : index
    %c0_9 = arith.constant 0 : index
    %4 = vector.load %arg3[%c0_7, %c0_8, %c0_9] : memref<2x8x8xf32, #tpu.memory_space<vmem>>, vector<1x8x8xf32>
    %5 = vector.shape_cast %4 : vector<1x8x8xf32> to vector<8x8xf32>
    %cst = arith.constant dense<0.000000e+00> : vector<128x8xf32>
    %6 = tpu.matmul %1, %5, %cst {dimension_numbers = #tpu.dot_dimension_numbers<[1], [0], [0], [1], [0, 0, 1, 1], [], []>} : vector<128x8xf32>, vector<8x8xf32>, vector<128x8xf32> -> vector<128x8xf32>
    %c0_10 = arith.constant 0 : index
    %c0_11 = arith.constant 0 : index
    %c0_12 = arith.constant 0 : index
    %7 = vector.load %arg4[%c0_10, %c0_11, %c0_12] : memref<2x1x8xf32, #tpu.memory_space<vmem>>, vector<1x1x8xf32>
    %8 = vector.shape_cast %7 : vector<1x1x8xf32> to vector<1x8xf32>
    %9 = vector.broadcast %8 : vector<1x8xf32> to vector<128x8xf32>
    %10 = arith.addf %6, %9 : vector<128x8xf32>
    %c0_13 = arith.constant 0 : index
    %c0_14 = arith.constant 0 : index
    %c0_15 = arith.constant 0 : index
    %11 = vector.load %arg5[%c0_13, %c0_14, %c0_15] : memref<2x8x8xf32, #tpu.memory_space<vmem>>, vector<1x8x8xf32>
    %12 = vector.shape_cast %11 : vector<1x8x8xf32> to vector<8x8xf32>
    %cst_16 = arith.constant dense<0.000000e+00> : vector<128x8xf32>
    %13 = tpu.matmul %3, %12, %cst_16 {dimension_numbers = #tpu.dot_dimension_numbers<[1], [0], [0], [1], [0, 0, 1, 1], [], []>} : vector<128x8xf32>, vector<8x8xf32>, vector<128x8xf32> -> vector<128x8xf32>
    %c0_17 = arith.constant 0 : index
    %c0_18 = arith.constant 0 : index
    %c0_19 = arith.constant 0 : index
    %14 = vector.load %arg6[%c0_17, %c0_18, %c0_19] : memref<2x1x8xf32, #tpu.memory_space<vmem>>, vector<1x1x8xf32>
    %15 = vector.shape_cast %14 : vector<1x1x8xf32> to vector<1x8xf32>
    %16 = vector.broadcast %15 : vector<1x8xf32> to vector<128x8xf32>
    %17 = arith.addf %13, %16 : vector<128x8xf32>
    %c0_20 = arith.constant 0 : index
    %c0_21 = arith.constant 0 : index
    %c0_22 = arith.constant 0 : index
    %18 = vector.load %arg7[%c0_20, %c0_21, %c0_22] : memref<2x8x128xf32, #tpu.memory_space<vmem>>, vector<1x8x128xf32>
    %19 = vector.shape_cast %18 : vector<1x8x128xf32> to vector<8x128xf32>
    %cst_23 = arith.constant dense<0.000000e+00> : vector<128x128xf32>
    %20 = tpu.matmul %3, %19, %cst_23 {dimension_numbers = #tpu.dot_dimension_numbers<[1], [0], [0], [1], [0, 0, 1, 1], [], []>} : vector<128x8xf32>, vector<8x128xf32>, vector<128x128xf32> -> vector<128x128xf32>
    %c0_24 = arith.constant 0 : index
    %c0_25 = arith.constant 0 : index
    %c0_26 = arith.constant 0 : index
    %21 = vector.load %arg8[%c0_24, %c0_25, %c0_26] : memref<2x1x128xf32, #tpu.memory_space<vmem>>, vector<1x1x128xf32>
    %22 = vector.shape_cast %21 : vector<1x1x128xf32> to vector<1x128xf32>
    %23 = vector.broadcast %22 : vector<1x128xf32> to vector<128x128xf32>
    %24 = arith.addf %20, %23 : vector<128x128xf32>
    %25 = arith.truncf %10 : vector<128x8xf32> to vector<128x8xbf16>
    %26 = arith.truncf %17 : vector<128x8xf32> to vector<128x8xbf16>
    %cst_27 = arith.constant dense<0.000000e+00> : vector<128x128xf32>
    %27 = tpu.matmul %25, %26, %cst_27 {dimension_numbers = #tpu.dot_dimension_numbers<[1], [1], [0], [0], [0, 0, 1, 0], [], []>} : vector<128x8xbf16>, vector<128x8xbf16>, vector<128x128xf32> -> vector<128x128xf32>
    %cst_28 = arith.constant dense<0xFF800000> : vector<128xf32>
    %28 = vector.multi_reduction <maximumf>, %27, %cst_28 [1] : vector<128x128xf32> to vector<128xf32>
    %29 = vector.shape_cast %28 : vector<128xf32> to vector<128x1xf32>
    %30 = vector.broadcast %29 : vector<128x1xf32> to vector<128x128xf32>
    %31 = arith.subf %27, %30 : vector<128x128xf32>
    %32 = math.exp %31 : vector<128x128xf32>
    %cst_29 = arith.constant dense<0.000000e+00> : vector<128xf32>
    %33 = vector.multi_reduction <add>, %32, %cst_29 [1] : vector<128x128xf32> to vector<128xf32>
    %34 = vector.shape_cast %33 : vector<128xf32> to vector<128x1xf32>
    %35 = arith.truncf %32 : vector<128x128xf32> to vector<128x128xbf16>
    %36 = arith.truncf %24 : vector<128x128xf32> to vector<128x128xbf16>
    %cst_30 = arith.constant dense<0.000000e+00> : vector<128x128xf32>
    %37 = tpu.matmul %35, %36, %cst_30 {dimension_numbers = #tpu.dot_dimension_numbers<[1], [0], [0], [1], [0, 0, 1, 1], [], []>} : vector<128x128xbf16>, vector<128x128xbf16>, vector<128x128xf32> -> vector<128x128xf32>
    %cst_31 = arith.constant 1.000000e+00 : f32
    %38 = vector.broadcast %cst_31 : f32 to vector<128x1xf32>
    %39 = arith.divf %38, %34 : vector<128x1xf32>
    %40 = vector.broadcast %39 : vector<128x1xf32> to vector<128x128xf32>
    %41 = arith.mulf %37, %40 : vector<128x128xf32>
    %c0_32 = arith.constant 0 : index
    %c0_33 = arith.constant 0 : index
    %c0_34 = arith.constant 0 : index
    %c0_35 = arith.constant 0 : index
    %42 = vector.load %arg9[%c0_32, %c0_33, %c0_34, %c0_35] : memref<1x2x128x256xf32, #tpu.memory_space<vmem>>, vector<1x1x128x128xf32>
    %43 = vector.shape_cast %42 : vector<1x1x128x128xf32> to vector<128x128xf32>
    %44 = vector.shape_cast %41 : vector<128x128xf32> to vector<1x1x128x128xf32>
    tpu.vector_store %arg9[%c0_32, %c0_33, %c0_34, %c0_35], %44 {strides = array<i32>} : memref<1x2x128x256xf32, #tpu.memory_space<vmem>>, vector<1x1x128x128xf32>,
    %c1 = arith.constant 1 : index
    %c0_36 = arith.constant 0 : index
    %c0_37 = arith.constant 0 : index
    %45 = vector.load %arg3[%c1, %c0_36, %c0_37] : memref<2x8x8xf32, #tpu.memory_space<vmem>>, vector<1x8x8xf32>
    %46 = vector.shape_cast %45 : vector<1x8x8xf32> to vector<8x8xf32>
    %cst_38 = arith.constant dense<0.000000e+00> : vector<128x8xf32>
    %47 = tpu.matmul %1, %46, %cst_38 {dimension_numbers = #tpu.dot_dimension_numbers<[1], [0], [0], [1], [0, 0, 1, 1], [], []>} : vector<128x8xf32>, vector<8x8xf32>, vector<128x8xf32> -> vector<128x8xf32>
    %c1_39 = arith.constant 1 : index
    %c0_40 = arith.constant 0 : index
    %c0_41 = arith.constant 0 : index
    %48 = vector.load %arg4[%c1_39, %c0_40, %c0_41] : memref<2x1x8xf32, #tpu.memory_space<vmem>>, vector<1x1x8xf32>
    %49 = vector.shape_cast %48 : vector<1x1x8xf32> to vector<1x8xf32>
    %50 = vector.broadcast %49 : vector<1x8xf32> to vector<128x8xf32>
    %51 = arith.addf %47, %50 : vector<128x8xf32>
    %c1_42 = arith.constant 1 : index
    %c0_43 = arith.constant 0 : index
    %c0_44 = arith.constant 0 : index
    %52 = vector.load %arg5[%c1_42, %c0_43, %c0_44] : memref<2x8x8xf32, #tpu.memory_space<vmem>>, vector<1x8x8xf32>
    %53 = vector.shape_cast %52 : vector<1x8x8xf32> to vector<8x8xf32>
    %cst_45 = arith.constant dense<0.000000e+00> : vector<128x8xf32>
    %54 = tpu.matmul %3, %53, %cst_45 {dimension_numbers = #tpu.dot_dimension_numbers<[1], [0], [0], [1], [0, 0, 1, 1], [], []>} : vector<128x8xf32>, vector<8x8xf32>, vector<128x8xf32> -> vector<128x8xf32>
    %c1_46 = arith.constant 1 : index
    %c0_47 = arith.constant 0 : index
    %c0_48 = arith.constant 0 : index
    %55 = vector.load %arg6[%c1_46, %c0_47, %c0_48] : memref<2x1x8xf32, #tpu.memory_space<vmem>>, vector<1x1x8xf32>
    %56 = vector.shape_cast %55 : vector<1x1x8xf32> to vector<1x8xf32>
    %57 = vector.broadcast %56 : vector<1x8xf32> to vector<128x8xf32>
    %58 = arith.addf %54, %57 : vector<128x8xf32>
    %c1_49 = arith.constant 1 : index
    %c0_50 = arith.constant 0 : index
    %c0_51 = arith.constant 0 : index
    %59 = vector.load %arg7[%c1_49, %c0_50, %c0_51] : memref<2x8x128xf32, #tpu.memory_space<vmem>>, vector<1x8x128xf32>
    %60 = vector.shape_cast %59 : vector<1x8x128xf32> to vector<8x128xf32>
    %cst_52 = arith.constant dense<0.000000e+00> : vector<128x128xf32>
    %61 = tpu.matmul %3, %60, %cst_52 {dimension_numbers = #tpu.dot_dimension_numbers<[1], [0], [0], [1], [0, 0, 1, 1], [], []>} : vector<128x8xf32>, vector<8x128xf32>, vector<128x128xf32> -> vector<128x128xf32>
    %c1_53 = arith.constant 1 : index
    %c0_54 = arith.constant 0 : index
    %c0_55 = arith.constant 0 : index
    %62 = vector.load %arg8[%c1_53, %c0_54, %c0_55] : memref<2x1x128xf32, #tpu.memory_space<vmem>>, vector<1x1x128xf32>
    %63 = vector.shape_cast %62 : vector<1x1x128xf32> to vector<1x128xf32>
    %64 = vector.broadcast %63 : vector<1x128xf32> to vector<128x128xf32>
    %65 = arith.addf %61, %64 : vector<128x128xf32>
    %66 = arith.truncf %51 : vector<128x8xf32> to vector<128x8xbf16>
    %67 = arith.truncf %58 : vector<128x8xf32> to vector<128x8xbf16>
    %cst_56 = arith.constant dense<0.000000e+00> : vector<128x128xf32>
    %68 = tpu.matmul %66, %67, %cst_56 {dimension_numbers = #tpu.dot_dimension_numbers<[1], [1], [0], [0], [0, 0, 1, 0], [], []>} : vector<128x8xbf16>, vector<128x8xbf16>, vector<128x128xf32> -> vector<128x128xf32>
    %cst_57 = arith.constant dense<0xFF800000> : vector<128xf32>
    %69 = vector.multi_reduction <maximumf>, %68, %cst_57 [1] : vector<128x128xf32> to vector<128xf32>
    %70 = vector.shape_cast %69 : vector<128xf32> to vector<128x1xf32>
    %71 = vector.broadcast %70 : vector<128x1xf32> to vector<128x128xf32>
    %72 = arith.subf %68, %71 : vector<128x128xf32>
    %73 = math.exp %72 : vector<128x128xf32>
    %cst_58 = arith.constant dense<0.000000e+00> : vector<128xf32>
    %74 = vector.multi_reduction <add>, %73, %cst_58 [1] : vector<128x128xf32> to vector<128xf32>
    %75 = vector.shape_cast %74 : vector<128xf32> to vector<128x1xf32>
    %76 = arith.truncf %73 : vector<128x128xf32> to vector<128x128xbf16>
    %77 = arith.truncf %65 : vector<128x128xf32> to vector<128x128xbf16>
    %cst_59 = arith.constant dense<0.000000e+00> : vector<128x128xf32>
    %78 = tpu.matmul %76, %77, %cst_59 {dimension_numbers = #tpu.dot_dimension_numbers<[1], [0], [0], [1], [0, 0, 1, 1], [], []>} : vector<128x128xbf16>, vector<128x128xbf16>, vector<128x128xf32> -> vector<128x128xf32>
    %cst_60 = arith.constant 1.000000e+00 : f32
    %79 = vector.broadcast %cst_60 : f32 to vector<128x1xf32>
    %80 = arith.divf %79, %75 : vector<128x1xf32>
    %81 = vector.broadcast %80 : vector<128x1xf32> to vector<128x128xf32>
    %82 = arith.mulf %78, %81 : vector<128x128xf32>
    %c0_61 = arith.constant 0 : index
    %c1_62 = arith.constant 1 : index
    %c0_63 = arith.constant 0 : index
    %c0_64 = arith.constant 0 : index
    %83 = vector.load %arg9[%c0_61, %c1_62, %c0_63, %c0_64] : memref<1x2x128x256xf32, #tpu.memory_space<vmem>>, vector<1x1x128x128xf32>
    %84 = vector.shape_cast %83 : vector<1x1x128x128xf32> to vector<128x128xf32>
    %85 = vector.shape_cast %82 : vector<128x128xf32> to vector<1x1x128x128xf32>
    tpu.vector_store %arg9[%c0_61, %c1_62, %c0_63, %c0_64], %85 {strides = array<i32>} : memref<1x2x128x256xf32, #tpu.memory_space<vmem>>, vector<1x1x128x128xf32>,
    %c0_65 = arith.constant 0 : index
    %c1_66 = arith.constant 1 : index
    %c0_67 = arith.constant 0 : index
    %c0_68 = arith.constant 0 : index
    %86 = vector.load %arg1[%c0_65, %c1_66, %c0_67, %c0_68] : memref<1x2x128x8xf32, #tpu.memory_space<vmem>>, vector<1x1x128x8xf32>
    %87 = vector.shape_cast %86 : vector<1x1x128x8xf32> to vector<128x8xf32>
    %c0_69 = arith.constant 0 : index
    %c1_70 = arith.constant 1 : index
    %c0_71 = arith.constant 0 : index
    %c0_72 = arith.constant 0 : index
    %88 = vector.load %arg2[%c0_69, %c1_70, %c0_71, %c0_72] : memref<1x2x128x8xf32, #tpu.memory_space<vmem>>, vector<1x1x128x8xf32>
    %89 = vector.shape_cast %88 : vector<1x1x128x8xf32> to vector<128x8xf32>
    %c0_73 = arith.constant 0 : index
    %c0_74 = arith.constant 0 : index
    %c0_75 = arith.constant 0 : index
    %90 = vector.load %arg3[%c0_73, %c0_74, %c0_75] : memref<2x8x8xf32, #tpu.memory_space<vmem>>, vector<1x8x8xf32>
    %91 = vector.shape_cast %90 : vector<1x8x8xf32> to vector<8x8xf32>
    %cst_76 = arith.constant dense<0.000000e+00> : vector<128x8xf32>
    %92 = tpu.matmul %87, %91, %cst_76 {dimension_numbers = #tpu.dot_dimension_numbers<[1], [0], [0], [1], [0, 0, 1, 1], [], []>} : vector<128x8xf32>, vector<8x8xf32>, vector<128x8xf32> -> vector<128x8xf32>
    %c0_77 = arith.constant 0 : index
    %c0_78 = arith.constant 0 : index
    %c0_79 = arith.constant 0 : index
    %93 = vector.load %arg4[%c0_77, %c0_78, %c0_79] : memref<2x1x8xf32, #tpu.memory_space<vmem>>, vector<1x1x8xf32>
    %94 = vector.shape_cast %93 : vector<1x1x8xf32> to vector<1x8xf32>
    %95 = vector.broadcast %94 : vector<1x8xf32> to vector<128x8xf32>
    %96 = arith.addf %92, %95 : vector<128x8xf32>
    %c0_80 = arith.constant 0 : index
    %c0_81 = arith.constant 0 : index
    %c0_82 = arith.constant 0 : index
    %97 = vector.load %arg5[%c0_80, %c0_81, %c0_82] : memref<2x8x8xf32, #tpu.memory_space<vmem>>, vector<1x8x8xf32>
    %98 = vector.shape_cast %97 : vector<1x8x8xf32> to vector<8x8xf32>
    %cst_83 = arith.constant dense<0.000000e+00> : vector<128x8xf32>
    %99 = tpu.matmul %89, %98, %cst_83 {dimension_numbers = #tpu.dot_dimension_numbers<[1], [0], [0], [1], [0, 0, 1, 1], [], []>} : vector<128x8xf32>, vector<8x8xf32>, vector<128x8xf32> -> vector<128x8xf32>
    %c0_84 = arith.constant 0 : index
    %c0_85 = arith.constant 0 : index
    %c0_86 = arith.constant 0 : index
    %100 = vector.load %arg6[%c0_84, %c0_85, %c0_86] : memref<2x1x8xf32, #tpu.memory_space<vmem>>, vector<1x1x8xf32>
    %101 = vector.shape_cast %100 : vector<1x1x8xf32> to vector<1x8xf32>
    %102 = vector.broadcast %101 : vector<1x8xf32> to vector<128x8xf32>
    %103 = arith.addf %99, %102 : vector<128x8xf32>
    %c0_87 = arith.constant 0 : index
    %c0_88 = arith.constant 0 : index
    %c0_89 = arith.constant 0 : index
    %104 = vector.load %arg7[%c0_87, %c0_88, %c0_89] : memref<2x8x128xf32, #tpu.memory_space<vmem>>, vector<1x8x128xf32>
    %105 = vector.shape_cast %104 : vector<1x8x128xf32> to vector<8x128xf32>
    %cst_90 = arith.constant dense<0.000000e+00> : vector<128x128xf32>
    %106 = tpu.matmul %89, %105, %cst_90 {dimension_numbers = #tpu.dot_dimension_numbers<[1], [0], [0], [1], [0, 0, 1, 1], [], []>} : vector<128x8xf32>, vector<8x128xf32>, vector<128x128xf32> -> vector<128x128xf32>
    %c0_91 = arith.constant 0 : index
    %c0_92 = arith.constant 0 : index
    %c0_93 = arith.constant 0 : index
    %107 = vector.load %arg8[%c0_91, %c0_92, %c0_93] : memref<2x1x128xf32, #tpu.memory_space<vmem>>, vector<1x1x128xf32>
    %108 = vector.shape_cast %107 : vector<1x1x128xf32> to vector<1x128xf32>
    %109 = vector.broadcast %108 : vector<1x128xf32> to vector<128x128xf32>
    %110 = arith.addf %106, %109 : vector<128x128xf32>
    %111 = arith.truncf %96 : vector<128x8xf32> to vector<128x8xbf16>
    %112 = arith.truncf %103 : vector<128x8xf32> to vector<128x8xbf16>
    %cst_94 = arith.constant dense<0.000000e+00> : vector<128x128xf32>
    %113 = tpu.matmul %111, %112, %cst_94 {dimension_numbers = #tpu.dot_dimension_numbers<[1], [1], [0], [0], [0, 0, 1, 0], [], []>} : vector<128x8xbf16>, vector<128x8xbf16>, vector<128x128xf32> -> vector<128x128xf32>
    %cst_95 = arith.constant dense<0xFF800000> : vector<128xf32>
    %114 = vector.multi_reduction <maximumf>, %113, %cst_95 [1] : vector<128x128xf32> to vector<128xf32>
    %115 = vector.shape_cast %114 : vector<128xf32> to vector<128x1xf32>
    %116 = vector.broadcast %115 : vector<128x1xf32> to vector<128x128xf32>
    %117 = arith.subf %113, %116 : vector<128x128xf32>
    %118 = math.exp %117 : vector<128x128xf32>
    %cst_96 = arith.constant dense<0.000000e+00> : vector<128xf32>
    %119 = vector.multi_reduction <add>, %118, %cst_96 [1] : vector<128x128xf32> to vector<128xf32>
    %120 = vector.shape_cast %119 : vector<128xf32> to vector<128x1xf32>
    %121 = arith.truncf %118 : vector<128x128xf32> to vector<128x128xbf16>
    %122 = arith.truncf %110 : vector<128x128xf32> to vector<128x128xbf16>
    %cst_97 = arith.constant dense<0.000000e+00> : vector<128x128xf32>
    %123 = tpu.matmul %121, %122, %cst_97 {dimension_numbers = #tpu.dot_dimension_numbers<[1], [0], [0], [1], [0, 0, 1, 1], [], []>} : vector<128x128xbf16>, vector<128x128xbf16>, vector<128x128xf32> -> vector<128x128xf32>
    %cst_98 = arith.constant 1.000000e+00 : f32
    %124 = vector.broadcast %cst_98 : f32 to vector<128x1xf32>
    %125 = arith.divf %124, %120 : vector<128x1xf32>
    %126 = vector.broadcast %125 : vector<128x1xf32> to vector<128x128xf32>
    %127 = arith.mulf %123, %126 : vector<128x128xf32>
    %c0_99 = arith.constant 0 : index
    %c0_100 = arith.constant 0 : index
    %c0_101 = arith.constant 0 : index
    %c128 = arith.constant 128 : index
    %128 = vector.load %arg9[%c0_99, %c0_100, %c0_101, %c128] : memref<1x2x128x256xf32, #tpu.memory_space<vmem>>, vector<1x1x128x128xf32>
    %129 = vector.shape_cast %128 : vector<1x1x128x128xf32> to vector<128x128xf32>
    %130 = vector.shape_cast %127 : vector<128x128xf32> to vector<1x1x128x128xf32>
    tpu.vector_store %arg9[%c0_99, %c0_100, %c0_101, %c128], %130 {strides = array<i32>} : memref<1x2x128x256xf32, #tpu.memory_space<vmem>>, vector<1x1x128x128xf32>,
    %c1_102 = arith.constant 1 : index
    %c0_103 = arith.constant 0 : index
    %c0_104 = arith.constant 0 : index
    %131 = vector.load %arg3[%c1_102, %c0_103, %c0_104] : memref<2x8x8xf32, #tpu.memory_space<vmem>>, vector<1x8x8xf32>
    %132 = vector.shape_cast %131 : vector<1x8x8xf32> to vector<8x8xf32>
    %cst_105 = arith.constant dense<0.000000e+00> : vector<128x8xf32>
    %133 = tpu.matmul %87, %132, %cst_105 {dimension_numbers = #tpu.dot_dimension_numbers<[1], [0], [0], [1], [0, 0, 1, 1], [], []>} : vector<128x8xf32>, vector<8x8xf32>, vector<128x8xf32> -> vector<128x8xf32>
    %c1_106 = arith.constant 1 : index
    %c0_107 = arith.constant 0 : index
    %c0_108 = arith.constant 0 : index
    %134 = vector.load %arg4[%c1_106, %c0_107, %c0_108] : memref<2x1x8xf32, #tpu.memory_space<vmem>>, vector<1x1x8xf32>
    %135 = vector.shape_cast %134 : vector<1x1x8xf32> to vector<1x8xf32>
    %136 = vector.broadcast %135 : vector<1x8xf32> to vector<128x8xf32>
    %137 = arith.addf %133, %136 : vector<128x8xf32>
    %c1_109 = arith.constant 1 : index
    %c0_110 = arith.constant 0 : index
    %c0_111 = arith.constant 0 : index
    %138 = vector.load %arg5[%c1_109, %c0_110, %c0_111] : memref<2x8x8xf32, #tpu.memory_space<vmem>>, vector<1x8x8xf32>
    %139 = vector.shape_cast %138 : vector<1x8x8xf32> to vector<8x8xf32>
    %cst_112 = arith.constant dense<0.000000e+00> : vector<128x8xf32>
    %140 = tpu.matmul %89, %139, %cst_112 {dimension_numbers = #tpu.dot_dimension_numbers<[1], [0], [0], [1], [0, 0, 1, 1], [], []>} : vector<128x8xf32>, vector<8x8xf32>, vector<128x8xf32> -> vector<128x8xf32>
    %c1_113 = arith.constant 1 : index
    %c0_114 = arith.constant 0 : index
    %c0_115 = arith.constant 0 : index
    %141 = vector.load %arg6[%c1_113, %c0_114, %c0_115] : memref<2x1x8xf32, #tpu.memory_space<vmem>>, vector<1x1x8xf32>
    %142 = vector.shape_cast %141 : vector<1x1x8xf32> to vector<1x8xf32>
    %143 = vector.broadcast %142 : vector<1x8xf32> to vector<128x8xf32>
    %144 = arith.addf %140, %143 : vector<128x8xf32>
    %c1_116 = arith.constant 1 : index
    %c0_117 = arith.constant 0 : index
    %c0_118 = arith.constant 0 : index
    %145 = vector.load %arg7[%c1_116, %c0_117, %c0_118] : memref<2x8x128xf32, #tpu.memory_space<vmem>>, vector<1x8x128xf32>
    %146 = vector.shape_cast %145 : vector<1x8x128xf32> to vector<8x128xf32>
    %cst_119 = arith.constant dense<0.000000e+00> : vector<128x128xf32>
    %147 = tpu.matmul %89, %146, %cst_119 {dimension_numbers = #tpu.dot_dimension_numbers<[1], [0], [0], [1], [0, 0, 1, 1], [], []>} : vector<128x8xf32>, vector<8x128xf32>, vector<128x128xf32> -> vector<128x128xf32>
    %c1_120 = arith.constant 1 : index
    %c0_121 = arith.constant 0 : index
    %c0_122 = arith.constant 0 : index
    %148 = vector.load %arg8[%c1_120, %c0_121, %c0_122] : memref<2x1x128xf32, #tpu.memory_space<vmem>>, vector<1x1x128xf32>
    %149 = vector.shape_cast %148 : vector<1x1x128xf32> to vector<1x128xf32>
    %150 = vector.broadcast %149 : vector<1x128xf32> to vector<128x128xf32>
    %151 = arith.addf %147, %150 : vector<128x128xf32>
    %152 = arith.truncf %137 : vector<128x8xf32> to vector<128x8xbf16>
    %153 = arith.truncf %144 : vector<128x8xf32> to vector<128x8xbf16>
    %cst_123 = arith.constant dense<0.000000e+00> : vector<128x128xf32>
    %154 = tpu.matmul %152, %153, %cst_123 {dimension_numbers = #tpu.dot_dimension_numbers<[1], [1], [0], [0], [0, 0, 1, 0], [], []>} : vector<128x8xbf16>, vector<128x8xbf16>, vector<128x128xf32> -> vector<128x128xf32>
    %cst_124 = arith.constant dense<0xFF800000> : vector<128xf32>
    %155 = vector.multi_reduction <maximumf>, %154, %cst_124 [1] : vector<128x128xf32> to vector<128xf32>
    %156 = vector.shape_cast %155 : vector<128xf32> to vector<128x1xf32>
    %157 = vector.broadcast %156 : vector<128x1xf32> to vector<128x128xf32>
    %158 = arith.subf %154, %157 : vector<128x128xf32>
    %159 = math.exp %158 : vector<128x128xf32>
    %cst_125 = arith.constant dense<0.000000e+00> : vector<128xf32>
    %160 = vector.multi_reduction <add>, %159, %cst_125 [1] : vector<128x128xf32> to vector<128xf32>
    %161 = vector.shape_cast %160 : vector<128xf32> to vector<128x1xf32>
    %162 = arith.truncf %159 : vector<128x128xf32> to vector<128x128xbf16>
    %163 = arith.truncf %151 : vector<128x128xf32> to vector<128x128xbf16>
    %cst_126 = arith.constant dense<0.000000e+00> : vector<128x128xf32>
    %164 = tpu.matmul %162, %163, %cst_126 {dimension_numbers = #tpu.dot_dimension_numbers<[1], [0], [0], [1], [0, 0, 1, 1], [], []>} : vector<128x128xbf16>, vector<128x128xbf16>, vector<128x128xf32> -> vector<128x128xf32>
    %cst_127 = arith.constant 1.000000e+00 : f32
    %165 = vector.broadcast %cst_127 : f32 to vector<128x1xf32>
    %166 = arith.divf %165, %161 : vector<128x1xf32>
    %167 = vector.broadcast %166 : vector<128x1xf32> to vector<128x128xf32>
    %168 = arith.mulf %164, %167 : vector<128x128xf32>
    %c0_128 = arith.constant 0 : index
    %c1_129 = arith.constant 1 : index
    %c0_130 = arith.constant 0 : index
    %c128_131 = arith.constant 128 : index
    %169 = vector.load %arg9[%c0_128, %c1_129, %c0_130, %c128_131] : memref<1x2x128x256xf32, #tpu.memory_space<vmem>>, vector<1x1x128x128xf32>
    %170 = vector.shape_cast %169 : vector<1x1x128x128xf32> to vector<128x128xf32>
    %171 = vector.shape_cast %168 : vector<128x128xf32> to vector<1x1x128x128xf32>
    tpu.vector_store %arg9[%c0_128, %c1_129, %c0_130, %c128_131], %171 {strides = array<i32>} : memref<1x2x128x256xf32, #tpu.memory_space<vmem>>, vector<1x1x128x128xf32>,
    return
  }
  func.func @transform_0(%arg0: i32) -> (i32, i32, i32, i32) {
    %c0_i32 = arith.constant 0 : i32
    %c0_i32_0 = arith.constant 0 : i32
    %c0_i32_1 = arith.constant 0 : i32
    %c0_i32_2 = arith.constant 0 : i32
    return %arg0, %c0_i32, %c0_i32_0, %c0_i32_1 : i32, i32, i32, i32
  }
  func.func @transform_1(%arg0: i32) -> (i32, i32, i32, i32) {
    %c0_i32 = arith.constant 0 : i32
    %c0_i32_0 = arith.constant 0 : i32
    %c0_i32_1 = arith.constant 0 : i32
    %c0_i32_2 = arith.constant 0 : i32
    return %arg0, %c0_i32, %c0_i32_0, %c0_i32_1 : i32, i32, i32, i32
  }
  func.func @transform_2(%arg0: i32) -> (i32, i32, i32) {
    %c0_i32 = arith.constant 0 : i32
    %c0_i32_0 = arith.constant 0 : i32
    %c0_i32_1 = arith.constant 0 : i32
    %c0_i32_2 = arith.constant 0 : i32
    return %c0_i32, %c0_i32_0, %c0_i32_1 : i32, i32, i32
  }
  func.func @transform_3(%arg0: i32) -> (i32, i32, i32) {
    %c0_i32 = arith.constant 0 : i32
    %c0_i32_0 = arith.constant 0 : i32
    %c0_i32_1 = arith.constant 0 : i32
    %c0_i32_2 = arith.constant 0 : i32
    return %c0_i32, %c0_i32_0, %c0_i32_1 : i32, i32, i32
  }
  func.func @transform_4(%arg0: i32) -> (i32, i32, i32) {
    %c0_i32 = arith.constant 0 : i32
    %c0_i32_0 = arith.constant 0 : i32
    %c0_i32_1 = arith.constant 0 : i32
    %c0_i32_2 = arith.constant 0 : i32
    return %c0_i32, %c0_i32_0, %c0_i32_1 : i32, i32, i32
  }
  func.func @transform_5(%arg0: i32) -> (i32, i32, i32) {
    %c0_i32 = arith.constant 0 : i32
    %c0_i32_0 = arith.constant 0 : i32
    %c0_i32_1 = arith.constant 0 : i32
    %c0_i32_2 = arith.constant 0 : i32
    return %c0_i32, %c0_i32_0, %c0_i32_1 : i32, i32, i32
  }
  func.func @transform_6(%arg0: i32) -> (i32, i32, i32) {
    %c0_i32 = arith.constant 0 : i32
    %c0_i32_0 = arith.constant 0 : i32
    %c0_i32_1 = arith.constant 0 : i32
    %c0_i32_2 = arith.constant 0 : i32
    return %c0_i32, %c0_i32_0, %c0_i32_1 : i32, i32, i32
  }
  func.func @transform_7(%arg0: i32) -> (i32, i32, i32) {
    %c0_i32 = arith.constant 0 : i32
    %c0_i32_0 = arith.constant 0 : i32
    %c0_i32_1 = arith.constant 0 : i32
    %c0_i32_2 = arith.constant 0 : i32
    return %c0_i32, %c0_i32_0, %c0_i32_1 : i32, i32, i32
  }
  func.func @transform_8(%arg0: i32) -> (i32, i32, i32, i32) {
    %c0_i32 = arith.constant 0 : i32
    %c0_i32_0 = arith.constant 0 : i32
    %c0_i32_1 = arith.constant 0 : i32
    %c0_i32_2 = arith.constant 0 : i32
    return %arg0, %c0_i32, %c0_i32_0, %c0_i32_1 : i32, i32, i32, i32
  }
}

</mosaic_0001>

<bundles_post_ra>
// kernel: tpu_custom_call.1
= control target key start
LH: loop header
LB: loop body
LE: loop exit
PB: predicated region body
PF: predicated region fallthrough
CT: control target
= control target key end

     0   :  { %13 = vsyncpa [#allocation3], 0  ;;  %s7715_s0 = inlined_call_operand.vmem [shape: f32[2,2,128,8], index: 0, kind: input, shape index: {}]   ;;  %s7716_s1 = inlined_call_operand.vmem [shape: f32[2,2,128,8], index: 1, kind: input, shape index: {}]   ;;  %s7717_s2 = inlined_call_operand.vmem [shape: f32[2,8,8], index: 2, kind: input, shape index: {}]   ;;  %s7718_s3 = inlined_call_operand.vmem [shape: f32[2,1,8], index: 3, kind: input, shape index: {}]   ;;  %s7719_s4 = inlined_call_operand.vmem [shape: f32[2,8,8], index: 4, kind: input, shape index: {}]   ;;  %s7720_s5 = inlined_call_operand.vmem [shape: f32[2,1,8], index: 5, kind: input, shape index: {}]   ;;  %s7721_s6 = inlined_call_operand.vmem [shape: f32[2,8,128], index: 6, kind: input, shape index: {}]   ;;  %s7722_s7 = inlined_call_operand.vmem [shape: f32[2,1,128], index: 7, kind: input, shape index: {}]   ;;  %s7723_s8 = inlined_call_operand.hbm [shape: f32[2,2,128,256], index: 8, kind: output, shape index: {}]  }
   0x1   :  { %15 = vsyncpa [#allocation3 + $0x1], 0  ;;  %s6001_s27 = smov 0   ;;  %s6003_s28 = smov 0  }
   0x2   :  { %s6005_s29 = smov 0   ;;  %s6007_s30 = smov 0  }
   0x3 LB: > { %s6022_s9 = sadd.s32 4294967295, %s5951_s30   ;;  %s4315_s10 = sadd.s32 4294967294, %s5951_s30   ;;  %s5951_s30 = sphi %s6007_s30, %s7869_s30   ;;  %s5947_s29 = sphi %s6005_s29, %s7868_s29   ;;  %s5943_s28 = sphi %s6003_s28, %s7867_s28   ;;  %s5939_s27 = sphi %s6001_s27, %s7866_s27  }
   0x4   : > { %s6026_s11 = sadd.s32 1, %s5951_s30   ;;  %s206_s12 = sadd.s32 1, %s5947_s29 }
   0x5   : > { %s203_s13 = ssub.s32 %s5951_s30, %s6026_s11  ;;  %p216_p0 = scmp.ne.s32.totalorder %s5947_s29, %s5943_s28 }
   0x6   : > { %p204_p1 = scmp.eq.s32.totalorder %s203_s13, 0  ;;  %p217_p2 = scmp.eq.s32.totalorder %s6022_s9, 1 }
   0x7   : > { %p222_p3 = scmp.ne.s32.totalorder %s5943_s28, %s5939_s27  ;;  %p223_p4 = scmp.eq.s32.totalorder %s4315_s10, 1 }
   0x8   : > { %s6037_s14 = scalar_select %p204_p1, %s5947_s29, %s206_s12  }
   0x9   : > { %p6039_p5 = por %p217_p2, %p216_p0  ;;  %p6043_p6 = por %p223_p4, %p222_p3 }
   0xa   : > { %p4318_p7 = scmp.ge.s32.totalorder %s5951_s30, 1  ;;  %p275_p8 = scmp.lt.s32.totalorder %s5951_s30, 3 }
   0xc   : > { %p276_p9 = pnand %p4318_p7, %p275_p8 }
   0xe   : > { %279 = sbr.rel (%p276_p9) target bundleno = 2837 (0xb15), region = 52 }
  0x15   : > { %v559_v0 = vld [vmem:[%s7719_s4] sm:$0xff]  ;;  %p314_p10 = scmp.lt.s32.totalorder %s6022_s9, 1  ;;  %vm365_vm0 = vcmask 64512   ;;  %s311_s24 = sand.u32 1, %s5943_s28  }
  0x16   : > { %v357_v1 = vld [vmem:[%s7717_s2] sm:$0xff]  ;;  %5002 = vmatprep.subr.mxu1 %v559_v0  ;;  %s4319_s26 = sshll.u32 %s311_s24, 9  ;;  %s4643_s13 = sshll.u32 %s6022_s9, 13 }
  0x17   : > { %4976 = vmatprep.subr.mxu0 %v357_v1  ;;  %5003 = vmatpush3.msra.mxu1 %v559_v0  ;;  %s315_s21 = scalar_select %p314_p10, %s6022_s9, 1  ;;  %v760_v34 = vld [vmem:[%s7721_s6] sm:$0xff] }
  0x18   : > { %4977 = vmatpush3.msra.mxu0 %v357_v1  ;;  %v6265_v35 = vld [vmem:[%s7720_s5] ss:$0 sm:$0xff]  ;;  %s7550_s10 = scalar_lea.vmem [#allocation2], %s4319_s26  ;;  %s7674_s9 = scalar_lea.sflag [#allocation3], %s311_s24 }
  0x19   : > { %s4641_s22 = sshll.u32 %s315_s21, 8  ;;  %5028 = vmatprep.subr.mxu0 %v760_v34  ;;  %v6272_v40 = vld [vmem:[%s7718_s3] ss:$0 sm:$0xff]  ;;  %s4241_s17 = sshll.u32 %s7550_s10, 4  ;;  %s7667_s17 = int_to_ptr.vmem [resolvable:$true] %s4241_s17 }
  0x1a   : > { %s6060_s25 = scalar_lea.vmem %s7716_s1, %s4641_s22  ;;  %s6078_s12 = scalar_lea.vmem %s7715_s0, %s4641_s22 }
  0x1b   : > { %v6063_v2 = vld [vmem:[%s6060_s25] sm:$0xff]  ;;  %v6066_v3 = vld [vmem:[%s6060_s25 + $0x8] sm:$0xff]  ;;  %v6069_v4 = vld [vmem:[%s6060_s25 + $0x10] sm:$0xff]  ;;  %s5889_s20 = scalar_lea.vmem %s7667_s17, 8192 }
  0x1c   : > { %5004 = vmatprep.mubr.msk.f32.mxu1 %vm365_vm0, %v6063_v2  ;;  %v6083_v5 = vld [vmem:[%s6060_s25 + $0x18] sm:$0xff]  ;;  %v6086_v6 = vld [vmem:[%s6060_s25 + $0x20] sm:$0xff]  ;;  %v6092_v8 = vld [vmem:[%s6078_s12 + $0x8] sm:$0xff]  ;;  %p5890_p11 = scmp.ne.s32.totalorder %s7667_s17, %s5889_s20 }
  0x1d   : > { %5005 = vmatmul.mubr.msk.f32.vlgmr.msra.gmra.mrb[0].mxu1 %vm365_vm0, %v6066_v3  ;;  %v6089_v7 = vld [vmem:[%s6078_s12] sm:$0xff]  ;;  %v6099_v9 = vld [vmem:[%s6078_s12 + $0x10] sm:$0xff]  ;;  %v6104_v10 = vld [vmem:[%s6060_s25 + $0x28] sm:$0xff] }
  0x1e   : > { %5007 = vmatprep.mubr.msk.f32.mxu1 %vm365_vm0, %v6069_v4  ;;  %4978 = vmatprep.mubr.msk.f32.mxu0 %vm365_vm0, %v6089_v7  ;;  %v6109_v11 = vld [vmem:[%s6060_s25 + $0x30] sm:$0xff]  ;;  %v6114_v12 = vld [vmem:[%s6078_s12 + $0x18] sm:$0xff]  ;;  %v6117_v13 = vld [vmem:[%s6078_s12 + $0x20] sm:$0xff]  ;;  %p5891_p12 = pnand %p5890_p11, %p6039_p5 }
  0x1f   : > { %4979 = vmatmul.mubr.msk.f32.vlgmr.msra.gmra.mrb[0].mxu0 %vm365_vm0, %v6092_v8  ;;  %v6124_v14 = vld [vmem:[%s6060_s25 + $0x38] sm:$0xff]  ;;  %v6129_v15 = vld [vmem:[%s6060_s25 + $0x40] sm:$0xff]  ;;  %v6134_v16 = vld [vmem:[%s6078_s12 + $0x28] sm:$0xff] }
  0x20   : > { %4981 = vmatprep.mubr.msk.f32.mxu0 %vm365_vm0, %v6099_v9  ;;  %v6137_v17 = vld [vmem:[%s6078_s12 + $0x30] sm:$0xff]  ;;  %v6144_v18 = vld [vmem:[%s6060_s25 + $0x48] sm:$0xff]  ;;  %v6154_v20 = vld [vmem:[%s6078_s12 + $0x38] sm:$0xff]  ;;  %5029 = vmatpush3.msra.mxu0 %v760_v34  ;;  %p5892_p13 = pneg %p5891_p12 }
  0x21   : > { %5008 = vmatmul.mubr.msk.f32.gmra.mrb[2].mxu1 %vm365_vm0, %v6083_v5  ;;  %v6149_v19 = vld [vmem:[%s6060_s25 + $0x50] sm:$0xff]  ;;  %v6157_v21 = vld [vmem:[%s6078_s12 + $0x40] sm:$0xff]  ;;  %v6164_v22 = vld [vmem:[%s6060_s25 + $0x58] sm:$0xff] }
  0x22   : > { %5010 = vmatprep.mubr.msk.f32.mxu1 %vm365_vm0, %v6086_v6  ;;  %v6169_v23 = vld [vmem:[%s6060_s25 + $0x60] sm:$0xff]  ;;  %v6174_v24 = vld [vmem:[%s6078_s12 + $0x48] sm:$0xff]  ;;  %v6177_v25 = vld [vmem:[%s6078_s12 + $0x50] sm:$0xff] }
  0x23   : > { %4982 = vmatmul.mubr.msk.f32.gmra.mrb[2].mxu0 %vm365_vm0, %v6114_v12  ;;  %v6184_v26 = vld [vmem:[%s6060_s25 + $0x68] sm:$0xff]  ;;  %v6189_v27 = vld [vmem:[%s6060_s25 + $0x70] sm:$0xff]  ;;  %v6194_v28 = vld [vmem:[%s6078_s12 + $0x58] sm:$0xff] }
  0x24   : > { %4984 = vmatprep.mubr.msk.f32.mxu0 %vm365_vm0, %v6117_v13  ;;  %v6197_v29 = vld [vmem:[%s6078_s12 + $0x60] sm:$0xff]  ;;  %v6204_v30 = vld [vmem:[%s6060_s25 + $0x78] sm:$0xff]  ;;  %v6211_v31 = vld [vmem:[%s6078_s12 + $0x68] sm:$0xff] }
  0x25   : > { %5011 = vmatmul.mubr.msk.f32.gmra.mrb[4].mxu1 %vm365_vm0, %v6104_v10  ;;  %7746 = vst [vmem:[#allocation5_spill] sm:$0xff] %v6204_v30  ;;  %v6214_v32 = vld [vmem:[%s6078_s12 + $0x70] sm:$0xff]  ;;  %v6223_v33 = vld [vmem:[%s6078_s12 + $0x78] sm:$0xff] }
  0x26   : > { %5013 = vmatprep.mubr.msk.f32.mxu1 %vm365_vm0, %v6109_v11 }
  0x27   : > { %4985 = vmatmul.mubr.msk.f32.gmra.mrb[4].mxu0 %vm365_vm0, %v6134_v16 }
  0x28   : > { %4987 = vmatprep.mubr.msk.f32.mxu0 %vm365_vm0, %v6137_v17 }
  0x29   : > { %5014 = vmatmul.mubr.msk.f32.gmra.mrb[6].mxu1 %vm365_vm0, %v6124_v14 }
  0x2a   : > { %5016 = vmatprep.mubr.msk.f32.mxu1 %vm365_vm0, %v6129_v15 }
  0x2b   : > { %4988 = vmatmul.mubr.msk.f32.gmra.mrb[6].mxu0 %vm365_vm0, %v6154_v20 }
  0x2c   : > { %4990 = vmatprep.mubr.msk.f32.mxu0 %vm365_vm0, %v6157_v21 }
  0x2d   : > { %5017 = vmatmul.mubr.msk.f32.gmra.mrb[8].mxu1 %vm365_vm0, %v6144_v18 }
  0x2e   : > { %5019 = vmatprep.mubr.msk.f32.mxu1 %vm365_vm0, %v6149_v19 }
  0x2f   : > { %4991 = vmatmul.mubr.msk.f32.gmra.mrb[8].mxu0 %vm365_vm0, %v6174_v24 }
  0x30   : > { %4993 = vmatprep.mubr.msk.f32.mxu0 %vm365_vm0, %v6177_v25 }
  0x31   : > { %5020 = vmatmul.mubr.msk.f32.gmra.mrb[10].mxu1 %vm365_vm0, %v6164_v22 }
  0x32   : > { %5022 = vmatprep.mubr.msk.f32.mxu1 %vm365_vm0, %v6169_v23 }
  0x33   : > { %4994 = vmatmul.mubr.msk.f32.gmra.mrb[10].mxu0 %vm365_vm0, %v6194_v28 }
  0x34   : > { %4996 = vmatprep.mubr.msk.f32.mxu0 %vm365_vm0, %v6197_v29 }
  0x35   : > { %5023 = vmatmul.mubr.msk.f32.gmra.mrb[12].mxu1 %vm365_vm0, %v6184_v26 }
  0x36   : > { %5025 = vmatprep.mubr.msk.f32.mxu1 %vm365_vm0, %v6189_v27 }
  0x37   : > { %4997 = vmatmul.mubr.msk.f32.gmra.mrb[12].mxu0 %vm365_vm0, %v6211_v31 }
  0x38   : > { %4999 = vmatprep.mubr.msk.f32.mxu0 %vm365_vm0, %v6214_v32 }
  0x39   : > { %5026 = vmatmul.mubr.msk.f32.gmra.mrb[14].mxu1 %vm365_vm0, %v6204_v30 }
  0x3b   : > { %5000 = vmatmul.mubr.msk.f32.gmra.mrb[14].mxu0 %vm365_vm0, %v6223_v33 }
  0x3c   : > { %5030 = vmatprep.mubr.msk.f32.mxu0 %vm365_vm0, %v6063_v2 }
  0x3f   : > { %5031 = vmatmul.mubr.msk.f32.vlgmr.msra.gmra.mrb[16].mxu0 %vm365_vm0, %v6066_v3 }
  0x40   : > { %5033 = vmatprep.mubr.msk.f32.mxu0 %vm365_vm0, %v6069_v4 }
  0x43   : > { %5034 = vmatmul.mubr.msk.f32.gmra.mrb[18].mxu0 %vm365_vm0, %v6083_v5 }
  0x44   : > { %5036 = vmatprep.mubr.msk.f32.mxu0 %vm365_vm0, %v6086_v6 }
  0x47   : > { %5037 = vmatmul.mubr.msk.f32.gmra.mrb[20].mxu0 %vm365_vm0, %v6104_v10 }
  0x48   : > { %5039 = vmatprep.mubr.msk.f32.mxu0 %vm365_vm0, %v6109_v11 }
  0x4b   : > { %5040 = vmatmul.mubr.msk.f32.gmra.mrb[22].mxu0 %vm365_vm0, %v6124_v14 }
  0x4c   : > { %5042 = vmatprep.mubr.msk.f32.mxu0 %vm365_vm0, %v6129_v15 }
  0x4f   : > { %5043 = vmatmul.mubr.msk.f32.gmra.mrb[24].mxu0 %vm365_vm0, %v6144_v18 }
  0x50   : > { %5045 = vmatprep.mubr.msk.f32.mxu0 %vm365_vm0, %v6149_v19 }
  0x53   : > { %5046 = vmatmul.mubr.msk.f32.gmra.mrb[26].mxu0 %vm365_vm0, %v6164_v22 }
  0x54   : > { %5048 = vmatprep.mubr.msk.f32.mxu0 %vm365_vm0, %v6169_v23 }
  0x57   : > { %5049 = vmatmul.mubr.msk.f32.gmra.mrb[28].mxu0 %vm365_vm0, %v6184_v26 }
  0x58   : > { %5051 = vmatprep.mubr.msk.f32.mxu0 %vm365_vm0, %v6189_v27 }
  0x5b   : > { %5052 = vmatmul.mubr.msk.f32.gmra.mrb[30].mxu0 %vm365_vm0, %v6204_v30 }
  0xf0   : > { %v5006_v36 = vpop.f32.mrb[0].mxu1 }
  0xf1   : > { %v687_v37 = vadd.f32 %v5006_v36, %v6265_v35  ;;  %v681_v38 = vpop.f32.mrb[1].mxu1 }
  0xf2   : > { %v682_v39 = vadd.f32 %v6265_v35, %v681_v38  ;;  %v4980_v45 = vpop.f32.mrb[0].mxu0 }
  0xf3   : > { %v486_v48 = vadd.f32 %v4980_v45, %v6272_v40  ;;  %v480_v49 = vpop.f32.mrb[1].mxu0 }
  0xf4   : > { %v921_v41 = vpack.c.bf16 %v687_v37, %v682_v39  ;;  %v5009_v42 = vpop.f32.mrb[2].mxu1  ;;  %v481_v50 = vadd.f32 %v6272_v40, %v480_v49 }
  0xf5   : > { %v697_v43 = vadd.f32 %v5009_v42, %v6265_v35  ;;  %v691_v44 = vpop.f32.mrb[3].mxu1 }
  0xf6   : > { %5544 = vmatprep.subr.msk.bf16.mxu1 %vm365_vm0, %v921_v41  ;;  %v954_v46 = vsel %vm365_vm0, %v921_v41, 0  ;;  %v692_v47 = vadd.f32 %v6265_v35, %v691_v44  ;;  %v913_v55 = vpack.c.bf16 %v486_v48, %v481_v50  ;;  %v4983_v56 = vpop.f32.mrb[2].mxu0 }
  0xf7   : > { %5055 = vmatpush3.bf16.xpose.msra.mxu1 %v954_v46  ;;  %v6284_v58 = vadd.f32 %v4983_v56, %v6272_v40  ;;  %v490_v59 = vpop.f32.mrb[3].mxu0 }
  0xf8   : > { %v922_v51 = vpack.c.bf16 %v697_v43, %v692_v47  ;;  %v5012_v52 = vpop.f32.mrb[4].mxu1  ;;  %v6287_v60 = vadd.f32 %v6272_v40, %v490_v59  ;;  %5070 = vmatprep.mubr.msk.bf16.mxu1 %vm365_vm0, %v913_v55 }
  0xf9   : > { %v707_v53 = vadd.f32 %v5012_v52, %v6265_v35  ;;  %v701_v54 = vpop.f32.mrb[5].mxu1 }
  0xfa   : > { %5545 = vmatprep.subr.msk.bf16.mxu1 %vm365_vm0, %v922_v51  ;;  %v702_v57 = vadd.f32 %v6265_v35, %v701_v54  ;;  %v957_v61 = vsel %vm365_vm0, %v922_v51, 0  ;;  %v914_v34 = vpack.c.bf16 %v6284_v58, %v6287_v60  ;;  %v4986_v36 = vpop.f32.mrb[4].mxu0  ;;  %v6351_v60 = vld [vmem:[%s7722_s7] ss:$0 sm:$0xff] }
  0xfb   : > { %v6296_v38 = vadd.f32 %v4986_v36, %v6272_v40  ;;  %v500_v39 = vpop.f32.mrb[5].mxu0 }
  0xfc   : > { %v923_v62 = vpack.c.bf16 %v707_v53, %v702_v57  ;;  %v5015_v63 = vpop.f32.mrb[6].mxu1  ;;  %v6299_v41 = vadd.f32 %v6272_v40, %v500_v39 }
  0xfd   : > { %v717_v0 = vadd.f32 %v5015_v63, %v6265_v35  ;;  %v711_v1 = vpop.f32.mrb[7].mxu1 }
  0xfe   : > { %v712_v37 = vadd.f32 %v6265_v35, %v711_v1  ;;  %v915_v46 = vpack.c.bf16 %v6296_v38, %v6299_v41  ;;  %v4989_v47 = vpop.f32.mrb[6].mxu0  ;;  %v960_v52 = vsel %vm365_vm0, %v923_v62, 0 }
  0xff   : > { %5057 = vmatpush3.bf16.xpose.msra.mxu1 %v957_v61  ;;  %v516_v49 = vadd.f32 %v4989_v47, %v6272_v40  ;;  %v510_v50 = vpop.f32.mrb[7].mxu0 }
 0x100   : > { %5546 = vmatprep.subr.msk.bf16.mxu1 %vm365_vm0, %v923_v62  ;;  %v924_v42 = vpack.c.bf16 %v717_v0, %v712_v37  ;;  %v5018_v43 = vpop.f32.mrb[8].mxu1  ;;  %v511_v51 = vadd.f32 %v6272_v40, %v510_v50 }
 0x101   : > { %v727_v44 = vadd.f32 %v5018_v43, %v6265_v35  ;;  %v721_v45 = vpop.f32.mrb[9].mxu1 }
 0x102   : > { %v722_v48 = vadd.f32 %v6265_v35, %v721_v45  ;;  %v916_v57 = vpack.c.bf16 %v516_v49, %v511_v51  ;;  %v4992_v59 = vpop.f32.mrb[8].mxu0 }
 0x103   : > { %v526_v63 = vadd.f32 %v4992_v59, %v6272_v40  ;;  %v520_v0 = vpop.f32.mrb[9].mxu0 }
 0x104   : > { %v925_v53 = vpack.c.bf16 %v727_v44, %v722_v48  ;;  %v5021_v54 = vpop.f32.mrb[10].mxu1  ;;  %v521_v1 = vadd.f32 %v6272_v40, %v520_v0  ;;  %v963_v48 = vsel %vm365_vm0, %v924_v42, 0 }
 0x105   : > { %v737_v55 = vadd.f32 %v5021_v54, %v6265_v35  ;;  %v731_v56 = vpop.f32.mrb[11].mxu1 }
 0x106   : > { %v732_v61 = vadd.f32 %v6265_v35, %v731_v56  ;;  %v917_v39 = vpack.c.bf16 %v526_v63, %v521_v1  ;;  %v4995_v41 = vpop.f32.mrb[10].mxu0 }
 0x107   : > { %5059 = vmatpush3.bf16.xpose.msra.mxu1 %v960_v52  ;;  %v536_v44 = vadd.f32 %v4995_v41, %v6272_v40  ;;  %v530_v45 = vpop.f32.mrb[11].mxu0  ;;  %v966_v41 = vsel %vm365_vm0, %v925_v53, 0 }
 0x108   : > { %5547 = vmatprep.subr.msk.bf16.mxu1 %vm365_vm0, %v924_v42  ;;  %v926_v36 = vpack.c.bf16 %v737_v55, %v732_v61  ;;  %v5024_v37 = vpop.f32.mrb[12].mxu1  ;;  %v531_v47 = vadd.f32 %v6272_v40, %v530_v45 }
 0x109   : > { %v747_v62 = vadd.f32 %v5024_v37, %v6265_v35  ;;  %v741_v38 = vpop.f32.mrb[13].mxu1 }
 0x10a   : > { %v742_v43 = vadd.f32 %v6265_v35, %v741_v38  ;;  %v918_v54 = vpack.c.bf16 %v536_v44, %v531_v47  ;;  %v4998_v55 = vpop.f32.mrb[12].mxu0 }
 0x10b   : > { %v546_v59 = vadd.f32 %v4998_v55, %v6272_v40  ;;  %v540_v61 = vpop.f32.mrb[13].mxu0 }
 0x10c   : > { %v927_v49 = vpack.c.bf16 %v747_v62, %v742_v43  ;;  %v5027_v50 = vpop.f32.mrb[14].mxu1  ;;  %v541_v63 = vadd.f32 %v6272_v40, %v540_v61 }
 0x10d   : > { %v757_v51 = vadd.f32 %v5027_v50, %v6265_v35  ;;  %v751_v52 = vpop.f32.mrb[15].mxu1 }
 0x10e   : > { %v752_v56 = vadd.f32 %v6265_v35, %v751_v52  ;;  %v919_v1 = vpack.c.bf16 %v546_v59, %v541_v63  ;;  %v5001_v42 = vpop.f32.mrb[14].mxu0  ;;  %v969_v35 = vsel %vm365_vm0, %v926_v36, 0  ;;  %v972_v44 = vsel %vm365_vm0, %v927_v49, 0 }
 0x10f   : > { %5061 = vmatpush3.bf16.xpose.msra.mxu1 %v963_v48  ;;  %v556_v37 = vadd.f32 %v5001_v42, %v6272_v40  ;;  %v550_v62 = vpop.f32.mrb[15].mxu0 }
 0x110   : > { %5548 = vmatprep.subr.msk.bf16.mxu1 %vm365_vm0, %v925_v53  ;;  %v928_v0 = vpack.c.bf16 %v757_v51, %v752_v56  ;;  %v551_v38 = vadd.f32 %v6272_v40, %v550_v62  ;;  %v4402_v40 = vld [vmem:[%s7719_s4 + $0x8] sm:$0xff] }
 0x112   : > { %v920_v43 = vpack.c.bf16 %v556_v37, %v551_v38  ;;  %v975_v45 = vsel %vm365_vm0, %v928_v0, 0  ;;  %v5032_v58 = vpop.f32.mrb[16].mxu0 }
 0x117   : > { %5063 = vmatpush3.bf16.xpose.msra.mxu1 %v966_v41 }
 0x118   : > { %5549 = vmatprep.subr.msk.bf16.mxu1 %vm365_vm0, %v926_v36 }
 0x11f   : > { %5065 = vmatpush3.bf16.xpose.msra.mxu1 %v969_v35 }
 0x120   : > { %5550 = vmatprep.subr.msk.bf16.mxu1 %vm365_vm0, %v927_v49 }
 0x127   : > { %5067 = vmatpush3.bf16.xpose.msra.mxu1 %v972_v44 }
 0x128   : > { %5551 = vmatprep.subr.msk.bf16.mxu1 %vm365_vm0, %v928_v0 }
 0x12f   : > { %5069 = vmatpush3.bf16.xpose.msra.mxu1 %v975_v45 }
 0x130   : > { %5144 = vmatprep.subr.mxu1 %v4402_v40 }
 0x136   : > { %5071 = vmatmul.mubr.msk.bf16.vlgmr.msra.gmra.mrb[16].mxu1 %vm365_vm0, %v914_v34  ;;  %v840_v34 = vadd.f32 %v5032_v58, %v6351_v60 }
 0x137   : > { %5074 = vmatprep.mubr.msk.bf16.mxu1 %vm365_vm0, %v915_v46  ;;  %v834_v46 = vpop.f32.mrb[17].mxu0  ;;  %5145 = vmatpush3.msra.mxu1 %v4402_v40 }
 0x138   : > { %v835_v53 = vadd.f32 %v6351_v60, %v834_v46 }
 0x13a   : > { %v1194_v47 = vpack.c.bf16 %v840_v34, %v835_v53 }
 0x13c   : > { %5086 = vmatprep.subr.bf16.mxu0 %v1194_v47 }
 0x13d   : > { %5087 = vmatpush3.bf16.msra.mxu0 %v1194_v47 }
 0x13e   : > { %5075 = vmatmul.mubr.msk.bf16.gmra.mrb[20].mxu1 %vm365_vm0, %v916_v57  ;;  %v5035_v57 = vpop.f32.mrb[18].mxu0 }
 0x13f   : > { %5078 = vmatprep.mubr.msk.bf16.mxu1 %vm365_vm0, %v917_v39  ;;  %v850_v36 = vadd.f32 %v5035_v57, %v6351_v60  ;;  %v844_v39 = vpop.f32.mrb[19].mxu0 }
 0x140   : > { %v845_v48 = vadd.f32 %v6351_v60, %v844_v39  ;;  %v5038_v49 = vpop.f32.mrb[20].mxu0 }
 0x141   : > { %v860_v50 = vadd.f32 %v5038_v49, %v6351_v60  ;;  %v854_v51 = vpop.f32.mrb[21].mxu0 }
 0x142   : > { %v1195_v52 = vpack.c.bf16 %v850_v36, %v845_v48  ;;  %v5041_v55 = vpop.f32.mrb[22].mxu0 }
 0x143   : > { %v870_v59 = vadd.f32 %v5041_v55, %v6351_v60  ;;  %v864_v61 = vpop.f32.mrb[23].mxu0 }
 0x144   : > { %5088 = vmatprep.subr.bf16.mxu0 %v1195_v52  ;;  %v865_v63 = vadd.f32 %v6351_v60, %v864_v61 }
 0x145   : > { %5089 = vmatpush3.bf16.msra.mxu0 %v1195_v52 }
 0x146   : > { %5079 = vmatmul.mubr.msk.bf16.gmra.mrb[24].mxu1 %vm365_vm0, %v918_v54  ;;  %v855_v54 = vadd.f32 %v6351_v60, %v854_v51  ;;  %v1197_v0 = vpack.c.bf16 %v870_v59, %v865_v63 }
 0x147   : > { %5082 = vmatprep.mubr.msk.bf16.mxu1 %vm365_vm0, %v919_v1  ;;  %v5044_v1 = vpop.f32.mrb[24].mxu0 }
 0x148   : > { %v1196_v56 = vpack.c.bf16 %v860_v50, %v855_v54  ;;  %v880_v45 = vadd.f32 %v5044_v1, %v6351_v60  ;;  %v874_v58 = vpop.f32.mrb[25].mxu0 }
 0x149   : > { %v875_v46 = vadd.f32 %v6351_v60, %v874_v58  ;;  %v5047_v39 = vpop.f32.mrb[26].mxu0 }
 0x14a   : > { %5090 = vmatprep.subr.bf16.mxu0 %v1196_v56  ;;  %v890_v47 = vadd.f32 %v5047_v39, %v6351_v60  ;;  %v884_v48 = vpop.f32.mrb[27].mxu0  ;;  %v6450_v39 = vld [vmem:[%s7717_s2 + $0x8] sm:$0xff] }
 0x14b   : > { %5091 = vmatpush3.bf16.msra.mxu0 %v1196_v56  ;;  %v1198_v36 = vpack.c.bf16 %v880_v45, %v875_v46  ;;  %v885_v49 = vadd.f32 %v6351_v60, %v884_v48  ;;  %v5050_v51 = vpop.f32.mrb[28].mxu0 }
 0x14c   : > { %5092 = vmatprep.subr.bf16.mxu0 %v1197_v0  ;;  %v900_v54 = vadd.f32 %v5050_v51, %v6351_v60  ;;  %v894_v55 = vpop.f32.mrb[29].mxu0 }
 0x14d   : > { %v1199_v50 = vpack.c.bf16 %v890_v47, %v885_v49  ;;  %v895_v59 = vadd.f32 %v6351_v60, %v894_v55  ;;  %v5053_v1 = vpop.f32.mrb[30].mxu0 }
 0x14e   : > { %5083 = vmatmul.mubr.msk.bf16.gmra.mrb[28].mxu1 %vm365_vm0, %v920_v43  ;;  %v904_v45 = vpop.f32.mrb[31].mxu0  ;;  %v910_v58 = vadd.f32 %v5053_v1, %v6351_v60 }
 0x14f   : > { %5146 = vmatprep.mubr.msk.f32.mxu1 %vm365_vm0, %v6063_v2  ;;  %5093 = vmatpush3.bf16.msra.mxu0 %v1197_v0  ;;  %v1200_v0 = vpack.c.bf16 %v900_v54, %v895_v59  ;;  %v905_v46 = vadd.f32 %v6351_v60, %v904_v45  ;;  %v6456_v60 = vld [vmem:[%s7720_s5 + $0x1] ss:$0 sm:$0xff] }
 0x150   : > { %5094 = vmatprep.subr.bf16.mxu0 %v1198_v36 }
 0x153   : > { %5095 = vmatpush3.bf16.msra.mxu0 %v1198_v36  ;;  %v1201_v36 = vpack.c.bf16 %v910_v58, %v905_v46 }
 0x154   : > { %5096 = vmatprep.subr.bf16.mxu0 %v1199_v50 }
 0x156   : > { %5147 = vmatmul.mubr.msk.f32.vlgmr.msra.gmra.mrb[32].mxu1 %vm365_vm0, %v6066_v3 }
 0x157   : > { %5149 = vmatprep.mubr.msk.f32.mxu1 %vm365_vm0, %v6069_v4  ;;  %5097 = vmatpush3.bf16.msra.mxu0 %v1199_v50 }
 0x158   : > { %5098 = vmatprep.subr.bf16.mxu0 %v1200_v0 }
 0x15a   : > { %5150 = vmatmul.mubr.msk.f32.gmra.mrb[34].mxu1 %vm365_vm0, %v6083_v5 }
 0x15b   : > { %5152 = vmatprep.mubr.msk.f32.mxu1 %vm365_vm0, %v6086_v6  ;;  %5099 = vmatpush3.bf16.msra.mxu0 %v1200_v0 }
 0x15c   : > { %5100 = vmatprep.subr.bf16.mxu0 %v1201_v36 }
 0x15e   : > { %5153 = vmatmul.mubr.msk.f32.gmra.mrb[36].mxu1 %vm365_vm0, %v6104_v10 }
 0x15f   : > { %5155 = vmatprep.mubr.msk.f32.mxu1 %vm365_vm0, %v6109_v11  ;;  %5101 = vmatpush3.bf16.msra.mxu0 %v1201_v36 }
 0x160   : > { %5118 = vmatprep.subr.mxu0 %v6450_v39 }
 0x162   : > { %5156 = vmatmul.mubr.msk.f32.gmra.mrb[38].mxu1 %vm365_vm0, %v6124_v14 }
 0x163   : > { %5158 = vmatprep.mubr.msk.f32.mxu1 %vm365_vm0, %v6129_v15 }
 0x166   : > { %5159 = vmatmul.mubr.msk.f32.gmra.mrb[40].mxu1 %vm365_vm0, %v6144_v18 }
 0x167   : > { %5161 = vmatprep.mubr.msk.f32.mxu1 %vm365_vm0, %v6149_v19 }
 0x16a   : > { %5162 = vmatmul.mubr.msk.f32.gmra.mrb[42].mxu1 %vm365_vm0, %v6164_v22 }
 0x16b   : > { %5164 = vmatprep.mubr.msk.f32.mxu1 %vm365_vm0, %v6169_v23 }
 0x16e   : > { %5165 = vmatmul.mubr.msk.f32.gmra.mrb[44].mxu1 %vm365_vm0, %v6184_v26 }
 0x16f   : > { %5167 = vmatprep.mubr.msk.f32.mxu1 %vm365_vm0, %v6189_v27 }
 0x172   : > { %5168 = vmatmul.mubr.msk.f32.gmra.mrb[46].mxu1 %vm365_vm0, %v6204_v30 }
 0x209   : > { %v6391_v42 = vpop.f32.mrb[16].mxu1 }
 0x20a   : > { %1078 = vmax.xlane.f32.xlu1 %v6391_v42  ;;  %v6394_v37 = vpop.f32.mrb[17].mxu1 }
 0x20b   : > { %1074 = vmax.xlane.f32.xlu0 %v6394_v37  ;;  %v6397_v62 = vpop.f32.mrb[18].mxu1 }
 0x20c   : > { %v6399_v38 = vpop.f32.mrb[19].mxu1 }
 0x20e   : > { %1080 = vmax.xlane.f32.xlu1 %v6397_v62 }
 0x20f   : > { %1076 = vmax.xlane.f32.xlu0 %v6399_v38 }
 0x211   : > { %v6403_v41 = vpop.f32.mrb[20].mxu1 }
 0x212   : > { %v6405_v43 = vpop.f32.mrb[21].mxu1 }
 0x213   : > { %1082 = vmax.xlane.f32.xlu0 %v6405_v43  ;;  %v6408_v35 = vpop.f32.mrb[22].mxu1 }
 0x214   : > { %v6410_v44 = vpop.f32.mrb[23].mxu1 }
 0x215   : > { %1084 = vmax.xlane.f32.xlu1 %v6410_v44 }
 0x217   : > { %1086 = vmax.xlane.f32.xlu0 %v6403_v41 }
 0x219   : > { %1088 = vmax.xlane.f32.xlu1 %v6408_v35  ;;  %v6416_v40 = vpop.f32.mrb[24].mxu1 }
 0x21a   : > { %v6418_v34 = vpop.f32.mrb[25].mxu1 }
 0x21b   : > { %1090 = vmax.xlane.f32.xlu0 %v6418_v34  ;;  %v6422_v53 = vpop.f32.mrb[26].mxu1 }
 0x21c   : > { %v6424_v57 = vpop.f32.mrb[27].mxu1 }
 0x21d   : > { %1092 = vmax.xlane.f32.xlu1 %v6424_v57 }
 0x21f   : > { %1094 = vmax.xlane.f32.xlu0 %v6416_v40 }
 0x221   : > { %1096 = vmax.xlane.f32.xlu1 %v6422_v53  ;;  %v6431_v52 = vpop.f32.mrb[28].mxu1 }
 0x222   : > { %v6434_v56 = vpop.f32.mrb[29].mxu1 }
 0x223   : > { %1098 = vmax.xlane.f32.xlu0 %v6434_v56  ;;  %v6438_v61 = vpop.f32.mrb[30].mxu1 }
 0x224   : > { %v6440_v63 = vpop.f32.mrb[31].mxu1 }
 0x225   : > { %1100 = vmax.xlane.f32.xlu1 %v6440_v63 }
 0x227   : > { %1102 = vmax.xlane.f32.xlu0 %v6431_v52 }
 0x229   : > { %1104 = vmax.xlane.f32.xlu1 %v6438_v61  ;;  %v5148_v47 = vpop.f32.mrb[32].mxu1 }
 0x22a   : > { %v1600_v48 = vadd.f32 %v5148_v47, %v6456_v60  ;;  %v1594_v49 = vpop.f32.mrb[33].mxu1 }
 0x22b   : > { %v1595_v50 = vadd.f32 %v6456_v60, %v1594_v49 }
 0x22d   : > { %v1836_v51 = vpack.c.bf16 %v1600_v48, %v1595_v50  ;;  %v5151_v54 = vpop.f32.mrb[34].mxu1 }
 0x22e   : > { %v1610_v55 = vadd.f32 %v5151_v54, %v6456_v60  ;;  %v1604_v59 = vpop.f32.mrb[35].mxu1 }
 0x22f   : > { %5552 = vmatprep.subr.msk.bf16.mxu1 %vm365_vm0, %v1836_v51  ;;  %v1869_v0 = vsel %vm365_vm0, %v1836_v51, 0  ;;  %v1605_v1 = vadd.f32 %v6456_v60, %v1604_v59 }
 0x230   : > { %5197 = vmatpush3.bf16.xpose.msra.mxu1 %v1869_v0 }
 0x231   : > { %v1837_v45 = vpack.c.bf16 %v1610_v55, %v1605_v1  ;;  %v5154_v58 = vpop.f32.mrb[36].mxu1 }
 0x232   : > { %v1620_v46 = vadd.f32 %v5154_v58, %v6456_v60  ;;  %v1614_v36 = vpop.f32.mrb[37].mxu1 }
 0x233   : > { %5553 = vmatprep.subr.msk.bf16.mxu1 %vm365_vm0, %v1837_v45  ;;  %v1615_v47 = vadd.f32 %v6456_v60, %v1614_v36  ;;  %v1872_v48 = vsel %vm365_vm0, %v1837_v45, 0 }
 0x235   : > { %v1838_v49 = vpack.c.bf16 %v1620_v46, %v1615_v47  ;;  %v5157_v50 = vpop.f32.mrb[38].mxu1 }
 0x236   : > { %v1630_v54 = vadd.f32 %v5157_v50, %v6456_v60  ;;  %v1624_v30 = vpop.f32.mrb[39].mxu1 }
 0x237   : > { %v1625_v51 = vadd.f32 %v6456_v60, %v1624_v30  ;;  %v1875_v59 = vsel %vm365_vm0, %v1838_v49, 0 }
 0x238   : > { %5199 = vmatpush3.bf16.xpose.msra.mxu1 %v1872_v48 }
 0x239   : > { %5554 = vmatprep.subr.msk.bf16.mxu1 %vm365_vm0, %v1838_v49  ;;  %v6471_v55 = vpack.c.bf16 %v1630_v54, %v1625_v51 }
 0x240   : > { %5201 = vmatpush3.bf16.xpose.msra.mxu1 %v1875_v59 }
 0x241   : > { %5555 = vmatprep.subr.msk.bf16.mxu1 %vm365_vm0, %v6471_v55 }
 0x297   : > { %v1079_v0 = vpop.xlane.xlu1 %1078 }
 0x298   : > { %v1075_v1 = vpop.xlane.xlu0 %1074  ;;  %v1108_v58 = vsub.f32 %v6391_v42, %v1079_v0 }
 0x299   : > { %v1106_v45 = vsub.f32 %v6394_v37, %v1075_v1 }
 0x29a   : > { %v1126_v50 = vmul.f32 1.442695, %v1108_v58 }
 0x29b   : > { %v1122_v46 = vmul.f32 1.442695, %v1106_v45  ;;  %v1081_v36 = vpop.xlane.xlu1 %1080 }
 0x29c   : > { %v1109_v30 = vsub.f32 %v6397_v62, %v1081_v36  ;;  %v1077_v47 = vpop.xlane.xlu0 %1076 }
 0x29d   : > { %v1107_v48 = vsub.f32 %v6399_v38, %v1077_v47  ;;  %5617 = vpow2.f32 %v1122_v46 }
 0x29e   : > { %v1128_v54 = vmul.f32 1.442695, %v1109_v30 }
 0x29f   : > { %v1124_v49 = vmul.f32 1.442695, %v1107_v48 }
 0x2a0   : > { %5619 = vpow2.f32 %v1128_v54  ;;  %v1083_v51 = vpop.xlane.xlu0 %1082 }
 0x2a1   : > { %5621 = vpow2.f32 %v1124_v49  ;;  %v1110_v59 = vsub.f32 %v6405_v43, %v1083_v51 }
 0x2a2   : > { %5623 = vpow2.f32 %v1126_v50  ;;  %v1085_v37 = vpop.xlane.xlu1 %1084 }
 0x2a3   : > { %v1130_v1 = vmul.f32 1.442695, %v1110_v59  ;;  %v1111_v42 = vsub.f32 %v6410_v44, %v1085_v37 }
 0x2a4   : > { %v1087_v0 = vpop.xlane.xlu0 %1086 }
 0x2a5   : > { %v1132_v45 = vmul.f32 1.442695, %v1111_v42  ;;  %v1112_v62 = vsub.f32 %v6403_v41, %v1087_v0  ;;  %5625 = vpow2.f32 %v1130_v1 }
 0x2a6   : > { %v1089_v38 = vpop.xlane.xlu1 %1088 }
 0x2a7   : > { %5627 = vpow2.f32 %v1132_v45  ;;  %v1134_v58 = vmul.f32 1.442695, %v1112_v62  ;;  %v1113_v46 = vsub.f32 %v6408_v35, %v1089_v38  ;;  %v6484_v30 = vpop.eup %5617 }
 0x2a8   : > { %v1091_v36 = vpop.xlane.xlu0 %1090 }
 0x2a9   : > { %v1136_v47 = vmul.f32 1.442695, %v1113_v46  ;;  %v1114_v43 = vsub.f32 %v6418_v34, %v1091_v36  ;;  %5629 = vpow2.f32 %v1134_v58 }
 0x2aa   : > { %v6487_v48 = vpop.eup %5619  ;;  %v1093_v44 = vpop.xlane.xlu1 %1092 }
 0x2ab   : > { %v6489_v50 = vpop.eup %5621  ;;  %5631 = vpow2.f32 %v1136_v47  ;;  %v1138_v41 = vmul.f32 1.442695, %v1114_v43  ;;  %v1115_v54 = vsub.f32 %v6424_v57, %v1093_v44 }
 0x2ac   : > { %v6492_v49 = vpop.eup %5623  ;;  %v1095_v51 = vpop.xlane.xlu0 %1094  ;;  %v1186_v35 = vpack.c.bf16 %v6489_v50, %v6484_v30 }
 0x2ad   : > { %v1140_v59 = vmul.f32 1.442695, %v1115_v54  ;;  %v1116_v37 = vsub.f32 %v6416_v40, %v1095_v51  ;;  %v1187_v34 = vpack.c.bf16 %v6487_v48, %v6492_v49  ;;  %5633 = vpow2.f32 %v1138_v41 }
 0x2ae   : > { %5102 = vmatprep.mubr.bf16.mxu0 %v1186_v35  ;;  %v1097_v1 = vpop.xlane.xlu1 %1096 }
 0x2af   : > { %5635 = vpow2.f32 %v1140_v59  ;;  %v1142_v42 = vmul.f32 1.442695, %v1116_v37  ;;  %v1117_v0 = vsub.f32 %v6422_v53, %v1097_v1  ;;  %5103 = vmatmul.mubr.bf16.vlgmr.msra.gmra.mrb[32].mxu0 %v1187_v34  ;;  %v6500_v57 = vpop.eup %5625 }
 0x2b0   : > { %5119 = vmatpush3.msra.mxu0 %v6450_v39  ;;  %v1099_v45 = vpop.xlane.xlu0 %1098 }
 0x2b1   : > { %v6503_v62 = vpop.eup %5627  ;;  %v1144_v38 = vmul.f32 1.442695, %v1117_v0  ;;  %v1118_v40 = vsub.f32 %v6434_v56, %v1099_v45  ;;  %5637 = vpow2.f32 %v1142_v42 }
 0x2b2   : > { %v1101_v58 = vpop.xlane.xlu1 %1100  ;;  %v1188_v46 = vpack.c.bf16 %v6503_v62, %v6500_v57 }
 0x2b3   : > { %5639 = vpow2.f32 %v1144_v38  ;;  %v1146_v36 = vmul.f32 1.442695, %v1118_v40  ;;  %v1119_v53 = vsub.f32 %v6440_v63, %v1101_v58  ;;  %v6509_v47 = vpop.eup %5629 }
 0x2b4   : > { %5106 = vmatprep.mubr.bf16.mxu0 %v1188_v46  ;;  %v1103_v43 = vpop.xlane.xlu0 %1102 }
 0x2b5   : > { %v6511_v39 = vpop.eup %5631  ;;  %v1148_v44 = vmul.f32 1.442695, %v1119_v53  ;;  %v1120_v41 = vsub.f32 %v6431_v52, %v1103_v43  ;;  %5641 = vpow2.f32 %v1146_v36 }
 0x2b6   : > { %v1105_v56 = vpop.xlane.xlu1 %1104  ;;  %v1189_v54 = vpack.c.bf16 %v6511_v39, %v6509_v47 }
 0x2b7   : > { %5643 = vpow2.f32 %v1148_v44  ;;  %v1150_v51 = vmul.f32 1.442695, %v1120_v41  ;;  %v1121_v35 = vsub.f32 %v6438_v61, %v1105_v56  ;;  %v6517_v59 = vpop.eup %5633 }
 0x2b8   : > { %5107 = vmatmul.mubr.bf16.gmra.mrb[36].mxu0 %v1189_v54  ;;  %v4421_v54 = vld [vmem:[%s7721_s6 + $0x8] sm:$0xff] }
 0x2b9   : > { %v6519_v63 = vpop.eup %5635  ;;  %v1152_v37 = vmul.f32 1.442695, %v1121_v35  ;;  %5645 = vpow2.f32 %v1150_v51  ;;  %5170 = vmatprep.subr.mxu0 %v4421_v54 }
 0x2ba   : > { %v1190_v34 = vpack.c.bf16 %v6519_v63, %v6517_v59 }
 0x2bb   : > { %5647 = vpow2.f32 %v1152_v37  ;;  %v6523_v52 = vpop.eup %5637  ;;  %v4385_v37 = vld [vmem:[%s7718_s3 + $0x1] ss:$0 sm:$0xff] }
 0x2bc   : > { %5110 = vmatprep.mubr.bf16.mxu0 %v1190_v34 }
 0x2bd   : > { %v6525_v1 = vpop.eup %5639 }
 0x2be   : > { %v1191_v42 = vpack.c.bf16 %v6525_v1, %v6523_v52 }
 0x2bf   : > { %v6529_v61 = vpop.eup %5641 }
 0x2c0   : > { %5111 = vmatmul.mubr.bf16.gmra.mrb[40].mxu0 %v1191_v42 }
 0x2c1   : > { %v6531_v0 = vpop.eup %5643 }
 0x2c2   : > { %7747 = vst [vmem:[#allocation6_spill] sm:$0xff] %v6531_v0  ;;  %v1192_v45 = vpack.c.bf16 %v6531_v0, %v6529_v61 }
 0x2c3   : > { %v6535_v38 = vpop.eup %5645 }
 0x2c4   : > { %7748 = vst [vmem:[#allocation7_spill] sm:$0xff] %v6535_v38  ;;  %5114 = vmatprep.mubr.bf16.mxu0 %v1192_v45 }
 0x2c5   : > { %v6537_v40 = vpop.eup %5647 }
 0x2c6   : > { %7749 = vst [vmem:[#allocation8_spill] sm:$0xff] %v6537_v40  ;;  %v1193_v58 = vpack.c.bf16 %v6537_v40, %v6535_v38 }
 0x2c8   : > { %5115 = vmatmul.mubr.bf16.gmra.mrb[44].mxu0 %v1193_v58 }
 0x2c9   : > { %5120 = vmatprep.mubr.msk.f32.mxu0 %vm365_vm0, %v6089_v7  ;;  %v1878_v7 = vsel %vm365_vm0, %v6471_v55, 0 }
 0x2ca   : > { %5203 = vmatpush3.bf16.xpose.msra.mxu1 %v1878_v7 }
 0x2d0   : > { %5121 = vmatmul.mubr.msk.f32.vlgmr.msra.gmra.mrb[48].mxu0 %vm365_vm0, %v6092_v8  ;;  %v5160_v8 = vpop.f32.mrb[40].mxu1 }
 0x2d1   : > { %5123 = vmatprep.mubr.msk.f32.mxu0 %vm365_vm0, %v6099_v9  ;;  %v1640_v9 = vadd.f32 %v5160_v8, %v6456_v60  ;;  %5171 = vmatpush3.msra.mxu0 %v4421_v54 }
 0x2d4   : > { %5124 = vmatmul.mubr.msk.f32.gmra.mrb[50].mxu0 %vm365_vm0, %v6114_v12  ;;  %v1634_v12 = vpop.f32.mrb[41].mxu1 }
 0x2d5   : > { %5126 = vmatprep.mubr.msk.f32.mxu0 %vm365_vm0, %v6117_v13  ;;  %v1635_v13 = vadd.f32 %v6456_v60, %v1634_v12 }
 0x2d8   : > { %5127 = vmatmul.mubr.msk.f32.gmra.mrb[52].mxu0 %vm365_vm0, %v6134_v16  ;;  %v1840_v16 = vpack.c.bf16 %v1640_v9, %v1635_v13 }
 0x2d9   : > { %5129 = vmatprep.mubr.msk.f32.mxu0 %vm365_vm0, %v6137_v17 }
 0x2da   : > { %5556 = vmatprep.subr.msk.bf16.mxu1 %vm365_vm0, %v1840_v16  ;;  %v1881_v17 = vsel %vm365_vm0, %v1840_v16, 0 }
 0x2db   : > { %5205 = vmatpush3.bf16.xpose.msra.mxu1 %v1881_v17 }
 0x2dc   : > { %5130 = vmatmul.mubr.msk.f32.gmra.mrb[54].mxu0 %vm365_vm0, %v6154_v20  ;;  %v5163_v20 = vpop.f32.mrb[42].mxu1 }
 0x2dd   : > { %5132 = vmatprep.mubr.msk.f32.mxu0 %vm365_vm0, %v6157_v21  ;;  %v1650_v21 = vadd.f32 %v5163_v20, %v6456_v60 }
 0x2e0   : > { %5133 = vmatmul.mubr.msk.f32.gmra.mrb[56].mxu0 %vm365_vm0, %v6174_v24 }
 0x2e1   : > { %5135 = vmatprep.mubr.msk.f32.mxu0 %vm365_vm0, %v6177_v25 }
 0x2e4   : > { %5136 = vmatmul.mubr.msk.f32.gmra.mrb[58].mxu0 %vm365_vm0, %v6194_v28 }
 0x2e5   : > { %5138 = vmatprep.mubr.msk.f32.mxu0 %vm365_vm0, %v6197_v29 }
 0x2e8   : > { %5139 = vmatmul.mubr.msk.f32.gmra.mrb[60].mxu0 %vm365_vm0, %v6211_v31 }
 0x2e9   : > { %5141 = vmatprep.mubr.msk.f32.mxu0 %vm365_vm0, %v6214_v32 }
 0x2ec   : > { %5142 = vmatmul.mubr.msk.f32.gmra.mrb[62].mxu0 %vm365_vm0, %v6223_v33 }
 0x2ed   : > { %5172 = vmatprep.mubr.msk.f32.mxu0 %vm365_vm0, %v6063_v2  ;;  %v1644_v2 = vpop.f32.mrb[43].mxu1 }
 0x2ee   : > { %v1645_v24 = vadd.f32 %v6456_v60, %v1644_v2  ;;  %v5166_v29 = vpop.f32.mrb[44].mxu1 }
 0x2ef   : > { %v1660_v31 = vadd.f32 %v5166_v29, %v6456_v60  ;;  %v1654_v32 = vpop.f32.mrb[45].mxu1 }
 0x2f0   : > { %v1841_v25 = vpack.c.bf16 %v1650_v21, %v1645_v24  ;;  %v1655_v33 = vadd.f32 %v6456_v60, %v1654_v32  ;;  %v5169_v36 = vpop.f32.mrb[46].mxu1  ;;  %5173 = vmatmul.mubr.msk.f32.vlgmr.msra.gmra.mrb[64].mxu0 %vm365_vm0, %v6066_v3  ;;  %v7750_v3 = vld [vmem:[#allocation5_spill] sm:$0xff] }
 0x2f1   : > { %v1670_v53 = vadd.f32 %v5169_v36, %v6456_v60  ;;  %v1664_v43 = vpop.f32.mrb[47].mxu1  ;;  %5175 = vmatprep.mubr.msk.f32.mxu0 %vm365_vm0, %v6069_v4 }
 0x2f2   : > { %5557 = vmatprep.subr.msk.bf16.mxu1 %vm365_vm0, %v1841_v25  ;;  %v1884_v28 = vsel %vm365_vm0, %v1841_v25, 0  ;;  %v1842_v55 = vpack.c.bf16 %v1660_v31, %v1655_v33  ;;  %v1665_v44 = vadd.f32 %v6456_v60, %v1664_v43 }
 0x2f3   : > { %5207 = vmatpush3.bf16.xpose.msra.mxu1 %v1884_v28 }
 0x2f4   : > { %5558 = vmatprep.subr.msk.bf16.mxu1 %vm365_vm0, %v1842_v55  ;;  %v1887_v46 = vsel %vm365_vm0, %v1842_v55, 0  ;;  %v1843_v41 = vpack.c.bf16 %v1670_v53, %v1665_v44  ;;  %5176 = vmatmul.mubr.msk.f32.gmra.mrb[66].mxu0 %vm365_vm0, %v6083_v5 }
 0x2f5   : > { %5178 = vmatprep.mubr.msk.f32.mxu0 %vm365_vm0, %v6086_v6 }
 0x2f6   : > { %v1890_v56 = vsel %vm365_vm0, %v1843_v41, 0 }
 0x2f8   : > { %5179 = vmatmul.mubr.msk.f32.gmra.mrb[68].mxu0 %vm365_vm0, %v6104_v10 }
 0x2f9   : > { %5181 = vmatprep.mubr.msk.f32.mxu0 %vm365_vm0, %v6109_v11 }
 0x2fb   : > { %5209 = vmatpush3.bf16.xpose.msra.mxu1 %v1887_v46 }
 0x2fc   : > { %5559 = vmatprep.subr.msk.bf16.mxu1 %vm365_vm0, %v1843_v41  ;;  %5182 = vmatmul.mubr.msk.f32.gmra.mrb[70].mxu0 %vm365_vm0, %v6124_v14 }
 0x2fd   : > { %5184 = vmatprep.mubr.msk.f32.mxu0 %vm365_vm0, %v6129_v15 }
 0x300   : > { %5185 = vmatmul.mubr.msk.f32.gmra.mrb[72].mxu0 %vm365_vm0, %v6144_v18 }
 0x301   : > { %5187 = vmatprep.mubr.msk.f32.mxu0 %vm365_vm0, %v6149_v19 }
 0x303   : > { %5211 = vmatpush3.bf16.xpose.msra.mxu1 %v1890_v56 }
 0x304   : > { %5188 = vmatmul.mubr.msk.f32.gmra.mrb[74].mxu0 %vm365_vm0, %v6164_v22 }
 0x305   : > { %5190 = vmatprep.mubr.msk.f32.mxu0 %vm365_vm0, %v6169_v23 }
 0x308   : > { %5191 = vmatmul.mubr.msk.f32.gmra.mrb[76].mxu0 %vm365_vm0, %v6184_v26 }
 0x309   : > { %5193 = vmatprep.mubr.msk.f32.mxu0 %vm365_vm0, %v6189_v27 }
 0x30c   : > { %5194 = vmatmul.mubr.msk.f32.gmra.mrb[78].mxu0 %vm365_vm0, %v7750_v3 }
 0x382   : > { %v6626_v4 = vpop.f32.mrb[32].mxu0 }
 0x383   : > { %7751 = vst [vmem:[#allocation5_spill] sm:$0xff] %v6626_v4  ;;  %v6628_v5 = vpop.f32.mrb[33].mxu0 }
 0x384   : > { %7752 = vst [vmem:[#allocation9_spill] sm:$0xff] %v6628_v5  ;;  %v6630_v6 = vpop.f32.mrb[34].mxu0 }
 0x385   : > { %7753 = vst [vmem:[#allocation10_spill] sm:$0xff] %v6630_v6  ;;  %v6632_v10 = vpop.f32.mrb[35].mxu0 }
 0x386   : > { %7754 = vst [vmem:[#allocation11_spill] sm:$0xff] %v6632_v10 }
 0x38b   : > { %v6634_v11 = vpop.f32.mrb[36].mxu0 }
 0x38c   : > { %7755 = vst [vmem:[#allocation12_spill] sm:$0xff] %v6634_v11  ;;  %v6636_v14 = vpop.f32.mrb[37].mxu0 }
 0x38d   : > { %7756 = vst [vmem:[#allocation13_spill] sm:$0xff] %v6636_v14  ;;  %v6638_v15 = vpop.f32.mrb[38].mxu0 }
 0x38e   : > { %7757 = vst [vmem:[#allocation14_spill] sm:$0xff] %v6638_v15  ;;  %v6640_v18 = vpop.f32.mrb[39].mxu0 }
 0x38f   : > { %7758 = vst [vmem:[#allocation15_spill] sm:$0xff] %v6640_v18 }
 0x393   : > { %v6642_v19 = vpop.f32.mrb[40].mxu0 }
 0x394   : > { %7759 = vst [vmem:[#allocation16_spill] sm:$0xff] %v6642_v19  ;;  %v6644_v22 = vpop.f32.mrb[41].mxu0 }
 0x395   : > { %7760 = vst [vmem:[#allocation17_spill] sm:$0xff] %v6644_v22  ;;  %v6646_v23 = vpop.f32.mrb[42].mxu0 }
 0x396   : > { %7761 = vst [vmem:[#allocation18_spill] sm:$0xff] %v6646_v23  ;;  %v6648_v26 = vpop.f32.mrb[43].mxu0 }
 0x397   : > { %7762 = vst [vmem:[#allocation19_spill] sm:$0xff] %v6648_v26 }
 0x39b   : > { %v6650_v27 = vpop.f32.mrb[44].mxu0 }
 0x39c   : > { %7763 = vst [vmem:[#allocation20_spill] sm:$0xff] %v6650_v27  ;;  %v6652_v60 = vpop.f32.mrb[45].mxu0  ;;  %v6830_v27 = vld [vmem:[%s7720_s5] ss:$0 sm:$0xff] }
 0x39d   : > { %7764 = vst [vmem:[#allocation21_spill] sm:$0xff] %v6652_v60  ;;  %v6654_v51 = vpop.f32.mrb[46].mxu0 }
 0x39e   : > { %7765 = vst [vmem:[#allocation22_spill] sm:$0xff] %v6654_v51  ;;  %v6656_v35 = vpop.f32.mrb[47].mxu0  ;;  %v6821_v51 = vld [vmem:[%s6060_s25 + $0xf8] sm:$0xff] }
 0x39f   : > { %7766 = vst [vmem:[#allocation23_spill] sm:$0xff] %v6656_v35 }
 0x3a3   : > { %v5122_v34 = vpop.f32.mrb[48].mxu0 }
 0x3a4   : > { %v1445_v42 = vadd.f32 %v5122_v34, %v4385_v37  ;;  %v1439_v45 = vpop.f32.mrb[49].mxu0 }
 0x3a5   : > { %v1440_v58 = vadd.f32 %v4385_v37, %v1439_v45 }
 0x3a7   : > { %v1828_v7 = vpack.c.bf16 %v1445_v42, %v1440_v58  ;;  %v5125_v8 = vpop.f32.mrb[50].mxu0 }
 0x3a8   : > { %v1455_v9 = vadd.f32 %v5125_v8, %v4385_v37  ;;  %v1449_v12 = vpop.f32.mrb[51].mxu0 }
 0x3a9   : > { %v1450_v13 = vadd.f32 %v4385_v37, %v1449_v12  ;;  %5212 = vmatprep.mubr.msk.bf16.mxu1 %vm365_vm0, %v1828_v7 }
 0x3ab   : > { %v1829_v16 = vpack.c.bf16 %v1455_v9, %v1450_v13  ;;  %v5128_v17 = vpop.f32.mrb[52].mxu0 }
 0x3ac   : > { %v1465_v20 = vadd.f32 %v5128_v17, %v4385_v37  ;;  %v1459_v21 = vpop.f32.mrb[53].mxu0 }
 0x3ad   : > { %v1460_v2 = vadd.f32 %v4385_v37, %v1459_v21  ;;  %5213 = vmatmul.mubr.msk.bf16.vlgmr.msra.gmra.mrb[48].mxu1 %vm365_vm0, %v1829_v16  ;;  %v2514_v16 = vld [vmem:[%s7719_s4] sm:$0xff] }
 0x3ae   : > { %v6678_v21 = vld [vmem:[%s6060_s25 + $0x80] sm:$0xff]  ;;  %5286 = vmatprep.subr.mxu1 %v2514_v16 }
 0x3af   : > { %v1830_v24 = vpack.c.bf16 %v1465_v20, %v1460_v2  ;;  %v5131_v25 = vpop.f32.mrb[54].mxu0  ;;  %v6675_v20 = vld [vmem:[%s7722_s7 + $0x1] ss:$0 sm:$0xff]  ;;  %5287 = vmatpush3.msra.mxu1 %v2514_v16 }
 0x3b0   : > { %v1475_v28 = vadd.f32 %v5131_v25, %v4385_v37  ;;  %v1469_v29 = vpop.f32.mrb[55].mxu0 }
 0x3b1   : > { %v1470_v31 = vadd.f32 %v4385_v37, %v1469_v29  ;;  %5216 = vmatprep.mubr.msk.bf16.mxu1 %vm365_vm0, %v1830_v24  ;;  %v6684_v24 = vld [vmem:[%s6060_s25 + $0x88] sm:$0xff] }
 0x3b3   : > { %v1831_v32 = vpack.c.bf16 %v1475_v28, %v1470_v31  ;;  %v5134_v33 = vpop.f32.mrb[56].mxu0 }
 0x3b4   : > { %v1485_v55 = vadd.f32 %v5134_v33, %v4385_v37  ;;  %v1479_v46 = vpop.f32.mrb[57].mxu0 }
 0x3b5   : > { %v1480_v36 = vadd.f32 %v4385_v37, %v1479_v46  ;;  %5217 = vmatmul.mubr.msk.bf16.gmra.mrb[52].mxu1 %vm365_vm0, %v1831_v32 }
 0x3b7   : > { %v1832_v53 = vpack.c.bf16 %v1485_v55, %v1480_v36  ;;  %v5137_v43 = vpop.f32.mrb[58].mxu0 }
 0x3b8   : > { %v1495_v44 = vadd.f32 %v5137_v43, %v4385_v37  ;;  %v1489_v41 = vpop.f32.mrb[59].mxu0 }
 0x3b9   : > { %v1490_v56 = vadd.f32 %v4385_v37, %v1489_v41  ;;  %5220 = vmatprep.mubr.msk.bf16.mxu1 %vm365_vm0, %v1832_v53 }
 0x3bb   : > { %v1833_v54 = vpack.c.bf16 %v1495_v44, %v1490_v56  ;;  %v5140_v3 = vpop.f32.mrb[60].mxu0 }
 0x3bc   : > { %v1505_v34 = vadd.f32 %v5140_v3, %v4385_v37  ;;  %v1499_v42 = vpop.f32.mrb[61].mxu0 }
 0x3bd   : > { %v1500_v45 = vadd.f32 %v4385_v37, %v1499_v42  ;;  %5221 = vmatmul.mubr.msk.bf16.gmra.mrb[56].mxu1 %vm365_vm0, %v1833_v54 }
 0x3bf   : > { %v1834_v58 = vpack.c.bf16 %v1505_v34, %v1500_v45  ;;  %v5143_v7 = vpop.f32.mrb[62].mxu0 }
 0x3c0   : > { %v1515_v8 = vadd.f32 %v5143_v7, %v4385_v37  ;;  %v1509_v9 = vpop.f32.mrb[63].mxu0 }
 0x3c1   : > { %v1510_v12 = vadd.f32 %v4385_v37, %v1509_v9  ;;  %5224 = vmatprep.mubr.msk.bf16.mxu1 %vm365_vm0, %v1834_v58 }
 0x3c3   : > { %v1835_v13 = vpack.c.bf16 %v1515_v8, %v1510_v12  ;;  %v5174_v17 = vpop.f32.mrb[64].mxu0 }
 0x3c4   : > { %v1755_v37 = vadd.f32 %v5174_v17, %v6675_v20  ;;  %v1749_v2 = vpop.f32.mrb[65].mxu0 }
 0x3c5   : > { %5225 = vmatmul.mubr.msk.bf16.gmra.mrb[60].mxu1 %vm365_vm0, %v1835_v13  ;;  %v1750_v25 = vadd.f32 %v6675_v20, %v1749_v2 }
 0x3c6   : > { %5288 = vmatprep.mubr.msk.f32.mxu1 %vm365_vm0, %v6678_v21 }
 0x3c7   : > { %v5177_v28 = vpop.f32.mrb[66].mxu0  ;;  %v2109_v32 = vpack.c.bf16 %v1755_v37, %v1750_v25 }
 0x3c8   : > { %v1765_v29 = vadd.f32 %v5177_v28, %v6675_v20  ;;  %v1759_v31 = vpop.f32.mrb[67].mxu0 }
 0x3c9   : > { %v1760_v33 = vadd.f32 %v6675_v20, %v1759_v31  ;;  %5228 = vmatprep.subr.bf16.mxu0 %v2109_v32 }
 0x3ca   : > { %5229 = vmatpush3.bf16.msra.mxu0 %v2109_v32  ;;  %v6731_v32 = vld [vmem:[%s6060_s25 + $0x98] sm:$0xff] }
 0x3cb   : > { %v5180_v55 = vpop.f32.mrb[68].mxu0  ;;  %v2110_v53 = vpack.c.bf16 %v1765_v29, %v1760_v33  ;;  %v6724_v29 = vld [vmem:[%s6060_s25 + $0x90] sm:$0xff] }
 0x3cc   : > { %v1775_v46 = vadd.f32 %v5180_v55, %v6675_v20  ;;  %v1769_v36 = vpop.f32.mrb[69].mxu0 }
 0x3cd   : > { %5289 = vmatmul.mubr.msk.f32.vlgmr.msra.gmra.mrb[64].mxu1 %vm365_vm0, %v6684_v24  ;;  %v1770_v43 = vadd.f32 %v6675_v20, %v1769_v36  ;;  %5230 = vmatprep.subr.bf16.mxu0 %v2110_v53 }
 0x3ce   : > { %5231 = vmatpush3.bf16.msra.mxu0 %v2110_v53  ;;  %5291 = vmatprep.mubr.msk.f32.mxu1 %vm365_vm0, %v6724_v29 }
 0x3cf   : > { %v5183_v44 = vpop.f32.mrb[70].mxu0  ;;  %v2111_v41 = vpack.c.bf16 %v1775_v46, %v1770_v43 }
 0x3d0   : > { %v1785_v56 = vadd.f32 %v5183_v44, %v6675_v20  ;;  %v1779_v54 = vpop.f32.mrb[71].mxu0 }
 0x3d1   : > { %v1780_v3 = vadd.f32 %v6675_v20, %v1779_v54  ;;  %5232 = vmatprep.subr.bf16.mxu0 %v2111_v41  ;;  %5292 = vmatmul.mubr.msk.f32.gmra.mrb[66].mxu1 %vm365_vm0, %v6731_v32 }
 0x3d2   : > { %5233 = vmatpush3.bf16.msra.mxu0 %v2111_v41 }
 0x3d3   : > { %v2112_v34 = vpack.c.bf16 %v1785_v56, %v1780_v3  ;;  %v5186_v42 = vpop.f32.mrb[72].mxu0  ;;  %v6748_v3 = vld [vmem:[%s6060_s25 + $0xa0] sm:$0xff] }
 0x3d4   : > { %v1795_v45 = vadd.f32 %v5186_v42, %v6675_v20  ;;  %v1789_v58 = vpop.f32.mrb[73].mxu0  ;;  %5294 = vmatprep.mubr.msk.f32.mxu1 %vm365_vm0, %v6748_v3 }
 0x3d5   : > { %v1790_v7 = vadd.f32 %v6675_v20, %v1789_v58  ;;  %5234 = vmatprep.subr.bf16.mxu0 %v2112_v34  ;;  %v6757_v58 = vld [vmem:[%s6060_s25 + $0xa8] sm:$0xff] }
 0x3d6   : > { %5235 = vmatpush3.bf16.msra.mxu0 %v2112_v34  ;;  %5295 = vmatmul.mubr.msk.f32.gmra.mrb[68].mxu1 %vm365_vm0, %v6757_v58 }
 0x3d7   : > { %v2113_v8 = vpack.c.bf16 %v1795_v45, %v1790_v7  ;;  %v5189_v46 = vpop.f32.mrb[74].mxu0 }
 0x3d8   : > { %v1799_v36 = vpop.f32.mrb[75].mxu0  ;;  %v1805_v53 = vadd.f32 %v5189_v46, %v6675_v20 }
 0x3d9   : > { %5236 = vmatprep.subr.bf16.mxu0 %v2113_v8  ;;  %v1800_v43 = vadd.f32 %v6675_v20, %v1799_v36 }
 0x3da   : > { %5237 = vmatpush3.bf16.msra.mxu0 %v2113_v8 }
 0x3db   : > { %v2114_v44 = vpack.c.bf16 %v1805_v53, %v1800_v43  ;;  %v5192_v41 = vpop.f32.mrb[76].mxu0 }
 0x3dc   : > { %v1809_v54 = vpop.f32.mrb[77].mxu0  ;;  %v1815_v42 = vadd.f32 %v5192_v41, %v6675_v20 }
 0x3dd   : > { %v1810_v45 = vadd.f32 %v6675_v20, %v1809_v54  ;;  %5238 = vmatprep.subr.bf16.mxu0 %v2114_v44  ;;  %v6772_v54 = vld [vmem:[%s6060_s25 + $0xb0] sm:$0xff] }
 0x3de   : > { %5239 = vmatpush3.bf16.msra.mxu0 %v2114_v44  ;;  %5297 = vmatprep.mubr.msk.f32.mxu1 %vm365_vm0, %v6772_v54 }
 0x3df   : > { %v2115_v46 = vpack.c.bf16 %v1815_v42, %v1810_v45  ;;  %v5195_v36 = vpop.f32.mrb[78].mxu0  ;;  %v6777_v42 = vld [vmem:[%s6060_s25 + $0xb8] sm:$0xff]  ;;  %v6787_v45 = vld [vmem:[%s6060_s25 + $0xc8] sm:$0xff] }
 0x3e0   : > { %v1819_v53 = vpop.f32.mrb[79].mxu0  ;;  %v1825_v43 = vadd.f32 %v5195_v36, %v6675_v20  ;;  %5298 = vmatmul.mubr.msk.f32.gmra.mrb[70].mxu1 %vm365_vm0, %v6777_v42  ;;  %v6798_v36 = vld [vmem:[%s6060_s25 + $0xd0] sm:$0xff] }
 0x3e1   : > { %v1820_v41 = vadd.f32 %v6675_v20, %v1819_v53  ;;  %5240 = vmatprep.subr.bf16.mxu0 %v2115_v46  ;;  %v6782_v20 = vld [vmem:[%s6060_s25 + $0xc0] sm:$0xff]  ;;  %v6803_v53 = vld [vmem:[%s6060_s25 + $0xd8] sm:$0xff] }
 0x3e2   : > { %5241 = vmatpush3.bf16.msra.mxu0 %v2115_v46  ;;  %5300 = vmatprep.mubr.msk.f32.mxu1 %vm365_vm0, %v6782_v20  ;;  %v6792_v46 = vld [vmem:[%s7717_s2] sm:$0xff] }
 0x3e3   : > { %v2116_v44 = vpack.c.bf16 %v1825_v43, %v1820_v41  ;;  %v6808_v43 = vld [vmem:[%s6060_s25 + $0xe0] sm:$0xff]  ;;  %v6811_v41 = vld [vmem:[%s6060_s25 + $0xe8] sm:$0xff] }
 0x3e4   : > { %5301 = vmatmul.mubr.msk.f32.gmra.mrb[72].mxu1 %vm365_vm0, %v6787_v45 }
 0x3e5   : > { %5242 = vmatprep.subr.bf16.mxu0 %v2116_v44  ;;  %5303 = vmatprep.mubr.msk.f32.mxu1 %vm365_vm0, %v6798_v36 }
 0x3e6   : > { %5243 = vmatpush3.bf16.msra.mxu0 %v2116_v44  ;;  %v6818_v44 = vld [vmem:[%s6060_s25 + $0xf0] sm:$0xff] }
 0x3e7   : > { %5260 = vmatprep.subr.mxu0 %v6792_v46 }
 0x3e8   : > { %5304 = vmatmul.mubr.msk.f32.gmra.mrb[74].mxu1 %vm365_vm0, %v6803_v53 }
 0x3e9   : > { %5306 = vmatprep.mubr.msk.f32.mxu1 %vm365_vm0, %v6808_v43 }
 0x3ec   : > { %5307 = vmatmul.mubr.msk.f32.gmra.mrb[76].mxu1 %vm365_vm0, %v6811_v41 }
 0x3ed   : > { %5309 = vmatprep.mubr.msk.f32.mxu1 %vm365_vm0, %v6818_v44 }
 0x3f0   : > { %5310 = vmatmul.mubr.msk.f32.gmra.mrb[78].mxu1 %vm365_vm0, %v6821_v51 }
 0x480   : > { %v6697_v9 = vpop.f32.mrb[48].mxu1 }
 0x481   : > { %v6699_v12 = vpop.f32.mrb[49].mxu1 }
 0x482   : > { %1989 = vmax.xlane.f32.xlu0 %v6699_v12  ;;  %v6702_v13 = vpop.f32.mrb[50].mxu1 }
 0x483   : > { %v6704_v16 = vpop.f32.mrb[51].mxu1 }
 0x484   : > { %1991 = vmax.xlane.f32.xlu1 %v6704_v16 }
 0x486   : > { %1993 = vmax.xlane.f32.xlu0 %v6697_v9 }
 0x488   : > { %1995 = vmax.xlane.f32.xlu1 %v6702_v13  ;;  %v6709_v17 = vpop.f32.mrb[52].mxu1 }
 0x489   : > { %v6711_v37 = vpop.f32.mrb[53].mxu1 }
 0x48a   : > { %1997 = vmax.xlane.f32.xlu0 %v6711_v37  ;;  %v6714_v2 = vpop.f32.mrb[54].mxu1 }
 0x48b   : > { %v6716_v25 = vpop.f32.mrb[55].mxu1 }
 0x48c   : > { %1999 = vmax.xlane.f32.xlu1 %v6716_v25 }
 0x48e   : > { %2001 = vmax.xlane.f32.xlu0 %v6709_v17 }
 0x490   : > { %2003 = vmax.xlane.f32.xlu1 %v6714_v2  ;;  %v6721_v28 = vpop.f32.mrb[56].mxu1 }
 0x491   : > { %v6726_v31 = vpop.f32.mrb[57].mxu1 }
 0x492   : > { %2005 = vmax.xlane.f32.xlu0 %v6726_v31  ;;  %v6734_v33 = vpop.f32.mrb[58].mxu1 }
 0x493   : > { %v6738_v55 = vpop.f32.mrb[59].mxu1 }
 0x494   : > { %2007 = vmax.xlane.f32.xlu1 %v6738_v55 }
 0x496   : > { %2009 = vmax.xlane.f32.xlu0 %v6721_v28 }
 0x498   : > { %2011 = vmax.xlane.f32.xlu1 %v6734_v33  ;;  %v6745_v56 = vpop.f32.mrb[60].mxu1 }
 0x499   : > { %v6750_v34 = vpop.f32.mrb[61].mxu1 }
 0x49a   : > { %2013 = vmax.xlane.f32.xlu0 %v6750_v34  ;;  %v6760_v7 = vpop.f32.mrb[62].mxu1 }
 0x49b   : > { %v6762_v8 = vpop.f32.mrb[63].mxu1 }
 0x49c   : > { %2015 = vmax.xlane.f32.xlu1 %v6762_v8 }
 0x49e   : > { %2017 = vmax.xlane.f32.xlu0 %v6745_v56 }
 0x4a0   : > { %2019 = vmax.xlane.f32.xlu1 %v6760_v7  ;;  %v5290_v35 = vpop.f32.mrb[64].mxu1 }
 0x4a1   : > { %v2642_v60 = vadd.f32 %v5290_v35, %v6830_v27  ;;  %v2636_v23 = vpop.f32.mrb[65].mxu1 }
 0x4a2   : > { %v2637_v19 = vadd.f32 %v6830_v27, %v2636_v23 }
 0x4a4   : > { %v2876_v26 = vpack.c.bf16 %v2642_v60, %v2637_v19 }
 0x4a6   : > { %5560 = vmatprep.subr.msk.bf16.mxu1 %vm365_vm0, %v2876_v26  ;;  %v2909_v22 = vsel %vm365_vm0, %v2876_v26, 0 }
 0x4a7   : > { %5339 = vmatpush3.bf16.xpose.msra.mxu1 %v2909_v22 }
 0x50f   : > { %v1990_v15 = vpop.xlane.xlu0 %1989 }
 0x510   : > { %v2021_v11 = vsub.f32 %v6699_v12, %v1990_v15 }
 0x511   : > { %v1992_v18 = vpop.xlane.xlu1 %1991 }
 0x512   : > { %v2037_v14 = vmul.f32 1.442695, %v2021_v11  ;;  %v2022_v6 = vsub.f32 %v6704_v16, %v1992_v18 }
 0x513   : > { %v1994_v4 = vpop.xlane.xlu0 %1993 }
 0x514   : > { %v2039_v10 = vmul.f32 1.442695, %v2022_v6  ;;  %v2023_v35 = vsub.f32 %v6697_v9, %v1994_v4  ;;  %5649 = vpow2.f32 %v2037_v14 }
 0x515   : > { %v1996_v5 = vpop.xlane.xlu1 %1995 }
 0x516   : > { %5651 = vpow2.f32 %v2039_v10  ;;  %v2041_v19 = vmul.f32 1.442695, %v2023_v35  ;;  %v2024_v23 = vsub.f32 %v6702_v13, %v1996_v5 }
 0x517   : > { %v1998_v60 = vpop.xlane.xlu0 %1997 }
 0x518   : > { %v2043_v26 = vmul.f32 1.442695, %v2024_v23  ;;  %v2025_v22 = vsub.f32 %v6711_v37, %v1998_v60  ;;  %5653 = vpow2.f32 %v2041_v19 }
 0x519   : > { %v2000_v15 = vpop.xlane.xlu1 %1999 }
 0x51a   : > { %5655 = vpow2.f32 %v2043_v26  ;;  %v2045_v11 = vmul.f32 1.442695, %v2025_v22  ;;  %v2026_v18 = vsub.f32 %v6716_v25, %v2000_v15 }
 0x51b   : > { %v2002_v12 = vpop.xlane.xlu0 %2001 }
 0x51c   : > { %v2047_v6 = vmul.f32 1.442695, %v2026_v18  ;;  %v2027_v4 = vsub.f32 %v6709_v17, %v2002_v12  ;;  %5657 = vpow2.f32 %v2045_v11 }
 0x51d   : > { %v2004_v14 = vpop.xlane.xlu1 %2003 }
 0x51e   : > { %5659 = vpow2.f32 %v2047_v6  ;;  %v2049_v10 = vmul.f32 1.442695, %v2027_v4  ;;  %v2028_v5 = vsub.f32 %v6714_v2, %v2004_v14  ;;  %v6844_v9 = vpop.eup %5649 }
 0x51f   : > { %7767 = vst [vmem:[#allocation24_spill] sm:$0xff] %v6844_v9  ;;  %v2006_v13 = vpop.xlane.xlu0 %2005 }
 0x520   : > { %v6846_v16 = vpop.eup %5651  ;;  %v2051_v37 = vmul.f32 1.442695, %v2028_v5  ;;  %v2029_v35 = vsub.f32 %v6726_v31, %v2006_v13  ;;  %5661 = vpow2.f32 %v2049_v10 }
 0x521   : > { %7768 = vst [vmem:[#allocation25_spill] sm:$0xff] %v6846_v16  ;;  %v2008_v25 = vpop.xlane.xlu1 %2007  ;;  %v2101_v19 = vpack.c.bf16 %v6846_v16, %v6844_v9 }
 0x522   : > { %5663 = vpow2.f32 %v2051_v37  ;;  %v2053_v17 = vmul.f32 1.442695, %v2029_v35  ;;  %v2030_v23 = vsub.f32 %v6738_v55, %v2008_v25  ;;  %v6852_v60 = vpop.eup %5653 }
 0x523   : > { %7769 = vst [vmem:[#allocation26_spill] sm:$0xff] %v6852_v60  ;;  %5244 = vmatprep.mubr.bf16.mxu0 %v2101_v19  ;;  %v2010_v2 = vpop.xlane.xlu0 %2009 }
 0x524   : > { %v6854_v26 = vpop.eup %5655  ;;  %v2055_v22 = vmul.f32 1.442695, %v2030_v23  ;;  %v2031_v15 = vsub.f32 %v6721_v28, %v2010_v2  ;;  %5665 = vpow2.f32 %v2053_v17 }
 0x525   : > { %7770 = vst [vmem:[#allocation27_spill] sm:$0xff] %v6854_v26  ;;  %v2012_v31 = vpop.xlane.xlu1 %2011  ;;  %v2102_v11 = vpack.c.bf16 %v6854_v26, %v6852_v60 }
 0x526   : > { %5667 = vpow2.f32 %v2055_v22  ;;  %v2057_v18 = vmul.f32 1.442695, %v2031_v15  ;;  %v2032_v12 = vsub.f32 %v6734_v33, %v2012_v31  ;;  %v6860_v6 = vpop.eup %5657 }
 0x527   : > { %7771 = vst [vmem:[#allocation28_spill] sm:$0xff] %v6860_v6  ;;  %5245 = vmatmul.mubr.bf16.vlgmr.msra.gmra.mrb[80].mxu0 %v2102_v11  ;;  %v2014_v55 = vpop.xlane.xlu0 %2013 }
 0x528   : > { %v6862_v4 = vpop.eup %5659  ;;  %v2059_v14 = vmul.f32 1.442695, %v2032_v12  ;;  %5261 = vmatpush3.msra.mxu0 %v6792_v46  ;;  %v2033_v28 = vsub.f32 %v6750_v34, %v2014_v55  ;;  %5669 = vpow2.f32 %v2057_v18 }
 0x529   : > { %7772 = vst [vmem:[#allocation29_spill] sm:$0xff] %v6862_v4  ;;  %v2016_v10 = vpop.xlane.xlu1 %2015  ;;  %v2103_v5 = vpack.c.bf16 %v6862_v4, %v6860_v6 }
 0x52a   : > { %5671 = vpow2.f32 %v2059_v14  ;;  %v2061_v13 = vmul.f32 1.442695, %v2033_v28  ;;  %v2034_v33 = vsub.f32 %v6762_v8, %v2016_v10  ;;  %v6869_v37 = vpop.eup %5661 }
 0x52b   : > { %7773 = vst [vmem:[#allocation30_spill] sm:$0xff] %v6869_v37  ;;  %5248 = vmatprep.mubr.bf16.mxu0 %v2103_v5  ;;  %v2018_v35 = vpop.xlane.xlu0 %2017  ;;  %v6902_v5 = vld [vmem:[%s6078_s12 + $0x80] sm:$0xff] }
 0x52c   : > { %v6871_v25 = vpop.eup %5663  ;;  %v2063_v19 = vmul.f32 1.442695, %v2034_v33  ;;  %v2035_v46 = vsub.f32 %v6745_v56, %v2018_v35  ;;  %5673 = vpow2.f32 %v2061_v13  ;;  %v6907_v13 = vld [vmem:[%s6078_s12 + $0x88] sm:$0xff]  ;;  %v6910_v33 = vld [vmem:[%s6078_s12 + $0x90] sm:$0xff]  ;;  %v6917_v35 = vld [vmem:[%s6078_s12 + $0x98] sm:$0xff] }
 0x52d   : > { %7774 = vst [vmem:[#allocation31_spill] sm:$0xff] %v6871_v25  ;;  %v2020_v34 = vpop.xlane.xlu1 %2019  ;;  %v2104_v17 = vpack.c.bf16 %v6871_v25, %v6869_v37 }
 0x52e   : > { %5675 = vpow2.f32 %v2063_v19  ;;  %v2065_v23 = vmul.f32 1.442695, %v2035_v46  ;;  %v2036_v2 = vsub.f32 %v6760_v7, %v2020_v34  ;;  %v6877_v22 = vpop.eup %5665  ;;  %v6920_v19 = vld [vmem:[%s6078_s12 + $0xa0] sm:$0xff]  ;;  %v6927_v46 = vld [vmem:[%s6078_s12 + $0xa8] sm:$0xff]  ;;  %v6930_v34 = vld [vmem:[%s6078_s12 + $0xb0] sm:$0xff] }
 0x52f   : > { %7775 = vst [vmem:[#allocation32_spill] sm:$0xff] %v6877_v22  ;;  %5249 = vmatmul.mubr.bf16.gmra.mrb[84].mxu0 %v2104_v17  ;;  %v6937_v17 = vld [vmem:[%s6078_s12 + $0xb8] sm:$0xff] }
 0x530   : > { %v6879_v8 = vpop.eup %5667  ;;  %v2067_v15 = vmul.f32 1.442695, %v2036_v2  ;;  %5677 = vpow2.f32 %v2065_v23  ;;  %v6940_v23 = vld [vmem:[%s6078_s12 + $0xc0] sm:$0xff]  ;;  %v6947_v2 = vld [vmem:[%s6078_s12 + $0xc8] sm:$0xff] }
 0x531   : > { %7776 = vst [vmem:[#allocation33_spill] sm:$0xff] %v6879_v8  ;;  %v2105_v56 = vpack.c.bf16 %v6879_v8, %v6877_v22 }
 0x532   : > { %5679 = vpow2.f32 %v2067_v15  ;;  %v6883_v31 = vpop.eup %5669  ;;  %v6950_v15 = vld [vmem:[%s6078_s12 + $0xd0] sm:$0xff] }
 0x533   : > { %7777 = vst [vmem:[#allocation34_spill] sm:$0xff] %v6883_v31  ;;  %5252 = vmatprep.mubr.bf16.mxu0 %v2105_v56  ;;  %v6957_v56 = vld [vmem:[%s6078_s12 + $0xd8] sm:$0xff] }
 0x534   : > { %v6885_v11 = vpop.eup %5671 }
 0x535   : > { %7778 = vst [vmem:[#allocation35_spill] sm:$0xff] %v6885_v11  ;;  %v2106_v7 = vpack.c.bf16 %v6885_v11, %v6883_v31 }
 0x536   : > { %v6889_v18 = vpop.eup %5673 }
 0x537   : > { %7779 = vst [vmem:[#allocation36_spill] sm:$0xff] %v6889_v18  ;;  %5253 = vmatmul.mubr.bf16.gmra.mrb[88].mxu0 %v2106_v7  ;;  %v6960_v7 = vld [vmem:[%s6078_s12 + $0xe0] sm:$0xff] }
 0x538   : > { %v6891_v12 = vpop.eup %5675 }
 0x539   : > { %7780 = vst [vmem:[#allocation37_spill] sm:$0xff] %v6891_v12  ;;  %v2107_v55 = vpack.c.bf16 %v6891_v12, %v6889_v18 }
 0x53a   : > { %v6895_v14 = vpop.eup %5677 }
 0x53b   : > { %7781 = vst [vmem:[#allocation38_spill] sm:$0xff] %v6895_v14  ;;  %5256 = vmatprep.mubr.bf16.mxu0 %v2107_v55  ;;  %v6967_v55 = vld [vmem:[%s6078_s12 + $0xe8] sm:$0xff] }
 0x53c   : > { %v6897_v28 = vpop.eup %5679 }
 0x53d   : > { %7782 = vst [vmem:[#allocation39_spill] sm:$0xff] %v6897_v28  ;;  %v2108_v10 = vpack.c.bf16 %v6897_v28, %v6895_v14  ;;  %v6977_v28 = vld [vmem:[%s6078_s12 + $0xf8] sm:$0xff]  ;;  %v5293_v14 = vpop.f32.mrb[66].mxu1 }
 0x53e   : > { %v2652_v12 = vadd.f32 %v5293_v14, %v6830_v27  ;;  %v2646_v18 = vpop.f32.mrb[67].mxu1 }
 0x53f   : > { %5257 = vmatmul.mubr.bf16.gmra.mrb[92].mxu0 %v2108_v10  ;;  %v6970_v10 = vld [vmem:[%s6078_s12 + $0xf0] sm:$0xff]  ;;  %v2647_v11 = vadd.f32 %v6830_v27, %v2646_v18  ;;  %v5296_v22 = vpop.f32.mrb[68].mxu1  ;;  %s7665_s12 = scalar_lea.hbm %s7723_s8, %s4643_s13 }
 0x540   : > { %5262 = vmatprep.mubr.msk.f32.mxu0 %vm365_vm0, %v6902_v5  ;;  %v2662_v25 = vadd.f32 %v5296_v22, %v6830_v27  ;;  %v2656_v37 = vpop.f32.mrb[69].mxu1 }
 0x541   : > { %v2877_v31 = vpack.c.bf16 %v2652_v12, %v2647_v11  ;;  %v2657_v4 = vadd.f32 %v6830_v27, %v2656_v37  ;;  %v5299_v26 = vpop.f32.mrb[70].mxu1 }
 0x542   : > { %v2672_v11 = vadd.f32 %v5299_v26, %v6830_v27  ;;  %v2666_v18 = vpop.f32.mrb[71].mxu1 }
 0x543   : > { %5561 = vmatprep.subr.msk.bf16.mxu1 %vm365_vm0, %v2877_v31  ;;  %v2912_v8 = vsel %vm365_vm0, %v2877_v31, 0  ;;  %v2878_v6 = vpack.c.bf16 %v2662_v25, %v2657_v4  ;;  %v2667_v12 = vadd.f32 %v6830_v27, %v2666_v18 }
 0x544   : > { %5341 = vmatpush3.bf16.xpose.msra.mxu1 %v2912_v8  ;;  %v5302_v8 = vpop.f32.mrb[72].mxu1 }
 0x545   : > { %5562 = vmatprep.subr.msk.bf16.mxu1 %vm365_vm0, %v2878_v6  ;;  %v2915_v14 = vsel %vm365_vm0, %v2878_v6, 0  ;;  %v2879_v31 = vpack.c.bf16 %v2672_v11, %v2667_v12  ;;  %v2682_v4 = vadd.f32 %v5302_v8, %v6830_v27  ;;  %v2676_v37 = vpop.f32.mrb[73].mxu1 }
 0x546   : > { %v2677_v25 = vadd.f32 %v6830_v27, %v2676_v37 }
 0x547   : > { %5263 = vmatmul.mubr.msk.f32.vlgmr.msra.gmra.mrb[96].mxu0 %vm365_vm0, %v6907_v13  ;;  %v2918_v22 = vsel %vm365_vm0, %v2879_v31, 0 }
 0x548   : > { %5265 = vmatprep.mubr.msk.f32.mxu0 %vm365_vm0, %v6910_v33  ;;  %v2880_v6 = vpack.c.bf16 %v2682_v4, %v2677_v25 }
 0x54a   : > { %v2921_v26 = vsel %vm365_vm0, %v2880_v6, 0 }
 0x54b   : > { %5266 = vmatmul.mubr.msk.f32.gmra.mrb[98].mxu0 %vm365_vm0, %v6917_v35 }
 0x54c   : > { %5268 = vmatprep.mubr.msk.f32.mxu0 %vm365_vm0, %v6920_v19  ;;  %5343 = vmatpush3.bf16.xpose.msra.mxu1 %v2915_v14  ;;  %v5305_v14 = vpop.f32.mrb[74].mxu1 }
 0x54d   : > { %5563 = vmatprep.subr.msk.bf16.mxu1 %vm365_vm0, %v2879_v31  ;;  %v2692_v11 = vadd.f32 %v5305_v14, %v6830_v27  ;;  %v2686_v18 = vpop.f32.mrb[75].mxu1 }
 0x54e   : > { %v2687_v12 = vadd.f32 %v6830_v27, %v2686_v18  ;;  %v5308_v8 = vpop.f32.mrb[76].mxu1 }
 0x54f   : > { %5269 = vmatmul.mubr.msk.f32.gmra.mrb[100].mxu0 %vm365_vm0, %v6927_v46  ;;  %v2702_v4 = vadd.f32 %v5308_v8, %v6830_v27  ;;  %v2696_v37 = vpop.f32.mrb[77].mxu1  ;;  %v2715_v8 = vld [vmem:[%s7721_s6] sm:$0xff] }
 0x550   : > { %5271 = vmatprep.mubr.msk.f32.mxu0 %vm365_vm0, %v6930_v34  ;;  %v2881_v31 = vpack.c.bf16 %v2692_v11, %v2687_v12  ;;  %v2697_v25 = vadd.f32 %v6830_v27, %v2696_v37  ;;  %v5311_v14 = vpop.f32.mrb[78].mxu1  ;;  %5312 = vmatprep.subr.mxu0 %v2715_v8 }
 0x551   : > { %v2712_v11 = vadd.f32 %v5311_v14, %v6830_v27  ;;  %v2706_v18 = vpop.f32.mrb[79].mxu1  ;;  %5313 = vmatpush3.msra.mxu0 %v2715_v8 }
 0x552   : > { %v2707_v12 = vadd.f32 %v6830_v27, %v2706_v18 }
 0x553   : > { %5272 = vmatmul.mubr.msk.f32.gmra.mrb[102].mxu0 %vm365_vm0, %v6937_v17 }
 0x554   : > { %5274 = vmatprep.mubr.msk.f32.mxu0 %vm365_vm0, %v6940_v23  ;;  %5345 = vmatpush3.bf16.xpose.msra.mxu1 %v2918_v22  ;;  %v2924_v22 = vsel %vm365_vm0, %v2881_v31, 0 }
 0x555   : > { %5564 = vmatprep.subr.msk.bf16.mxu1 %vm365_vm0, %v2880_v6  ;;  %v2882_v6 = vpack.c.bf16 %v2702_v4, %v2697_v25 }
 0x557   : > { %5275 = vmatmul.mubr.msk.f32.gmra.mrb[104].mxu0 %vm365_vm0, %v6947_v2 }
 0x558   : > { %5277 = vmatprep.mubr.msk.f32.mxu0 %vm365_vm0, %v6950_v15 }
 0x55b   : > { %5278 = vmatmul.mubr.msk.f32.gmra.mrb[106].mxu0 %vm365_vm0, %v6957_v56 }
 0x55c   : > { %5280 = vmatprep.mubr.msk.f32.mxu0 %vm365_vm0, %v6960_v7  ;;  %5347 = vmatpush3.bf16.xpose.msra.mxu1 %v2921_v26  ;;  %v2927_v26 = vsel %vm365_vm0, %v2882_v6, 0 }
 0x55d   : > { %5565 = vmatprep.subr.msk.bf16.mxu1 %vm365_vm0, %v2881_v31  ;;  %v2883_v31 = vpack.c.bf16 %v2712_v11, %v2707_v12 }
 0x55f   : > { %5281 = vmatmul.mubr.msk.f32.gmra.mrb[108].mxu0 %vm365_vm0, %v6967_v55 }
 0x560   : > { %5283 = vmatprep.mubr.msk.f32.mxu0 %vm365_vm0, %v6970_v10 }
 0x563   : > { %5284 = vmatmul.mubr.msk.f32.gmra.mrb[110].mxu0 %vm365_vm0, %v6977_v28 }
 0x564   : > { %5314 = vmatprep.mubr.msk.f32.mxu0 %vm365_vm0, %v6678_v21  ;;  %5349 = vmatpush3.bf16.xpose.msra.mxu1 %v2924_v22  ;;  %v2930_v22 = vsel %vm365_vm0, %v2883_v31, 0 }
 0x565   : > { %5566 = vmatprep.subr.msk.bf16.mxu1 %vm365_vm0, %v2882_v6 }
 0x567   : > { %5315 = vmatmul.mubr.msk.f32.vlgmr.msra.gmra.mrb[112].mxu0 %vm365_vm0, %v6684_v24 }
 0x568   : > { %5317 = vmatprep.mubr.msk.f32.mxu0 %vm365_vm0, %v6724_v29 }
 0x56b   : > { %5318 = vmatmul.mubr.msk.f32.gmra.mrb[114].mxu0 %vm365_vm0, %v6731_v32 }
 0x56c   : > { %5351 = vmatpush3.bf16.xpose.msra.mxu1 %v2927_v26  ;;  %5320 = vmatprep.mubr.msk.f32.mxu0 %vm365_vm0, %v6748_v3 }
 0x56d   : > { %5567 = vmatprep.subr.msk.bf16.mxu1 %vm365_vm0, %v2883_v31 }
 0x56f   : > { %5321 = vmatmul.mubr.msk.f32.gmra.mrb[116].mxu0 %vm365_vm0, %v6757_v58 }
 0x570   : > { %5323 = vmatprep.mubr.msk.f32.mxu0 %vm365_vm0, %v6772_v54 }
 0x573   : > { %5324 = vmatmul.mubr.msk.f32.gmra.mrb[118].mxu0 %vm365_vm0, %v6777_v42 }
 0x574   : > { %5353 = vmatpush3.bf16.xpose.msra.mxu1 %v2930_v22  ;;  %5326 = vmatprep.mubr.msk.f32.mxu0 %vm365_vm0, %v6782_v20 }
 0x577   : > { %5327 = vmatmul.mubr.msk.f32.gmra.mrb[120].mxu0 %vm365_vm0, %v6787_v45 }
 0x578   : > { %5329 = vmatprep.mubr.msk.f32.mxu0 %vm365_vm0, %v6798_v36 }
 0x57b   : > { %5330 = vmatmul.mubr.msk.f32.gmra.mrb[122].mxu0 %vm365_vm0, %v6803_v53 }
 0x57c   : > { %5332 = vmatprep.mubr.msk.f32.mxu0 %vm365_vm0, %v6808_v43 }
 0x57f   : > { %5333 = vmatmul.mubr.msk.f32.gmra.mrb[124].mxu0 %vm365_vm0, %v6811_v41 }
 0x580   : > { %5335 = vmatprep.mubr.msk.f32.mxu0 %vm365_vm0, %v6818_v44 }
 0x583   : > { %5336 = vmatmul.mubr.msk.f32.gmra.mrb[126].mxu0 %vm365_vm0, %v6821_v51 }
 0x5fa   : > { %v7044_v27 = vpop.f32.mrb[80].mxu0 }
 0x5fb   : > { %7783 = vst [vmem:[#allocation40_spill] sm:$0xff] %v7044_v27  ;;  %v7046_v4 = vpop.f32.mrb[81].mxu0 }
 0x5fc   : > { %7784 = vst [vmem:[#allocation41_spill] sm:$0xff] %v7046_v4  ;;  %v7048_v37 = vpop.f32.mrb[82].mxu0 }
 0x5fd   : > { %7785 = vst [vmem:[#allocation42_spill] sm:$0xff] %v7048_v37  ;;  %v7050_v25 = vpop.f32.mrb[83].mxu0 }
 0x5fe   : > { %7786 = vst [vmem:[#allocation43_spill] sm:$0xff] %v7050_v25 }
 0x602   : > { %v7052_v6 = vpop.f32.mrb[84].mxu0 }
 0x603   : > { %7787 = vst [vmem:[#allocation44_spill] sm:$0xff] %v7052_v6  ;;  %v7054_v26 = vpop.f32.mrb[85].mxu0 }
 0x604   : > { %7788 = vst [vmem:[#allocation45_spill] sm:$0xff] %v7054_v26  ;;  %v7056_v14 = vpop.f32.mrb[86].mxu0 }
 0x605   : > { %7789 = vst [vmem:[#allocation46_spill] sm:$0xff] %v7056_v14  ;;  %v7058_v11 = vpop.f32.mrb[87].mxu0  ;;  %v4496_v14 = vld [vmem:[%s7718_s3] ss:$0 sm:$0xff] }
 0x606   : > { %7790 = vst [vmem:[#allocation47_spill] sm:$0xff] %v7058_v11 }
 0x60a   : > { %v7060_v18 = vpop.f32.mrb[88].mxu0 }
 0x60b   : > { %7791 = vst [vmem:[#allocation48_spill] sm:$0xff] %v7060_v18  ;;  %v7062_v12 = vpop.f32.mrb[89].mxu0 }
 0x60c   : > { %7792 = vst [vmem:[#allocation49_spill] sm:$0xff] %v7062_v12  ;;  %v7064_v31 = vpop.f32.mrb[90].mxu0 }
 0x60d   : > { %7793 = vst [vmem:[#allocation50_spill] sm:$0xff] %v7064_v31  ;;  %v7066_v22 = vpop.f32.mrb[91].mxu0 }
 0x60e   : > { %7794 = vst [vmem:[#allocation51_spill] sm:$0xff] %v7066_v22 }
 0x612   : > { %v7068_v8 = vpop.f32.mrb[92].mxu0 }
 0x613   : > { %7795 = vst [vmem:[#allocation52_spill] sm:$0xff] %v7068_v8  ;;  %v7070_v37 = vpop.f32.mrb[93].mxu0 }
 0x614   : > { %7796 = vst [vmem:[#allocation53_spill] sm:$0xff] %v7070_v37  ;;  %v7072_v27 = vpop.f32.mrb[94].mxu0 }
 0x615   : > { %7797 = vst [vmem:[#allocation54_spill] sm:$0xff] %v7072_v27  ;;  %v7074_v6 = vpop.f32.mrb[95].mxu0 }
 0x616   : > { %7798 = vst [vmem:[#allocation55_spill] sm:$0xff] %v7074_v6 }
 0x61a   : > { %v5264_v11 = vpop.f32.mrb[96].mxu0 }
 0x61b   : > { %v2441_v18 = vadd.f32 %v5264_v11, %v4496_v14  ;;  %v2435_v26 = vpop.f32.mrb[97].mxu0 }
 0x61c   : > { %v2436_v12 = vadd.f32 %v4496_v14, %v2435_v26 }
 0x61e   : > { %v2868_v25 = vpack.c.bf16 %v2441_v18, %v2436_v12  ;;  %v5267_v31 = vpop.f32.mrb[98].mxu0 }
 0x61f   : > { %v2451_v4 = vadd.f32 %v5267_v31, %v4496_v14  ;;  %v2445_v22 = vpop.f32.mrb[99].mxu0 }
 0x620   : > { %v2446_v60 = vadd.f32 %v4496_v14, %v2445_v22  ;;  %5354 = vmatprep.mubr.msk.bf16.mxu1 %vm365_vm0, %v2868_v25 }
 0x622   : > { %v2869_v8 = vpack.c.bf16 %v2451_v4, %v2446_v60  ;;  %v5270_v37 = vpop.f32.mrb[100].mxu0 }
 0x623   : > { %v2461_v27 = vadd.f32 %v5270_v37, %v4496_v14  ;;  %v2455_v16 = vpop.f32.mrb[101].mxu0 }
 0x624   : > { %v2456_v6 = vadd.f32 %v4496_v14, %v2455_v16  ;;  %5355 = vmatmul.mubr.msk.bf16.vlgmr.msra.gmra.mrb[80].mxu1 %vm365_vm0, %v2869_v8 }
 0x626   : > { %v2870_v9 = vpack.c.bf16 %v2461_v27, %v2456_v6  ;;  %v5273_v40 = vpop.f32.mrb[102].mxu0 }
 0x627   : > { %v2471_v38 = vadd.f32 %v5273_v40, %v4496_v14  ;;  %v2465_v11 = vpop.f32.mrb[103].mxu0 }
 0x628   : > { %v2466_v0 = vadd.f32 %v4496_v14, %v2465_v11  ;;  %5358 = vmatprep.mubr.msk.bf16.mxu1 %vm365_vm0, %v2870_v9 }
 0x62a   : > { %v2871_v26 = vpack.c.bf16 %v2471_v38, %v2466_v0  ;;  %v5276_v18 = vpop.f32.mrb[104].mxu0 }
 0x62b   : > { %v2481_v12 = vadd.f32 %v5276_v18, %v4496_v14  ;;  %v2475_v31 = vpop.f32.mrb[105].mxu0 }
 0x62c   : > { %v2476_v22 = vadd.f32 %v4496_v14, %v2475_v31  ;;  %5359 = vmatmul.mubr.msk.bf16.gmra.mrb[84].mxu1 %vm365_vm0, %v2871_v26 }
 0x62e   : > { %v2872_v60 = vpack.c.bf16 %v2481_v12, %v2476_v22  ;;  %v5279_v4 = vpop.f32.mrb[106].mxu0  ;;  %v4574_v12 = vld [vmem:[%s7719_s4 + $0x8] sm:$0xff] }
 0x62f   : > { %v2491_v37 = vadd.f32 %v5279_v4, %v4496_v14  ;;  %v2485_v16 = vpop.f32.mrb[107].mxu0  ;;  %5428 = vmatprep.subr.mxu1 %v4574_v12 }
 0x630   : > { %v2486_v25 = vadd.f32 %v4496_v14, %v2485_v16  ;;  %5362 = vmatprep.mubr.msk.bf16.mxu1 %vm365_vm0, %v2872_v60  ;;  %v7095_v60 = vld [vmem:[%s7722_s7] ss:$0 sm:$0xff]  ;;  %5429 = vmatpush3.msra.mxu1 %v4574_v12 }
 0x632   : > { %v2873_v27 = vpack.c.bf16 %v2491_v37, %v2486_v25  ;;  %v5282_v40 = vpop.f32.mrb[108].mxu0 }
 0x633   : > { %v2501_v6 = vadd.f32 %v5282_v40, %v4496_v14  ;;  %v2495_v8 = vpop.f32.mrb[109].mxu0 }
 0x634   : > { %v2496_v11 = vadd.f32 %v4496_v14, %v2495_v8  ;;  %5363 = vmatmul.mubr.msk.bf16.gmra.mrb[88].mxu1 %vm365_vm0, %v2873_v27 }
 0x636   : > { %v2874_v0 = vpack.c.bf16 %v2501_v6, %v2496_v11  ;;  %v5285_v38 = vpop.f32.mrb[110].mxu0 }
 0x637   : > { %v2511_v9 = vadd.f32 %v5285_v38, %v4496_v14  ;;  %v2505_v18 = vpop.f32.mrb[111].mxu0 }
 0x638   : > { %v2506_v31 = vadd.f32 %v4496_v14, %v2505_v18  ;;  %5366 = vmatprep.mubr.msk.bf16.mxu1 %vm365_vm0, %v2874_v0 }
 0x63a   : > { %v2875_v26 = vpack.c.bf16 %v2511_v9, %v2506_v31  ;;  %v5316_v22 = vpop.f32.mrb[112].mxu0 }
 0x63b   : > { %v2795_v14 = vadd.f32 %v5316_v22, %v7095_v60  ;;  %v2789_v4 = vpop.f32.mrb[113].mxu0 }
 0x63c   : > { %5367 = vmatmul.mubr.msk.bf16.gmra.mrb[92].mxu1 %vm365_vm0, %v2875_v26  ;;  %v2790_v37 = vadd.f32 %v7095_v60, %v2789_v4 }
 0x63d   : > { %5430 = vmatprep.mubr.msk.f32.mxu1 %vm365_vm0, %v6678_v21 }
 0x63e   : > { %v5319_v16 = vpop.f32.mrb[114].mxu0  ;;  %v3149_v27 = vpack.c.bf16 %v2795_v14, %v2790_v37 }
 0x63f   : > { %v2805_v21 = vadd.f32 %v5319_v16, %v7095_v60  ;;  %v2799_v25 = vpop.f32.mrb[115].mxu0 }
 0x640   : > { %v2800_v40 = vadd.f32 %v7095_v60, %v2799_v25  ;;  %5370 = vmatprep.subr.bf16.mxu0 %v3149_v27 }
 0x641   : > { %5371 = vmatpush3.bf16.msra.mxu0 %v3149_v27 }
 0x642   : > { %v5322_v6 = vpop.f32.mrb[116].mxu0  ;;  %v3150_v0 = vpack.c.bf16 %v2805_v21, %v2800_v40 }
 0x643   : > { %v2815_v8 = vadd.f32 %v5322_v6, %v7095_v60  ;;  %v2809_v11 = vpop.f32.mrb[117].mxu0 }
 0x644   : > { %5431 = vmatmul.mubr.msk.f32.vlgmr.msra.gmra.mrb[96].mxu1 %vm365_vm0, %v6684_v24  ;;  %v2810_v38 = vadd.f32 %v7095_v60, %v2809_v11  ;;  %5372 = vmatprep.subr.bf16.mxu0 %v3150_v0 }
 0x645   : > { %5433 = vmatprep.mubr.msk.f32.mxu1 %vm365_vm0, %v6724_v29  ;;  %5373 = vmatpush3.bf16.msra.mxu0 %v3150_v0 }
 0x646   : > { %v5325_v9 = vpop.f32.mrb[118].mxu0  ;;  %v3151_v24 = vpack.c.bf16 %v2815_v8, %v2810_v38 }
 0x647   : > { %v2825_v18 = vadd.f32 %v5325_v9, %v7095_v60  ;;  %v2819_v31 = vpop.f32.mrb[119].mxu0 }
 0x648   : > { %5434 = vmatmul.mubr.msk.f32.gmra.mrb[98].mxu1 %vm365_vm0, %v6731_v32  ;;  %v2820_v29 = vadd.f32 %v7095_v60, %v2819_v31  ;;  %5374 = vmatprep.subr.bf16.mxu0 %v3151_v24 }
 0x649   : > { %5436 = vmatprep.mubr.msk.f32.mxu1 %vm365_vm0, %v6748_v3  ;;  %5375 = vmatpush3.bf16.msra.mxu0 %v3151_v24 }
 0x64a   : > { %v3152_v26 = vpack.c.bf16 %v2825_v18, %v2820_v29  ;;  %v5328_v12 = vpop.f32.mrb[120].mxu0 }
 0x64b   : > { %v2835_v22 = vadd.f32 %v5328_v12, %v7095_v60  ;;  %v2829_v32 = vpop.f32.mrb[121].mxu0 }
 0x64c   : > { %5437 = vmatmul.mubr.msk.f32.gmra.mrb[100].mxu1 %vm365_vm0, %v6757_v58  ;;  %v2830_v14 = vadd.f32 %v7095_v60, %v2829_v32  ;;  %5376 = vmatprep.subr.bf16.mxu0 %v3152_v26  ;;  %v7194_v32 = vld [vmem:[%s7717_s2 + $0x8] sm:$0xff] }
 0x64d   : > { %5439 = vmatprep.mubr.msk.f32.mxu1 %vm365_vm0, %v6772_v54  ;;  %5377 = vmatpush3.bf16.msra.mxu0 %v3152_v26 }
 0x64e   : > { %v3153_v4 = vpack.c.bf16 %v2835_v22, %v2830_v14  ;;  %v5331_v37 = vpop.f32.mrb[122].mxu0 }
 0x64f   : > { %v2839_v16 = vpop.f32.mrb[123].mxu0  ;;  %v2845_v21 = vadd.f32 %v5331_v37, %v7095_v60 }
 0x650   : > { %5440 = vmatmul.mubr.msk.f32.gmra.mrb[102].mxu1 %vm365_vm0, %v6777_v42  ;;  %5378 = vmatprep.subr.bf16.mxu0 %v3153_v4  ;;  %v2840_v25 = vadd.f32 %v7095_v60, %v2839_v16 }
 0x651   : > { %5442 = vmatprep.mubr.msk.f32.mxu1 %vm365_vm0, %v6782_v20  ;;  %5379 = vmatpush3.bf16.msra.mxu0 %v3153_v4 }
 0x652   : > { %v3154_v27 = vpack.c.bf16 %v2845_v21, %v2840_v25  ;;  %v5334_v40 = vpop.f32.mrb[124].mxu0 }
 0x653   : > { %v2849_v8 = vpop.f32.mrb[125].mxu0  ;;  %v2855_v0 = vadd.f32 %v5334_v40, %v7095_v60 }
 0x654   : > { %5443 = vmatmul.mubr.msk.f32.gmra.mrb[104].mxu1 %vm365_vm0, %v6787_v45  ;;  %v2850_v38 = vadd.f32 %v7095_v60, %v2849_v8  ;;  %5380 = vmatprep.subr.bf16.mxu0 %v3154_v27 }
 0x655   : > { %5445 = vmatprep.mubr.msk.f32.mxu1 %vm365_vm0, %v6798_v36  ;;  %5381 = vmatpush3.bf16.msra.mxu0 %v3154_v27 }
 0x656   : > { %v3155_v18 = vpack.c.bf16 %v2855_v0, %v2850_v38  ;;  %v5337_v31 = vpop.f32.mrb[126].mxu0 }
 0x657   : > { %v2859_v29 = vpop.f32.mrb[127].mxu0  ;;  %v2865_v26 = vadd.f32 %v5337_v31, %v7095_v60 }
 0x658   : > { %5446 = vmatmul.mubr.msk.f32.gmra.mrb[106].mxu1 %vm365_vm0, %v6803_v53  ;;  %v2860_v12 = vadd.f32 %v7095_v60, %v2859_v29  ;;  %5382 = vmatprep.subr.bf16.mxu0 %v3155_v18  ;;  %v7200_v60 = vld [vmem:[%s7720_s5 + $0x1] ss:$0 sm:$0xff] }
 0x659   : > { %5448 = vmatprep.mubr.msk.f32.mxu1 %vm365_vm0, %v6808_v43  ;;  %5383 = vmatpush3.bf16.msra.mxu0 %v3155_v18 }
 0x65a   : > { %v3156_v22 = vpack.c.bf16 %v2865_v26, %v2860_v12 }
 0x65c   : > { %5449 = vmatmul.mubr.msk.f32.gmra.mrb[108].mxu1 %vm365_vm0, %v6811_v41  ;;  %5384 = vmatprep.subr.bf16.mxu0 %v3156_v22 }
 0x65d   : > { %5451 = vmatprep.mubr.msk.f32.mxu1 %vm365_vm0, %v6818_v44  ;;  %5385 = vmatpush3.bf16.msra.mxu0 %v3156_v22 }
 0x65e   : > { %5402 = vmatprep.subr.mxu0 %v7194_v32 }
 0x660   : > { %5452 = vmatmul.mubr.msk.f32.gmra.mrb[110].mxu1 %vm365_vm0, %v6821_v51 }
 0x6f7   : > { %v7137_v3 = vpop.f32.mrb[80].mxu1 }
 0x6f8   : > { %v7139_v58 = vpop.f32.mrb[81].mxu1 }
 0x6f9   : > { %3029 = vmax.xlane.f32.xlu0 %v7139_v58  ;;  %v7142_v54 = vpop.f32.mrb[82].mxu1 }
 0x6fa   : > { %v7144_v42 = vpop.f32.mrb[83].mxu1 }
 0x6fb   : > { %3031 = vmax.xlane.f32.xlu1 %v7144_v42 }
 0x6fd   : > { %3033 = vmax.xlane.f32.xlu0 %v7137_v3 }
 0x6ff   : > { %3035 = vmax.xlane.f32.xlu1 %v7142_v54  ;;  %v7149_v20 = vpop.f32.mrb[84].mxu1 }
 0x700   : > { %v7151_v45 = vpop.f32.mrb[85].mxu1 }
 0x701   : > { %3037 = vmax.xlane.f32.xlu0 %v7151_v45  ;;  %v7154_v51 = vpop.f32.mrb[86].mxu1 }
 0x702   : > { %v7156_v36 = vpop.f32.mrb[87].mxu1 }
 0x703   : > { %3039 = vmax.xlane.f32.xlu1 %v7156_v36 }
 0x705   : > { %3041 = vmax.xlane.f32.xlu0 %v7149_v20 }
 0x707   : > { %3043 = vmax.xlane.f32.xlu1 %v7154_v51  ;;  %v7161_v53 = vpop.f32.mrb[88].mxu1 }
 0x708   : > { %v7163_v43 = vpop.f32.mrb[89].mxu1 }
 0x709   : > { %3045 = vmax.xlane.f32.xlu0 %v7163_v43  ;;  %v7166_v41 = vpop.f32.mrb[90].mxu1 }
 0x70a   : > { %v7168_v44 = vpop.f32.mrb[91].mxu1 }
 0x70b   : > { %3047 = vmax.xlane.f32.xlu1 %v7168_v44 }
 0x70d   : > { %3049 = vmax.xlane.f32.xlu0 %v7161_v53 }
 0x70f   : > { %3051 = vmax.xlane.f32.xlu1 %v7166_v41  ;;  %v7175_v6 = vpop.f32.mrb[92].mxu1 }
 0x710   : > { %v7177_v11 = vpop.f32.mrb[93].mxu1 }
 0x711   : > { %3053 = vmax.xlane.f32.xlu0 %v7177_v11  ;;  %v7182_v9 = vpop.f32.mrb[94].mxu1 }
 0x712   : > { %v7184_v24 = vpop.f32.mrb[95].mxu1 }
 0x713   : > { %3055 = vmax.xlane.f32.xlu1 %v7184_v24 }
 0x715   : > { %3057 = vmax.xlane.f32.xlu0 %v7175_v6 }
 0x717   : > { %3059 = vmax.xlane.f32.xlu1 %v7182_v9  ;;  %v5432_v14 = vpop.f32.mrb[96].mxu1 }
 0x718   : > { %v3551_v4 = vadd.f32 %v5432_v14, %v7200_v60  ;;  %v3545_v37 = vpop.f32.mrb[97].mxu1 }
 0x719   : > { %v3546_v16 = vadd.f32 %v7200_v60, %v3545_v37 }
 0x71b   : > { %v3785_v21 = vpack.c.bf16 %v3551_v4, %v3546_v16  ;;  %v5435_v25 = vpop.f32.mrb[98].mxu1 }
 0x71c   : > { %v3561_v27 = vadd.f32 %v5435_v25, %v7200_v60  ;;  %v3555_v40 = vpop.f32.mrb[99].mxu1 }
 0x71d   : > { %5568 = vmatprep.subr.msk.bf16.mxu1 %vm365_vm0, %v3785_v21  ;;  %v3818_v8 = vsel %vm365_vm0, %v3785_v21, 0  ;;  %v3556_v0 = vadd.f32 %v7200_v60, %v3555_v40 }
 0x71e   : > { %5481 = vmatpush3.bf16.xpose.msra.mxu1 %v3818_v8 }
 0x71f   : > { %v3786_v38 = vpack.c.bf16 %v3561_v27, %v3556_v0  ;;  %v5438_v18 = vpop.f32.mrb[100].mxu1 }
 0x720   : > { %v3571_v31 = vadd.f32 %v5438_v18, %v7200_v60  ;;  %v3565_v29 = vpop.f32.mrb[101].mxu1 }
 0x721   : > { %5569 = vmatprep.subr.msk.bf16.mxu1 %vm365_vm0, %v3786_v38  ;;  %v3566_v26 = vadd.f32 %v7200_v60, %v3565_v29  ;;  %v3821_v12 = vsel %vm365_vm0, %v3786_v38, 0 }
 0x723   : > { %v3787_v22 = vpack.c.bf16 %v3571_v31, %v3566_v26  ;;  %v5441_v14 = vpop.f32.mrb[102].mxu1 }
 0x724   : > { %v3581_v4 = vadd.f32 %v5441_v14, %v7200_v60  ;;  %v3575_v37 = vpop.f32.mrb[103].mxu1 }
 0x725   : > { %v3576_v16 = vadd.f32 %v7200_v60, %v3575_v37  ;;  %v3824_v25 = vsel %vm365_vm0, %v3787_v22, 0 }
 0x726   : > { %5483 = vmatpush3.bf16.xpose.msra.mxu1 %v3821_v12 }
 0x727   : > { %5570 = vmatprep.subr.msk.bf16.mxu1 %vm365_vm0, %v3787_v22  ;;  %v7215_v21 = vpack.c.bf16 %v3581_v4, %v3576_v16 }
 0x72e   : > { %5485 = vmatpush3.bf16.xpose.msra.mxu1 %v3824_v25 }
 0x72f   : > { %5571 = vmatprep.subr.msk.bf16.mxu1 %vm365_vm0, %v7215_v21 }
 0x786   : > { %v3030_v27 = vpop.xlane.xlu0 %3029 }
 0x787   : > { %v3061_v40 = vsub.f32 %v7139_v58, %v3030_v27 }
 0x788   : > { %v3032_v8 = vpop.xlane.xlu1 %3031 }
 0x789   : > { %v3077_v0 = vmul.f32 1.442695, %v3061_v40  ;;  %v3062_v38 = vsub.f32 %v7144_v42, %v3032_v8 }
 0x78a   : > { %v3034_v18 = vpop.xlane.xlu0 %3033 }
 0x78b   : > { %v3079_v31 = vmul.f32 1.442695, %v3062_v38  ;;  %v3063_v29 = vsub.f32 %v7137_v3, %v3034_v18  ;;  %5681 = vpow2.f32 %v3077_v0 }
 0x78c   : > { %v3036_v26 = vpop.xlane.xlu1 %3035 }
 0x78d   : > { %5683 = vpow2.f32 %v3079_v31  ;;  %v3081_v12 = vmul.f32 1.442695, %v3063_v29  ;;  %v3064_v22 = vsub.f32 %v7142_v54, %v3036_v26 }
 0x78e   : > { %v3038_v14 = vpop.xlane.xlu0 %3037 }
 0x78f   : > { %v3083_v4 = vmul.f32 1.442695, %v3064_v22  ;;  %v3065_v37 = vsub.f32 %v7151_v45, %v3038_v14  ;;  %5685 = vpow2.f32 %v3081_v12 }
 0x790   : > { %v3040_v58 = vpop.xlane.xlu1 %3039 }
 0x791   : > { %5687 = vpow2.f32 %v3083_v4  ;;  %v3085_v16 = vmul.f32 1.442695, %v3065_v37  ;;  %v3066_v42 = vsub.f32 %v7156_v36, %v3040_v58 }
 0x792   : > { %v3042_v25 = vpop.xlane.xlu0 %3041 }
 0x793   : > { %v3087_v27 = vmul.f32 1.442695, %v3066_v42  ;;  %v3067_v3 = vsub.f32 %v7149_v20, %v3042_v25  ;;  %5689 = vpow2.f32 %v3085_v16 }
 0x794   : > { %v3044_v40 = vpop.xlane.xlu1 %3043 }
 0x795   : > { %5691 = vpow2.f32 %v3087_v27  ;;  %v3089_v8 = vmul.f32 1.442695, %v3067_v3  ;;  %v3068_v54 = vsub.f32 %v7154_v51, %v3044_v40  ;;  %v7228_v0 = vpop.eup %5681 }
 0x796   : > { %v3046_v38 = vpop.xlane.xlu0 %3045 }
 0x797   : > { %v7230_v45 = vpop.eup %5683  ;;  %v3091_v18 = vmul.f32 1.442695, %v3068_v54  ;;  %v3069_v31 = vsub.f32 %v7163_v43, %v3046_v38  ;;  %5693 = vpow2.f32 %v3089_v8 }
 0x798   : > { %v3048_v36 = vpop.xlane.xlu1 %3047  ;;  %v3141_v29 = vpack.c.bf16 %v7230_v45, %v7228_v0 }
 0x799   : > { %5695 = vpow2.f32 %v3091_v18  ;;  %v3093_v20 = vmul.f32 1.442695, %v3069_v31  ;;  %v3070_v26 = vsub.f32 %v7168_v44, %v3048_v36  ;;  %v7236_v12 = vpop.eup %5685 }
 0x79a   : > { %5386 = vmatprep.mubr.bf16.mxu0 %v3141_v29  ;;  %v3050_v51 = vpop.xlane.xlu0 %3049 }
 0x79b   : > { %v7238_v22 = vpop.eup %5687  ;;  %v3095_v14 = vmul.f32 1.442695, %v3070_v26  ;;  %v3071_v4 = vsub.f32 %v7161_v53, %v3050_v51  ;;  %5697 = vpow2.f32 %v3093_v20 }
 0x79c   : > { %v3052_v43 = vpop.xlane.xlu1 %3051  ;;  %v3142_v37 = vpack.c.bf16 %v7238_v22, %v7236_v12 }
 0x79d   : > { %5699 = vpow2.f32 %v3095_v14  ;;  %v3097_v58 = vmul.f32 1.442695, %v3071_v4  ;;  %v3072_v16 = vsub.f32 %v7166_v41, %v3052_v43  ;;  %v7244_v42 = vpop.eup %5689 }
 0x79e   : > { %5387 = vmatmul.mubr.bf16.vlgmr.msra.gmra.mrb[128].mxu0 %v3142_v37  ;;  %v3054_v44 = vpop.xlane.xlu0 %3053 }
 0x79f   : > { %v7246_v25 = vpop.eup %5691  ;;  %v3099_v27 = vmul.f32 1.442695, %v3072_v16  ;;  %5403 = vmatpush3.msra.mxu0 %v7194_v32  ;;  %v3073_v53 = vsub.f32 %v7177_v11, %v3054_v44  ;;  %5701 = vpow2.f32 %v3097_v58 }
 0x7a0   : > { %v3056_v3 = vpop.xlane.xlu1 %3055  ;;  %v3143_v40 = vpack.c.bf16 %v7246_v25, %v7244_v42 }
 0x7a1   : > { %5703 = vpow2.f32 %v3099_v27  ;;  %v3101_v8 = vmul.f32 1.442695, %v3073_v53  ;;  %v3074_v41 = vsub.f32 %v7184_v24, %v3056_v3  ;;  %v7253_v54 = vpop.eup %5693 }
 0x7a2   : > { %5390 = vmatprep.mubr.bf16.mxu0 %v3143_v40  ;;  %v3058_v38 = vpop.xlane.xlu0 %3057 }
 0x7a3   : > { %v7255_v18 = vpop.eup %5695  ;;  %v3103_v31 = vmul.f32 1.442695, %v3074_v41  ;;  %v3075_v32 = vsub.f32 %v7175_v6, %v3058_v38  ;;  %5705 = vpow2.f32 %v3101_v8 }
 0x7a4   : > { %v3060_v11 = vpop.xlane.xlu1 %3059  ;;  %v3144_v36 = vpack.c.bf16 %v7255_v18, %v7253_v54 }
 0x7a5   : > { %5707 = vpow2.f32 %v3103_v31  ;;  %v3105_v29 = vmul.f32 1.442695, %v3075_v32  ;;  %v3076_v20 = vsub.f32 %v7182_v9, %v3060_v11  ;;  %v7261_v26 = vpop.eup %5697 }
 0x7a6   : > { %5391 = vmatmul.mubr.bf16.gmra.mrb[132].mxu0 %v3144_v36  ;;  %v4593_v36 = vld [vmem:[%s7721_s6 + $0x8] sm:$0xff] }
 0x7a7   : > { %v7263_v24 = vpop.eup %5699  ;;  %v3107_v51 = vmul.f32 1.442695, %v3076_v20  ;;  %5709 = vpow2.f32 %v3105_v29  ;;  %5454 = vmatprep.subr.mxu0 %v4593_v36  ;;  %v5874_v29 = vld [vmem:[%s6060_s25 + $0x88] sm:$0xff]  ;;  %v5876_v20 = vld [vmem:[%s6060_s25 + $0x98] sm:$0xff] }
 0x7a8   : > { %v3145_v14 = vpack.c.bf16 %v7263_v24, %v7261_v26 }
 0x7a9   : > { %5711 = vpow2.f32 %v3107_v51  ;;  %v7267_v6 = vpop.eup %5701  ;;  %v5877_v51 = vld [vmem:[%s6060_s25 + $0xa0] sm:$0xff] }
 0x7aa   : > { %5394 = vmatprep.mubr.bf16.mxu0 %v3145_v14  ;;  %v5878_v14 = vld [vmem:[%s6060_s25 + $0xa8] sm:$0xff] }
 0x7ab   : > { %v7269_v4 = vpop.eup %5703 }
 0x7ac   : > { %v3146_v43 = vpack.c.bf16 %v7269_v4, %v7267_v6 }
 0x7ad   : > { %v7273_v9 = vpop.eup %5705 }
 0x7ae   : > { %5395 = vmatmul.mubr.bf16.gmra.mrb[136].mxu0 %v3146_v43  ;;  %v5879_v43 = vld [vmem:[%s6060_s25 + $0xb0] sm:$0xff] }
 0x7af   : > { %v7275_v37 = vpop.eup %5707 }
 0x7b0   : > { %v3147_v58 = vpack.c.bf16 %v7275_v37, %v7273_v9 }
 0x7b1   : > { %v7279_v16 = vpop.eup %5709 }
 0x7b2   : > { %5398 = vmatprep.mubr.bf16.mxu0 %v3147_v58  ;;  %v5880_v58 = vld [vmem:[%s6060_s25 + $0xb8] sm:$0xff] }
 0x7b3   : > { %v7281_v44 = vpop.eup %5711 }
 0x7b4   : > { %v3148_v27 = vpack.c.bf16 %v7281_v44, %v7279_v16 }
 0x7b6   : > { %5399 = vmatmul.mubr.bf16.gmra.mrb[140].mxu0 %v3148_v27  ;;  %v5881_v27 = vld [vmem:[%s6060_s25 + $0xc0] sm:$0xff] }
 0x7b7   : > { %5404 = vmatprep.mubr.msk.f32.mxu0 %vm365_vm0, %v6902_v5  ;;  %v5873_v5 = vld [vmem:[%s6060_s25 + $0x80] sm:$0xff] }
 0x7be   : > { %5405 = vmatmul.mubr.msk.f32.vlgmr.msra.gmra.mrb[144].mxu0 %vm365_vm0, %v6907_v13  ;;  %v3827_v13 = vsel %vm365_vm0, %v7215_v21, 0 }
 0x7bf   : > { %5407 = vmatprep.mubr.msk.f32.mxu0 %vm365_vm0, %v6910_v33  ;;  %5487 = vmatpush3.bf16.xpose.msra.mxu1 %v3827_v13  ;;  %v5444_v33 = vpop.f32.mrb[104].mxu1  ;;  %v5883_v13 = vld [vmem:[%s6060_s25 + $0xd0] sm:$0xff] }
 0x7c0   : > { %5455 = vmatpush3.msra.mxu0 %v4593_v36 }
 0x7c2   : > { %5408 = vmatmul.mubr.msk.f32.gmra.mrb[146].mxu0 %vm365_vm0, %v6917_v35  ;;  %v3591_v35 = vadd.f32 %v5444_v33, %v7200_v60  ;;  %v5884_v33 = vld [vmem:[%s6060_s25 + $0xd8] sm:$0xff] }
 0x7c3   : > { %5410 = vmatprep.mubr.msk.f32.mxu0 %vm365_vm0, %v6920_v19  ;;  %v3585_v19 = vpop.f32.mrb[105].mxu1 }
 0x7c6   : > { %5411 = vmatmul.mubr.msk.f32.gmra.mrb[148].mxu0 %vm365_vm0, %v6927_v46  ;;  %v3586_v46 = vadd.f32 %v7200_v60, %v3585_v19  ;;  %v5886_v19 = vld [vmem:[%s6060_s25 + $0xe8] sm:$0xff] }
 0x7c7   : > { %5413 = vmatprep.mubr.msk.f32.mxu0 %vm365_vm0, %v6930_v34 }
 0x7c8   : > { %v3789_v34 = vpack.c.bf16 %v3591_v35, %v3586_v46  ;;  %v5885_v35 = vld [vmem:[%s6060_s25 + $0xe0] sm:$0xff]  ;;  %v5887_v46 = vld [vmem:[%s6060_s25 + $0xf0] sm:$0xff] }
 0x7ca   : > { %5414 = vmatmul.mubr.msk.f32.gmra.mrb[150].mxu0 %vm365_vm0, %v6937_v17  ;;  %5572 = vmatprep.subr.msk.bf16.mxu1 %vm365_vm0, %v3789_v34  ;;  %v3830_v17 = vsel %vm365_vm0, %v3789_v34, 0  ;;  %v5888_v34 = vld [vmem:[%s6060_s25 + $0xf8] sm:$0xff] }
 0x7cb   : > { %5416 = vmatprep.mubr.msk.f32.mxu0 %vm365_vm0, %v6940_v23  ;;  %5489 = vmatpush3.bf16.xpose.msra.mxu1 %v3830_v17 }
 0x7ce   : > { %5417 = vmatmul.mubr.msk.f32.gmra.mrb[152].mxu0 %vm365_vm0, %v6947_v2 }
 0x7cf   : > { %5419 = vmatprep.mubr.msk.f32.mxu0 %vm365_vm0, %v6950_v15 }
 0x7d2   : > { %5420 = vmatmul.mubr.msk.f32.gmra.mrb[154].mxu0 %vm365_vm0, %v6957_v56 }
 0x7d3   : > { %5422 = vmatprep.mubr.msk.f32.mxu0 %vm365_vm0, %v6960_v7 }
 0x7d6   : > { %5423 = vmatmul.mubr.msk.f32.gmra.mrb[156].mxu0 %vm365_vm0, %v6967_v55 }
 0x7d7   : > { %5425 = vmatprep.mubr.msk.f32.mxu0 %vm365_vm0, %v6970_v10 }
 0x7da   : > { %5426 = vmatmul.mubr.msk.f32.gmra.mrb[158].mxu0 %vm365_vm0, %v6977_v28  ;;  %v5447_v28 = vpop.f32.mrb[106].mxu1 }
 0x7db   : > { %5456 = vmatprep.mubr.msk.f32.mxu0 %vm365_vm0, %v5873_v5  ;;  %v3601_v23 = vadd.f32 %v5447_v28, %v7200_v60  ;;  %v3595_v2 = vpop.f32.mrb[107].mxu1  ;;  %v5882_v5 = vld [vmem:[%s6060_s25 + $0xc8] sm:$0xff] }
 0x7dc   : > { %v3596_v15 = vadd.f32 %v7200_v60, %v3595_v2  ;;  %v5450_v55 = vpop.f32.mrb[108].mxu1 }
 0x7dd   : > { %v3611_v10 = vadd.f32 %v5450_v55, %v7200_v60  ;;  %v3605_v21 = vpop.f32.mrb[109].mxu1 }
 0x7de   : > { %v3790_v56 = vpack.c.bf16 %v3601_v23, %v3596_v15  ;;  %v3606_v53 = vadd.f32 %v7200_v60, %v3605_v21  ;;  %v5453_v8 = vpop.f32.mrb[110].mxu1  ;;  %5457 = vmatmul.mubr.msk.f32.vlgmr.msra.gmra.mrb[160].mxu0 %vm365_vm0, %v5874_v29 }
 0x7df   : > { %v3621_v41 = vadd.f32 %v5453_v8, %v7200_v60  ;;  %v3615_v38 = vpop.f32.mrb[111].mxu1 }
 0x7e0   : > { %5573 = vmatprep.subr.msk.bf16.mxu1 %vm365_vm0, %v3790_v56  ;;  %v3833_v7 = vsel %vm365_vm0, %v3790_v56, 0  ;;  %v3791_v3 = vpack.c.bf16 %v3611_v10, %v3606_v53  ;;  %v3616_v31 = vadd.f32 %v7200_v60, %v3615_v38  ;;  %v5875_v60 = vld [vmem:[%s6060_s25 + $0x90] sm:$0xff]  ;;  %s5953_s25 = smov [#allocation2]  }
 0x7e1   : > { %5491 = vmatpush3.bf16.xpose.msra.mxu1 %v3833_v7  ;;  %5459 = vmatprep.mubr.msk.f32.mxu0 %vm365_vm0, %v5875_v60  ;;  %s5893_s21 = sshll.u32 %s5953_s25, 4  ;;  %s5894_s21 = int_to_ptr.vmem [resolvable:$false] %s5893_s21 }
 0x7e2   : > { %5574 = vmatprep.subr.msk.bf16.mxu1 %vm365_vm0, %v3791_v3  ;;  %v3836_v40 = vsel %vm365_vm0, %v3791_v3, 0  ;;  %v3792_v32 = vpack.c.bf16 %v3621_v41, %v3616_v31  ;;  %5460 = vmatmul.mubr.msk.f32.gmra.mrb[162].mxu0 %vm365_vm0, %v5876_v20  ;;  %v4557_v31 = vld [vmem:[%s7718_s3 + $0x1] ss:$0 sm:$0xff]  ;;  %s5895_s22 = scalar_lea.vmem %s5894_s21, 16384  ;;  %p5896_p0 = scmp.lt.s32.totalorder %s7667_s17, %s5894_s21 }
 0x7e3   : > { %5462 = vmatprep.mubr.msk.f32.mxu0 %vm365_vm0, %v5877_v51  ;;  %p5897_p1 = scmp.lt.s32.totalorder %s5895_s22, %s5889_s20 }
 0x7e4   : > { %v3839_v11 = vsel %vm365_vm0, %v3792_v32, 0 }
 0x7e5   : > { %p5898_p2 = por %p5897_p1, %p5896_p0 }
 0x7e6   : > { %5463 = vmatmul.mubr.msk.f32.gmra.mrb[164].mxu0 %vm365_vm0, %v5878_v14 }
 0x7e7   : > { %5465 = vmatprep.mubr.msk.f32.mxu0 %vm365_vm0, %v5879_v43  ;;  %p5899_p3 = pnand %p5898_p2, %p5892_p13 }
 0x7e9   : > { %5493 = vmatpush3.bf16.xpose.msra.mxu1 %v3836_v40 }
 0x7ea   : > { %5575 = vmatprep.subr.msk.bf16.mxu1 %vm365_vm0, %v3792_v32  ;;  %5466 = vmatmul.mubr.msk.f32.gmra.mrb[166].mxu0 %vm365_vm0, %v5880_v58 }
 0x7eb   : > { %5468 = vmatprep.mubr.msk.f32.mxu0 %vm365_vm0, %v5881_v27 }
 0x7ee   : > { %5469 = vmatmul.mubr.msk.f32.gmra.mrb[168].mxu0 %vm365_vm0, %v5882_v5 }
 0x7ef   : > { %5471 = vmatprep.mubr.msk.f32.mxu0 %vm365_vm0, %v5883_v13 }
 0x7f1   : > { %5495 = vmatpush3.bf16.xpose.msra.mxu1 %v3839_v11 }
 0x7f2   : > { %5472 = vmatmul.mubr.msk.f32.gmra.mrb[170].mxu0 %vm365_vm0, %v5884_v33 }
 0x7f3   : > { %5474 = vmatprep.mubr.msk.f32.mxu0 %vm365_vm0, %v5885_v35 }
 0x7f6   : > { %5475 = vmatmul.mubr.msk.f32.gmra.mrb[172].mxu0 %vm365_vm0, %v5886_v19 }
 0x7f7   : > { %5477 = vmatprep.mubr.msk.f32.mxu0 %vm365_vm0, %v5887_v46 }
 0x7fa   : > { %5478 = vmatmul.mubr.msk.f32.gmra.mrb[174].mxu0 %vm365_vm0, %v5888_v34 }
 0x871   : > { %v7370_v17 = vpop.f32.mrb[128].mxu0 }
 0x872   : > { %v7372_v28 = vpop.f32.mrb[129].mxu0 }
 0x873   : > { %v7374_v23 = vpop.f32.mrb[130].mxu0 }
 0x874   : > { %v7376_v2 = vpop.f32.mrb[131].mxu0 }
 0x879   : > { %v7378_v15 = vpop.f32.mrb[132].mxu0 }
 0x87a   : > { %v7380_v56 = vpop.f32.mrb[133].mxu0 }
 0x87b   : > { %v7382_v7 = vpop.f32.mrb[134].mxu0 }
 0x87c   : > { %v7384_v55 = vpop.f32.mrb[135].mxu0 }
 0x881   : > { %v7386_v10 = vpop.f32.mrb[136].mxu0 }
 0x882   : > { %7799 = vst [vmem:[#allocation56_spill] sm:$0xff] %v7386_v10  ;;  %v7388_v21 = vpop.f32.mrb[137].mxu0 }
 0x883   : > { %7800 = vst [vmem:[#allocation57_spill] sm:$0xff] %v7388_v21  ;;  %v7390_v53 = vpop.f32.mrb[138].mxu0 }
 0x884   : > { %7801 = vst [vmem:[#allocation58_spill] sm:$0xff] %v7390_v53  ;;  %v7392_v3 = vpop.f32.mrb[139].mxu0 }
 0x885   : > { %7802 = vst [vmem:[#allocation59_spill] sm:$0xff] %v7392_v3 }
 0x889   : > { %v7394_v40 = vpop.f32.mrb[140].mxu0 }
 0x88a   : > { %7803 = vst [vmem:[#allocation60_spill] sm:$0xff] %v7394_v40  ;;  %v7396_v8 = vpop.f32.mrb[141].mxu0 }
 0x88b   : > { %7804 = vst [vmem:[#allocation61_spill] sm:$0xff] %v7396_v8  ;;  %v7398_v41 = vpop.f32.mrb[142].mxu0 }
 0x88c   : > { %7805 = vst [vmem:[#allocation62_spill] sm:$0xff] %v7398_v41  ;;  %v7400_v38 = vpop.f32.mrb[143].mxu0 }
 0x88d   : > { %7806 = vst [vmem:[#allocation63_spill] sm:$0xff] %v7400_v38 }
 0x891   : > { %v5406_v32 = vpop.f32.mrb[144].mxu0 }
 0x892   : > { %v3398_v11 = vadd.f32 %v5406_v32, %v4557_v31  ;;  %v3392_v36 = vpop.f32.mrb[145].mxu0 }
 0x893   : > { %v3393_v29 = vadd.f32 %v4557_v31, %v3392_v36 }
 0x895   : > { %v3777_v60 = vpack.c.bf16 %v3398_v11, %v3393_v29  ;;  %v5409_v20 = vpop.f32.mrb[146].mxu0 }
 0x896   : > { %v3408_v51 = vadd.f32 %v5409_v20, %v4557_v31  ;;  %v3402_v14 = vpop.f32.mrb[147].mxu0 }
 0x897   : > { %v3403_v43 = vadd.f32 %v4557_v31, %v3402_v14  ;;  %5496 = vmatprep.mubr.msk.bf16.mxu1 %vm365_vm0, %v3777_v60 }
 0x899   : > { %v3778_v58 = vpack.c.bf16 %v3408_v51, %v3403_v43  ;;  %v5412_v27 = vpop.f32.mrb[148].mxu0 }
 0x89a   : > { %v3418_v5 = vadd.f32 %v5412_v27, %v4557_v31  ;;  %v3412_v13 = vpop.f32.mrb[149].mxu0 }
 0x89b   : > { %v3413_v33 = vadd.f32 %v4557_v31, %v3412_v13  ;;  %5497 = vmatmul.mubr.msk.bf16.vlgmr.msra.gmra.mrb[112].mxu1 %vm365_vm0, %v3778_v58 }
 0x89d   : > { %v3779_v35 = vpack.c.bf16 %v3418_v5, %v3413_v33  ;;  %v5415_v19 = vpop.f32.mrb[150].mxu0 }
 0x89e   : > { %v3428_v46 = vadd.f32 %v5415_v19, %v4557_v31  ;;  %v3422_v34 = vpop.f32.mrb[151].mxu0 }
 0x89f   : > { %v3423_v32 = vadd.f32 %v4557_v31, %v3422_v34  ;;  %5500 = vmatprep.mubr.msk.bf16.mxu1 %vm365_vm0, %v3779_v35 }
 0x8a1   : > { %v3780_v11 = vpack.c.bf16 %v3428_v46, %v3423_v32  ;;  %v5418_v36 = vpop.f32.mrb[152].mxu0 }
 0x8a2   : > { %v3438_v29 = vadd.f32 %v5418_v36, %v4557_v31  ;;  %v3432_v20 = vpop.f32.mrb[153].mxu0 }
 0x8a3   : > { %v3433_v14 = vadd.f32 %v4557_v31, %v3432_v20  ;;  %5501 = vmatmul.mubr.msk.bf16.gmra.mrb[116].mxu1 %vm365_vm0, %v3780_v11 }
 0x8a5   : > { %v3781_v60 = vpack.c.bf16 %v3438_v29, %v3433_v14  ;;  %v5421_v51 = vpop.f32.mrb[154].mxu0  ;;  %v7416_v14 = vld [vmem:[%s7722_s7 + $0x1] ss:$0 sm:$0xff] }
 0x8a6   : > { %v3448_v43 = vadd.f32 %v5421_v51, %v4557_v31  ;;  %v3442_v27 = vpop.f32.mrb[155].mxu0 }
 0x8a7   : > { %v3443_v13 = vadd.f32 %v4557_v31, %v3442_v27  ;;  %5504 = vmatprep.mubr.msk.bf16.mxu1 %vm365_vm0, %v3781_v60 }
 0x8a9   : > { %v3782_v58 = vpack.c.bf16 %v3448_v43, %v3443_v13  ;;  %v5424_v5 = vpop.f32.mrb[156].mxu0 }
 0x8aa   : > { %v3458_v33 = vadd.f32 %v5424_v5, %v4557_v31  ;;  %v3452_v19 = vpop.f32.mrb[157].mxu0 }
 0x8ab   : > { %v3453_v34 = vadd.f32 %v4557_v31, %v3452_v19  ;;  %5505 = vmatmul.mubr.msk.bf16.gmra.mrb[120].mxu1 %vm365_vm0, %v3782_v58 }
 0x8ad   : > { %v3783_v35 = vpack.c.bf16 %v3458_v33, %v3453_v34  ;;  %v5427_v46 = vpop.f32.mrb[158].mxu0 }
 0x8ae   : > { %v3468_v32 = vadd.f32 %v5427_v46, %v4557_v31  ;;  %v3462_v36 = vpop.f32.mrb[159].mxu0 }
 0x8af   : > { %v3463_v20 = vadd.f32 %v4557_v31, %v3462_v36  ;;  %5508 = vmatprep.mubr.msk.bf16.mxu1 %vm365_vm0, %v3783_v35 }
 0x8b1   : > { %v3784_v11 = vpack.c.bf16 %v3468_v32, %v3463_v20  ;;  %v5458_v29 = vpop.f32.mrb[160].mxu0 }
 0x8b2   : > { %v3704_v60 = vadd.f32 %v5458_v29, %v7416_v14  ;;  %v3698_v51 = vpop.f32.mrb[161].mxu0 }
 0x8b3   : > { %5509 = vmatmul.mubr.msk.bf16.gmra.mrb[124].mxu1 %vm365_vm0, %v3784_v11  ;;  %v3699_v43 = vadd.f32 %v7416_v14, %v3698_v51 }
 0x8b5   : > { %v5461_v13 = vpop.f32.mrb[162].mxu0  ;;  %v4058_v58 = vpack.c.bf16 %v3704_v60, %v3699_v43 }
 0x8b6   : > { %v3714_v5 = vadd.f32 %v5461_v13, %v7416_v14  ;;  %v3708_v33 = vpop.f32.mrb[163].mxu0 }
 0x8b7   : > { %v3709_v34 = vadd.f32 %v7416_v14, %v3708_v33  ;;  %5512 = vmatprep.subr.bf16.mxu0 %v4058_v58 }
 0x8b8   : > { %5513 = vmatpush3.bf16.msra.mxu0 %v4058_v58 }
 0x8b9   : > { %v5464_v35 = vpop.f32.mrb[164].mxu0  ;;  %v4059_v20 = vpack.c.bf16 %v3714_v5, %v3709_v34 }
 0x8ba   : > { %v3724_v32 = vadd.f32 %v5464_v35, %v7416_v14  ;;  %v3718_v36 = vpop.f32.mrb[165].mxu0 }
 0x8bb   : > { %v3719_v11 = vadd.f32 %v7416_v14, %v3718_v36  ;;  %5514 = vmatprep.subr.bf16.mxu0 %v4059_v20 }
 0x8bc   : > { %5515 = vmatpush3.bf16.msra.mxu0 %v4059_v20 }
 0x8bd   : > { %v5467_v29 = vpop.f32.mrb[166].mxu0  ;;  %v4060_v43 = vpack.c.bf16 %v3724_v32, %v3719_v11 }
 0x8be   : > { %v3734_v60 = vadd.f32 %v5467_v29, %v7416_v14  ;;  %v3728_v51 = vpop.f32.mrb[167].mxu0 }
 0x8bf   : > { %v3729_v13 = vadd.f32 %v7416_v14, %v3728_v51  ;;  %5516 = vmatprep.subr.bf16.mxu0 %v4060_v43 }
 0x8c0   : > { %5517 = vmatpush3.bf16.msra.mxu0 %v4060_v43 }
 0x8c1   : > { %v5470_v33 = vpop.f32.mrb[168].mxu0  ;;  %v4061_v58 = vpack.c.bf16 %v3734_v60, %v3729_v13 }
 0x8c2   : > { %v3744_v35 = vadd.f32 %v5470_v33, %v7416_v14  ;;  %v3738_v41 = vpop.f32.mrb[169].mxu0 }
 0x8c3   : > { %v3739_v34 = vadd.f32 %v7416_v14, %v3738_v41  ;;  %5518 = vmatprep.subr.bf16.mxu0 %v4061_v58 }
 0x8c4   : > { %5519 = vmatpush3.bf16.msra.mxu0 %v4061_v58 }
 0x8c5   : > { %v4062_v11 = vpack.c.bf16 %v3744_v35, %v3739_v34  ;;  %v5473_v13 = vpop.f32.mrb[170].mxu0 }
 0x8c6   : > { %v3748_v43 = vpop.f32.mrb[171].mxu0  ;;  %v3754_v33 = vadd.f32 %v5473_v13, %v7416_v14 }
 0x8c7   : > { %5520 = vmatprep.subr.bf16.mxu0 %v4062_v11  ;;  %v3749_v35 = vadd.f32 %v7416_v14, %v3748_v43 }
 0x8c8   : > { %5521 = vmatpush3.bf16.msra.mxu0 %v4062_v11 }
 0x8c9   : > { %v4063_v58 = vpack.c.bf16 %v3754_v33, %v3749_v35  ;;  %v5476_v34 = vpop.f32.mrb[172].mxu0 }
 0x8ca   : > { %v3758_v38 = vpop.f32.mrb[173].mxu0  ;;  %v3764_v53 = vadd.f32 %v5476_v34, %v7416_v14 }
 0x8cb   : > { %v3759_v10 = vadd.f32 %v7416_v14, %v3758_v38  ;;  %5522 = vmatprep.subr.bf16.mxu0 %v4063_v58 }
 0x8cc   : > { %5523 = vmatpush3.bf16.msra.mxu0 %v4063_v58  ;;  %v7825_v58 = vld [vmem:[#allocation39_spill] sm:$0xff] }
 0x8cd   : > { %v4064_v43 = vpack.c.bf16 %v3764_v53, %v3759_v10  ;;  %v5479_v33 = vpop.f32.mrb[174].mxu0  ;;  %v7820_v10 = vld [vmem:[#allocation34_spill] sm:$0xff]  ;;  %v7822_v53 = vld [vmem:[#allocation36_spill] sm:$0xff] }
 0x8ce   : > { %v3768_v35 = vpop.f32.mrb[175].mxu0  ;;  %v3774_v3 = vadd.f32 %v5479_v33, %v7416_v14 }
 0x8cf   : > { %v3769_v21 = vadd.f32 %v7416_v14, %v3768_v35  ;;  %5524 = vmatprep.subr.bf16.mxu0 %v4064_v43  ;;  %v7824_v14 = vld [vmem:[#allocation38_spill] sm:$0xff] }
 0x8d0   : > { %5525 = vmatpush3.bf16.msra.mxu0 %v4064_v43 }
 0x8d1   : > { %v4065_v38 = vpack.c.bf16 %v3774_v3, %v3769_v21  ;;  %v7821_v21 = vld [vmem:[#allocation35_spill] sm:$0xff]  ;;  %v7823_v3 = vld [vmem:[#allocation37_spill] sm:$0xff] }
 0x8d3   : > { %5526 = vmatprep.subr.bf16.mxu0 %v4065_v38 }
 0x8d4   : > { %5527 = vmatpush3.bf16.msra.mxu0 %v4065_v38 }
 0x96e   : > { %v7420_v27 = vpop.f32.mrb[112].mxu1 }
 0x96f   : > { %v7422_v31 = vpop.f32.mrb[113].mxu1 }
 0x970   : > { %3938 = vmax.xlane.f32.xlu0 %v7422_v31  ;;  %v7426_v19 = vpop.f32.mrb[114].mxu1 }
 0x971   : > { %v7429_v46 = vpop.f32.mrb[115].mxu1 }
 0x972   : > { %3940 = vmax.xlane.f32.xlu1 %v7429_v46 }
 0x974   : > { %3942 = vmax.xlane.f32.xlu0 %v7420_v27 }
 0x976   : > { %3944 = vmax.xlane.f32.xlu1 %v7426_v19  ;;  %v7439_v5 = vpop.f32.mrb[116].mxu1 }
 0x977   : > { %v7442_v36 = vpop.f32.mrb[117].mxu1 }
 0x978   : > { %3946 = vmax.xlane.f32.xlu0 %v7442_v36  ;;  %v7445_v32 = vpop.f32.mrb[118].mxu1 }
 0x979   : > { %v7447_v29 = vpop.f32.mrb[119].mxu1 }
 0x97a   : > { %3948 = vmax.xlane.f32.xlu1 %v7447_v29 }
 0x97c   : > { %3950 = vmax.xlane.f32.xlu0 %v7439_v5 }
 0x97e   : > { %3952 = vmax.xlane.f32.xlu1 %v7445_v32  ;;  %v7452_v20 = vpop.f32.mrb[120].mxu1 }
 0x97f   : > { %v7454_v41 = vpop.f32.mrb[121].mxu1 }
 0x980   : > { %3954 = vmax.xlane.f32.xlu0 %v7454_v41  ;;  %v7457_v60 = vpop.f32.mrb[122].mxu1 }
 0x981   : > { %v7459_v51 = vpop.f32.mrb[123].mxu1 }
 0x982   : > { %3956 = vmax.xlane.f32.xlu1 %v7459_v51 }
 0x984   : > { %3958 = vmax.xlane.f32.xlu0 %v7452_v20 }
 0x986   : > { %3960 = vmax.xlane.f32.xlu1 %v7457_v60  ;;  %v7466_v40 = vpop.f32.mrb[124].mxu1 }
 0x987   : > { %v7468_v8 = vpop.f32.mrb[125].mxu1 }
 0x988   : > { %3962 = vmax.xlane.f32.xlu0 %v7468_v8  ;;  %v7473_v11 = vpop.f32.mrb[126].mxu1 }
 0x989   : > { %v7475_v13 = vpop.f32.mrb[127].mxu1 }
 0x98a   : > { %3964 = vmax.xlane.f32.xlu1 %v7475_v13 }
 0x98c   : > { %3966 = vmax.xlane.f32.xlu0 %v7466_v40 }
 0x98e   : > { %3968 = vmax.xlane.f32.xlu1 %v7473_v11 }
 0x990   : > { %1154 = vadd.xlane.f32.xlu0 %v6484_v30  ;;  %v7807_v30 = vld [vmem:[#allocation6_spill] sm:$0xff] }
 0x992   : > { %1156 = vadd.xlane.f32.xlu1 %v6489_v50  ;;  %v7809_v50 = vld [vmem:[#allocation8_spill] sm:$0xff] }
 0x994   : > { %1158 = vadd.xlane.f32.xlu0 %v6492_v49  ;;  %v7810_v49 = vld [vmem:[#allocation24_spill] sm:$0xff] }
 0x996   : > { %1160 = vadd.xlane.f32.xlu1 %v6487_v48  ;;  %v7808_v48 = vld [vmem:[#allocation7_spill] sm:$0xff] }
 0x998   : > { %1162 = vadd.xlane.f32.xlu0 %v6500_v57  ;;  %v7811_v57 = vld [vmem:[#allocation25_spill] sm:$0xff] }
 0x99a   : > { %1164 = vadd.xlane.f32.xlu1 %v6503_v62  ;;  %v7812_v62 = vld [vmem:[#allocation26_spill] sm:$0xff] }
 0x99c   : > { %1166 = vadd.xlane.f32.xlu0 %v6509_v47  ;;  %v7813_v47 = vld [vmem:[#allocation27_spill] sm:$0xff] }
 0x99e   : > { %1168 = vadd.xlane.f32.xlu1 %v6511_v39  ;;  %v7814_v39 = vld [vmem:[#allocation28_spill] sm:$0xff] }
 0x9a0   : > { %1170 = vadd.xlane.f32.xlu0 %v6517_v59  ;;  %v7815_v59 = vld [vmem:[#allocation29_spill] sm:$0xff] }
 0x9a2   : > { %1172 = vadd.xlane.f32.xlu1 %v6519_v63  ;;  %v7816_v63 = vld [vmem:[#allocation30_spill] sm:$0xff] }
 0x9a4   : > { %1174 = vadd.xlane.f32.xlu0 %v6523_v52  ;;  %v7817_v52 = vld [vmem:[#allocation31_spill] sm:$0xff] }
 0x9a6   : > { %1176 = vadd.xlane.f32.xlu1 %v6525_v1  ;;  %v7818_v1 = vld [vmem:[#allocation32_spill] sm:$0xff] }
 0x9a8   : > { %1178 = vadd.xlane.f32.xlu0 %v6529_v61  ;;  %v7819_v61 = vld [vmem:[#allocation33_spill] sm:$0xff] }
 0x9aa   : > { %1180 = vadd.xlane.f32.xlu1 %v7807_v30 }
 0x9ac   : > { %1182 = vadd.xlane.f32.xlu0 %v7808_v48 }
 0x9ae   : > { %1184 = vadd.xlane.f32.xlu1 %v7809_v50 }
 0x9b0   : > { %2069 = vadd.xlane.f32.xlu0 %v7810_v49 }
 0x9b2   : > { %2071 = vadd.xlane.f32.xlu1 %v7811_v57 }
 0x9b4   : > { %2073 = vadd.xlane.f32.xlu0 %v7812_v62 }
 0x9b6   : > { %2075 = vadd.xlane.f32.xlu1 %v7813_v47 }
 0x9b8   : > { %2077 = vadd.xlane.f32.xlu0 %v7814_v39 }
 0x9ba   : > { %2079 = vadd.xlane.f32.xlu1 %v7815_v59 }
 0x9bc   : > { %2081 = vadd.xlane.f32.xlu0 %v7816_v63 }
 0x9be   : > { %2083 = vadd.xlane.f32.xlu1 %v7817_v52 }
 0x9c0   : > { %2085 = vadd.xlane.f32.xlu0 %v7818_v1 }
 0x9c2   : > { %2087 = vadd.xlane.f32.xlu1 %v7819_v61 }
 0x9c4   : > { %2089 = vadd.xlane.f32.xlu0 %v7820_v10 }
 0x9c6   : > { %2091 = vadd.xlane.f32.xlu1 %v7821_v21 }
 0x9c8   : > { %2093 = vadd.xlane.f32.xlu0 %v7822_v53 }
 0x9ca   : > { %2095 = vadd.xlane.f32.xlu1 %v7823_v3 }
 0x9cc   : > { %2097 = vadd.xlane.f32.xlu0 %v7824_v14 }
 0x9ce   : > { %2099 = vadd.xlane.f32.xlu1 %v7825_v58 }
 0x9d0   : > { %3109 = vadd.xlane.f32.xlu0 %v7228_v0 }
 0x9d2   : > { %3111 = vadd.xlane.f32.xlu1 %v7230_v45 }
 0x9d4   : > { %3113 = vadd.xlane.f32.xlu0 %v7236_v12 }
 0x9d6   : > { %3115 = vadd.xlane.f32.xlu1 %v7238_v22 }
 0x9d8   : > { %3117 = vadd.xlane.f32.xlu0 %v7244_v42 }
 0x9da   : > { %3119 = vadd.xlane.f32.xlu1 %v7246_v25 }
 0x9dc   : > { %3121 = vadd.xlane.f32.xlu0 %v7253_v54 }
 0x9de   : > { %3123 = vadd.xlane.f32.xlu1 %v7255_v18 }
 0x9e0   : > { %3125 = vadd.xlane.f32.xlu0 %v7261_v26 }
 0x9e2   : > { %3127 = vadd.xlane.f32.xlu1 %v7263_v24 }
 0x9e4   : > { %3129 = vadd.xlane.f32.xlu0 %v7267_v6 }
 0x9e6   : > { %3131 = vadd.xlane.f32.xlu1 %v7269_v4 }
 0x9e8   : > { %3133 = vadd.xlane.f32.xlu0 %v7273_v9 }
 0x9ea   : > { %3135 = vadd.xlane.f32.xlu1 %v7275_v37 }
 0x9ec   : > { %3137 = vadd.xlane.f32.xlu0 %v7279_v16 }
 0x9ee   : > { %3139 = vadd.xlane.f32.xlu1 %v7281_v44 }
 0x9fd   : > { %v3939_v0 = vpop.xlane.xlu0 %3938 }
 0x9fe   : > { %v3970_v45 = vsub.f32 %v7422_v31, %v3939_v0 }
 0x9ff   : > { %v3941_v12 = vpop.xlane.xlu1 %3940 }
 0xa00   : > { %v3986_v22 = vmul.f32 1.442695, %v3970_v45  ;;  %v3971_v42 = vsub.f32 %v7429_v46, %v3941_v12 }
 0xa01   : > { %v3943_v25 = vpop.xlane.xlu0 %3942 }
 0xa02   : > { %v3988_v54 = vmul.f32 1.442695, %v3971_v42  ;;  %v3972_v18 = vsub.f32 %v7420_v27, %v3943_v25  ;;  %5713 = vpow2.f32 %v3986_v22 }
 0xa03   : > { %v3945_v26 = vpop.xlane.xlu1 %3944 }
 0xa04   : > { %5715 = vpow2.f32 %v3988_v54  ;;  %v3990_v24 = vmul.f32 1.442695, %v3972_v18  ;;  %v3973_v6 = vsub.f32 %v7426_v19, %v3945_v26 }
 0xa05   : > { %v3947_v4 = vpop.xlane.xlu0 %3946 }
 0xa06   : > { %5717 = vpow2.f32 %v3990_v24  ;;  %v3992_v9 = vmul.f32 1.442695, %v3973_v6  ;;  %v3974_v37 = vsub.f32 %v7442_v36, %v3947_v4 }
 0xa07   : > { %v3949_v16 = vpop.xlane.xlu1 %3948 }
 0xa08   : > { %5719 = vpow2.f32 %v3992_v9  ;;  %v3994_v44 = vmul.f32 1.442695, %v3974_v37  ;;  %v3975_v31 = vsub.f32 %v7447_v29, %v3949_v16 }
 0xa09   : > { %v3951_v46 = vpop.xlane.xlu0 %3950 }
 0xa0a   : > { %v3996_v34 = vmul.f32 1.442695, %v3975_v31  ;;  %v3976_v27 = vsub.f32 %v7439_v5, %v3951_v46  ;;  %5721 = vpow2.f32 %v3994_v44 }
 0xa0b   : > { %v3953_v43 = vpop.xlane.xlu1 %3952 }
 0xa0c   : > { %5723 = vpow2.f32 %v3996_v34  ;;  %v3998_v33 = vmul.f32 1.442695, %v3976_v27  ;;  %v3977_v19 = vsub.f32 %v7445_v32, %v3953_v43  ;;  %v5714_v35 = vpop.eup %5713 }
 0xa0d   : > { %v3955_v38 = vpop.xlane.xlu0 %3954 }
 0xa0e   : > { %v5716_v30 = vpop.eup %5715  ;;  %5725 = vpow2.f32 %v3998_v33  ;;  %v4000_v36 = vmul.f32 1.442695, %v3977_v19  ;;  %v3978_v48 = vsub.f32 %v7454_v41, %v3955_v38 }
 0xa0f   : > { %v3957_v50 = vpop.xlane.xlu1 %3956  ;;  %v4050_v49 = vpack.c.bf16 %v5716_v30, %v5714_v35 }
 0xa10   : > { %v5718_v29 = vpop.eup %5717  ;;  %5727 = vpow2.f32 %v4000_v36  ;;  %v4002_v57 = vmul.f32 1.442695, %v3978_v48  ;;  %v3979_v5 = vsub.f32 %v7459_v51, %v3957_v50 }
 0xa11   : > { %5528 = vmatprep.mubr.bf16.mxu0 %v4050_v49  ;;  %v3959_v62 = vpop.xlane.xlu0 %3958  ;;  %4022 = vadd.xlane.f32.xlu0 %v5718_v29  ;;  %v7827_v49 = vld [vmem:[#allocation11_spill] sm:$0xff] }
 0xa12   : > { %v5720_v47 = vpop.eup %5719  ;;  %v4004_v39 = vmul.f32 1.442695, %v3979_v5  ;;  %v3980_v32 = vsub.f32 %v7452_v20, %v3959_v62  ;;  %5729 = vpow2.f32 %v4002_v57  ;;  %v7828_v57 = vld [vmem:[#allocation5_spill] sm:$0xff] }
 0xa13   : > { %v3961_v59 = vpop.xlane.xlu1 %3960  ;;  %4024 = vadd.xlane.f32.xlu1 %v5720_v47  ;;  %v4051_v63 = vpack.c.bf16 %v5720_v47, %v5718_v29 }
 0xa14   : > { %5731 = vpow2.f32 %v4004_v39  ;;  %v4006_v41 = vmul.f32 1.442695, %v3980_v32  ;;  %v3981_v52 = vsub.f32 %v7457_v60, %v3961_v59  ;;  %v5722_v1 = vpop.eup %5721  ;;  %v7829_v39 = vld [vmem:[#allocation10_spill] sm:$0xff] }
 0xa15   : > { %5529 = vmatmul.mubr.bf16.vlgmr.msra.gmra.mrb[176].mxu0 %v4051_v63  ;;  %4018 = vadd.xlane.f32.xlu0 %v5714_v35  ;;  %v3963_v61 = vpop.xlane.xlu0 %3962  ;;  %v7826_v35 = vld [vmem:[#allocation9_spill] sm:$0xff] }
 0xa16   : > { %v5724_v51 = vpop.eup %5723  ;;  %5733 = vpow2.f32 %v4006_v41  ;;  %v4008_v10 = vmul.f32 1.442695, %v3981_v52  ;;  %v3982_v21 = vsub.f32 %v7468_v8, %v3963_v61  ;;  %v7830_v41 = vld [vmem:[#allocation13_spill] sm:$0xff] }
 0xa17   : > { %4020 = vadd.xlane.f32.xlu1 %v5716_v30  ;;  %v3965_v53 = vpop.xlane.xlu1 %3964  ;;  %v4052_v20 = vpack.c.bf16 %v5724_v51, %v5722_v1 }
 0xa18   : > { %v5726_v3 = vpop.eup %5725  ;;  %5735 = vpow2.f32 %v4008_v10  ;;  %v4010_v14 = vmul.f32 1.442695, %v3982_v21  ;;  %v3983_v58 = vsub.f32 %v7475_v13, %v3965_v53 }
 0xa19   : > { %5532 = vmatprep.mubr.bf16.mxu0 %v4052_v20  ;;  %4030 = vadd.xlane.f32.xlu0 %v5726_v3  ;;  %v3967_v60 = vpop.xlane.xlu0 %3966  ;;  %v7832_v20 = vld [vmem:[#allocation12_spill] sm:$0xff] }
 0xa1a   : > { %v5728_v0 = vpop.eup %5727  ;;  %v4012_v45 = vmul.f32 1.442695, %v3983_v58  ;;  %v3984_v12 = vsub.f32 %v7466_v40, %v3967_v60  ;;  %5737 = vpow2.f32 %v4010_v14  ;;  %v7833_v60 = vld [vmem:[#allocation14_spill] sm:$0xff] }
 0xa1b   : > { %4032 = vadd.xlane.f32.xlu1 %v5728_v0  ;;  %v3969_v22 = vpop.xlane.xlu1 %3968  ;;  %v4053_v42 = vpack.c.bf16 %v5728_v0, %v5726_v3 }
 0xa1c   : > { %5739 = vpow2.f32 %v4012_v45  ;;  %v4014_v8 = vmul.f32 1.442695, %v3984_v12  ;;  %v3985_v25 = vsub.f32 %v7473_v11, %v3969_v22  ;;  %v5730_v54 = vpop.eup %5729  ;;  %v7834_v22 = vld [vmem:[#allocation17_spill] sm:$0xff] }
 0xa1d   : > { %5533 = vmatmul.mubr.bf16.gmra.mrb[180].mxu0 %v4053_v42  ;;  %4026 = vadd.xlane.f32.xlu0 %v5722_v1  ;;  %v1155_v18 = vpop.xlane.xlu0 %1154 }
 0xa1e   : > { %v5732_v13 = vpop.eup %5731  ;;  %5741 = vpow2.f32 %v4014_v8  ;;  %v4016_v26 = vmul.f32 1.442695, %v3985_v25 }
 0xa1f   : > { %5743 = vrcp.f32 %v1155_v18  ;;  %4028 = vadd.xlane.f32.xlu1 %v5724_v51  ;;  %v1157_v24 = vpop.xlane.xlu1 %1156  ;;  %v4054_v40 = vpack.c.bf16 %v5732_v13, %v5730_v54  ;;  %v7831_v51 = vld [vmem:[#allocation15_spill] sm:$0xff] }
 0xa20   : > { %v5734_v6 = vpop.eup %5733  ;;  %5745 = vpow2.f32 %v4016_v26 }
 0xa21   : > { %5747 = vrcp.f32 %v1157_v24  ;;  %5536 = vmatprep.mubr.bf16.mxu0 %v4054_v40  ;;  %4038 = vadd.xlane.f32.xlu0 %v5734_v6  ;;  %v1159_v4 = vpop.xlane.xlu0 %1158  ;;  %v7836_v24 = vld [vmem:[#allocation16_spill] sm:$0xff] }
 0xa22   : > { %v5736_v11 = vpop.eup %5735  ;;  %5749 = vrcp.f32 %v1159_v4 }
 0xa23   : > { %4040 = vadd.xlane.f32.xlu1 %v5736_v11  ;;  %v1161_v9 = vpop.xlane.xlu1 %1160  ;;  %v4055_v37 = vpack.c.bf16 %v5736_v11, %v5734_v6  ;;  %v7837_v11 = vld [vmem:[#allocation18_spill] sm:$0xff] }
 0xa24   : > { %5751 = vrcp.f32 %v1161_v9  ;;  %v5738_v16 = vpop.eup %5737 }
 0xa25   : > { %5537 = vmatmul.mubr.bf16.gmra.mrb[184].mxu0 %v4055_v37  ;;  %4034 = vadd.xlane.f32.xlu0 %v5730_v54  ;;  %v1163_v44 = vpop.xlane.xlu0 %1162  ;;  %v7835_v54 = vld [vmem:[#allocation19_spill] sm:$0xff] }
 0xa26   : > { %v5740_v31 = vpop.eup %5739  ;;  %5753 = vrcp.f32 %v1163_v44  ;;  %v7838_v44 = vld [vmem:[#allocation21_spill] sm:$0xff] }
 0xa27   : > { %4036 = vadd.xlane.f32.xlu1 %v5732_v13  ;;  %v1165_v46 = vpop.xlane.xlu1 %1164  ;;  %v4056_v34 = vpack.c.bf16 %v5740_v31, %v5738_v16 }
 0xa28   : > { %v5742_v27 = vpop.eup %5741  ;;  %5755 = vrcp.f32 %v1165_v46 }
 0xa29   : > { %v5744_v43 = vpop.eup %5743  ;;  %4042 = vadd.xlane.f32.xlu0 %v5738_v16  ;;  %v1167_v33 = vpop.xlane.xlu0 %1166  ;;  %5540 = vmatprep.mubr.bf16.mxu0 %v4056_v34 }
 0xa2a   : > { %v5746_v19 = vpop.eup %5745  ;;  %v1331_v38 = vmul.f32 %v5744_v43, %v7826_v35  ;;  %5757 = vrcp.f32 %v1167_v33  ;;  %v7840_v35 = vld [vmem:[#allocation20_spill] sm:$0xff] }
 0xa2b   : > { %v5748_v30 = vpop.eup %5747  ;;  %4044 = vadd.xlane.f32.xlu1 %v5740_v31  ;;  %v1169_v36 = vpop.xlane.xlu1 %1168  ;;  %v4057_v48 = vpack.c.bf16 %v5746_v19, %v5742_v27 }
 0xa2c   : > { %v5750_v50 = vpop.eup %5749  ;;  %1347 = vst [vmem:[%s7550_s10] sm:$0xff] %v1331_v38  ;;  %v1332_v29 = vmul.f32 %v5748_v30, %v7827_v49  ;;  %5759 = vrcp.f32 %v1169_v36 }
 0xa2d   : > { %v1333_v5 = vmul.f32 %v5750_v50, %v7828_v57  ;;  %4046 = vadd.xlane.f32.xlu0 %v5742_v27  ;;  %v1171_v62 = vpop.xlane.xlu0 %1170  ;;  %5541 = vmatmul.mubr.bf16.gmra.mrb[188].mxu0 %v4057_v48  ;;  %v7839_v27 = vld [vmem:[#allocation23_spill] sm:$0xff]  ;;  %v7841_v48 = vld [vmem:[#allocation22_spill] sm:$0xff]  ;;  %v7842_v57 = vld [vmem:[#allocation41_spill] sm:$0xff] }
 0xa2e   : > { %v5752_v47 = vpop.eup %5751  ;;  %1348 = vst [vmem:[%s7550_s10 + $0x10] sm:$0xff] %v1332_v29  ;;  %5761 = vrcp.f32 %v1171_v62 }
 0xa2f   : > { %1349 = vst [vmem:[%s7550_s10 + $0x20] sm:$0xff] %v1333_v5  ;;  %v1334_v32 = vmul.f32 %v5752_v47, %v7829_v39  ;;  %4048 = vadd.xlane.f32.xlu1 %v5746_v19  ;;  %v1173_v59 = vpop.xlane.xlu1 %1172  ;;  %v7843_v39 = vld [vmem:[#allocation43_spill] sm:$0xff] }
 0xa30   : > { %v5754_v63 = vpop.eup %5753  ;;  %5763 = vrcp.f32 %v1173_v59 }
 0xa31   : > { %1350 = vst [vmem:[%s7550_s10 + $0x30] sm:$0xff] %v1334_v32  ;;  %v1335_v52 = vmul.f32 %v5754_v63, %v7830_v41  ;;  %v1175_v1 = vpop.xlane.xlu0 %1174  ;;  %v7844_v41 = vld [vmem:[#allocation40_spill] sm:$0xff] }
 0xa32   : > { %v5756_v61 = vpop.eup %5755  ;;  %5765 = vrcp.f32 %v1175_v1 }
 0xa33   : > { %1351 = vst [vmem:[%s7550_s10 + $0x40] sm:$0xff] %v1335_v52  ;;  %v1336_v10 = vmul.f32 %v5756_v61, %v7831_v51  ;;  %v1177_v21 = vpop.xlane.xlu1 %1176  ;;  %v7845_v51 = vld [vmem:[#allocation42_spill] sm:$0xff] }
 0xa34   : > { %v5758_v53 = vpop.eup %5757  ;;  %5767 = vrcp.f32 %v1177_v21 }
 0xa35   : > { %1352 = vst [vmem:[%s7550_s10 + $0x50] sm:$0xff] %v1336_v10  ;;  %v1337_v3 = vmul.f32 %v5758_v53, %v7832_v20  ;;  %v1179_v14 = vpop.xlane.xlu0 %1178  ;;  %v7846_v20 = vld [vmem:[#allocation45_spill] sm:$0xff] }
 0xa36   : > { %v5760_v58 = vpop.eup %5759  ;;  %5769 = vrcp.f32 %v1179_v14 }
 0xa37   : > { %1353 = vst [vmem:[%s7550_s10 + $0x60] sm:$0xff] %v1337_v3  ;;  %v1338_v0 = vmul.f32 %v5760_v58, %v7833_v60  ;;  %v1181_v45 = vpop.xlane.xlu1 %1180  ;;  %v7847_v60 = vld [vmem:[#allocation47_spill] sm:$0xff] }
 0xa38   : > { %v5762_v12 = vpop.eup %5761  ;;  %5771 = vrcp.f32 %v1181_v45 }
 0xa39   : > { %1354 = vst [vmem:[%s7550_s10 + $0x70] sm:$0xff] %v1338_v0  ;;  %v1339_v42 = vmul.f32 %v5762_v12, %v7834_v22  ;;  %v1183_v8 = vpop.xlane.xlu0 %1182  ;;  %v7848_v22 = vld [vmem:[#allocation44_spill] sm:$0xff] }
 0xa3a   : > { %v5764_v25 = vpop.eup %5763  ;;  %5773 = vrcp.f32 %v1183_v8 }
 0xa3b   : > { %1355 = vst [vmem:[%s7550_s10 + $0x80] sm:$0xff] %v1339_v42  ;;  %v1340_v18 = vmul.f32 %v5764_v25, %v7835_v54  ;;  %v1185_v13 = vpop.xlane.xlu1 %1184  ;;  %v7849_v54 = vld [vmem:[#allocation46_spill] sm:$0xff] }
 0xa3c   : > { %v5766_v26 = vpop.eup %5765  ;;  %5775 = vrcp.f32 %v1185_v13 }
 0xa3d   : > { %1356 = vst [vmem:[%s7550_s10 + $0x90] sm:$0xff] %v1340_v18  ;;  %v1341_v40 = vmul.f32 %v5766_v26, %v7836_v24  ;;  %v2070_v6 = vpop.xlane.xlu0 %2069  ;;  %v7850_v24 = vld [vmem:[#allocation49_spill] sm:$0xff] }
 0xa3e   : > { %v5768_v4 = vpop.eup %5767  ;;  %5777 = vrcp.f32 %v2070_v6 }
 0xa3f   : > { %1357 = vst [vmem:[%s7550_s10 + $0xa0] sm:$0xff] %v1341_v40  ;;  %v1342_v9 = vmul.f32 %v5768_v4, %v7837_v11  ;;  %v2072_v37 = vpop.xlane.xlu1 %2071  ;;  %v7851_v11 = vld [vmem:[#allocation51_spill] sm:$0xff] }
 0xa40   : > { %v5770_v16 = vpop.eup %5769  ;;  %5779 = vrcp.f32 %v2072_v37 }
 0xa41   : > { %1358 = vst [vmem:[%s7550_s10 + $0xb0] sm:$0xff] %v1342_v9  ;;  %v1343_v31 = vmul.f32 %v5770_v16, %v7838_v44  ;;  %v2074_v46 = vpop.xlane.xlu0 %2073  ;;  %v7852_v44 = vld [vmem:[#allocation48_spill] sm:$0xff] }
 0xa42   : > { %v5772_v34 = vpop.eup %5771  ;;  %5781 = vrcp.f32 %v2074_v46 }
 0xa43   : > { %1359 = vst [vmem:[%s7550_s10 + $0xc0] sm:$0xff] %v1343_v31  ;;  %v1344_v43 = vmul.f32 %v5772_v34, %v7839_v27  ;;  %v2076_v33 = vpop.xlane.xlu1 %2075  ;;  %v7853_v27 = vld [vmem:[#allocation50_spill] sm:$0xff] }
 0xa44   : > { %v5774_v19 = vpop.eup %5773  ;;  %5783 = vrcp.f32 %v2076_v33 }
 0xa45   : > { %1360 = vst [vmem:[%s7550_s10 + $0xd0] sm:$0xff] %v1344_v43  ;;  %v1345_v38 = vmul.f32 %v5774_v19, %v7840_v35  ;;  %v2078_v30 = vpop.xlane.xlu0 %2077  ;;  %v7854_v35 = vld [vmem:[#allocation53_spill] sm:$0xff] }
 0xa46   : > { %v5776_v36 = vpop.eup %5775  ;;  %5785 = vrcp.f32 %v2078_v30 }
 0xa47   : > { %1361 = vst [vmem:[%s7550_s10 + $0xe0] sm:$0xff] %v1345_v38  ;;  %v1346_v50 = vmul.f32 %v5776_v36, %v7841_v48  ;;  %v2080_v49 = vpop.xlane.xlu1 %2079  ;;  %v7855_v48 = vld [vmem:[#allocation55_spill] sm:$0xff] }
 0xa48   : > { %v5778_v29 = vpop.eup %5777  ;;  %5787 = vrcp.f32 %v2080_v49 }
 0xa49   : > { %1362 = vst [vmem:[%s7550_s10 + $0xf0] sm:$0xff] %v1346_v50  ;;  %v2246_v5 = vmul.f32 %v5778_v29, %v7842_v57  ;;  %v2082_v62 = vpop.xlane.xlu0 %2081  ;;  %v7856_v57 = vld [vmem:[#allocation52_spill] sm:$0xff] }
 0xa4a   : > { %v5780_v47 = vpop.eup %5779  ;;  %5789 = vrcp.f32 %v2082_v62 }
 0xa4b   : > { %4448 = vst [vmem:[%s7550_s10 + $0x100] sm:$0xff] %v2246_v5  ;;  %v2247_v32 = vmul.f32 %v5780_v47, %v7843_v39  ;;  %v2084_v59 = vpop.xlane.xlu1 %2083  ;;  %v7857_v39 = vld [vmem:[#allocation54_spill] sm:$0xff] }
 0xa4c   : > { %v5782_v63 = vpop.eup %5781  ;;  %5791 = vrcp.f32 %v2084_v59 }
 0xa4d   : > { %4449 = vst [vmem:[%s7550_s10 + $0x110] sm:$0xff] %v2247_v32  ;;  %v2248_v52 = vmul.f32 %v5782_v63, %v7844_v41  ;;  %v2086_v1 = vpop.xlane.xlu0 %2085 }
 0xa4e   : > { %v5784_v61 = vpop.eup %5783  ;;  %5793 = vrcp.f32 %v2086_v1 }
 0xa4f   : > { %4450 = vst [vmem:[%s7550_s10 + $0x120] sm:$0xff] %v2248_v52  ;;  %v2249_v10 = vmul.f32 %v5784_v61, %v7845_v51  ;;  %v2088_v21 = vpop.xlane.xlu1 %2087 }
 0xa50   : > { %v5786_v53 = vpop.eup %5785  ;;  %5795 = vrcp.f32 %v2088_v21 }
 0xa51   : > { %4451 = vst [vmem:[%s7550_s10 + $0x130] sm:$0xff] %v2249_v10  ;;  %v2250_v3 = vmul.f32 %v5786_v53, %v7846_v20  ;;  %v2090_v14 = vpop.xlane.xlu0 %2089 }
 0xa52   : > { %v5788_v58 = vpop.eup %5787  ;;  %5797 = vrcp.f32 %v2090_v14 }
 0xa53   : > { %4452 = vst [vmem:[%s7550_s10 + $0x140] sm:$0xff] %v2250_v3  ;;  %v2251_v0 = vmul.f32 %v5788_v58, %v7847_v60  ;;  %v2092_v45 = vpop.xlane.xlu1 %2091 }
 0xa54   : > { %v5790_v12 = vpop.eup %5789  ;;  %5799 = vrcp.f32 %v2092_v45 }
 0xa55   : > { %4453 = vst [vmem:[%s7550_s10 + $0x150] sm:$0xff] %v2251_v0  ;;  %v2252_v42 = vmul.f32 %v5790_v12, %v7848_v22  ;;  %v2094_v8 = vpop.xlane.xlu0 %2093 }
 0xa56   : > { %v5792_v25 = vpop.eup %5791  ;;  %5801 = vrcp.f32 %v2094_v8 }
 0xa57   : > { %4454 = vst [vmem:[%s7550_s10 + $0x160] sm:$0xff] %v2252_v42  ;;  %v2253_v18 = vmul.f32 %v5792_v25, %v7849_v54  ;;  %v2096_v13 = vpop.xlane.xlu1 %2095 }
 0xa58   : > { %v5794_v26 = vpop.eup %5793  ;;  %5803 = vrcp.f32 %v2096_v13 }
 0xa59   : > { %4455 = vst [vmem:[%s7550_s10 + $0x170] sm:$0xff] %v2253_v18  ;;  %v2254_v40 = vmul.f32 %v5794_v26, %v7850_v24  ;;  %v2098_v6 = vpop.xlane.xlu0 %2097 }
 0xa5a   : > { %v5796_v4 = vpop.eup %5795  ;;  %5805 = vrcp.f32 %v2098_v6 }
 0xa5b   : > { %4456 = vst [vmem:[%s7550_s10 + $0x180] sm:$0xff] %v2254_v40  ;;  %v2255_v9 = vmul.f32 %v5796_v4, %v7851_v11  ;;  %v2100_v37 = vpop.xlane.xlu1 %2099  ;;  %v7861_v4 = vld [vmem:[#allocation58_spill] sm:$0xff] }
 0xa5c   : > { %v5798_v16 = vpop.eup %5797  ;;  %5807 = vrcp.f32 %v2100_v37  ;;  %v7862_v37 = vld [vmem:[#allocation61_spill] sm:$0xff] }
 0xa5d   : > { %4457 = vst [vmem:[%s7550_s10 + $0x190] sm:$0xff] %v2255_v9  ;;  %v2256_v31 = vmul.f32 %v5798_v16, %v7852_v44  ;;  %v3110_v46 = vpop.xlane.xlu0 %3109 }
 0xa5e   : > { %v5800_v34 = vpop.eup %5799  ;;  %5809 = vrcp.f32 %v3110_v46 }
 0xa5f   : > { %4458 = vst [vmem:[%s7550_s10 + $0x1a0] sm:$0xff] %v2256_v31  ;;  %v2257_v43 = vmul.f32 %v5800_v34, %v7853_v27  ;;  %v3112_v33 = vpop.xlane.xlu1 %3111  ;;  %v7863_v31 = vld [vmem:[#allocation63_spill] sm:$0xff]  ;;  %v7864_v27 = vld [vmem:[#allocation60_spill] sm:$0xff] }
 0xa60   : > { %v5802_v19 = vpop.eup %5801  ;;  %5811 = vrcp.f32 %v3112_v33 }
 0xa61   : > { %4459 = vst [vmem:[%s7550_s10 + $0x1b0] sm:$0xff] %v2257_v43  ;;  %v2258_v38 = vmul.f32 %v5802_v19, %v7854_v35  ;;  %v3114_v30 = vpop.xlane.xlu0 %3113  ;;  %v7865_v19 = vld [vmem:[#allocation62_spill] sm:$0xff] }
 0xa62   : > { %v5804_v36 = vpop.eup %5803  ;;  %5813 = vrcp.f32 %v3114_v30 }
 0xa63   : > { %4460 = vst [vmem:[%s7550_s10 + $0x1c0] sm:$0xff] %v2258_v38  ;;  %v2259_v50 = vmul.f32 %v5804_v36, %v7855_v48  ;;  %v3116_v49 = vpop.xlane.xlu1 %3115 }
 0xa64   : > { %v5806_v29 = vpop.eup %5805  ;;  %5815 = vrcp.f32 %v3116_v49 }
 0xa65   : > { %4461 = vst [vmem:[%s7550_s10 + $0x1d0] sm:$0xff] %v2259_v50  ;;  %v2260_v5 = vmul.f32 %v5806_v29, %v7856_v57  ;;  %v3118_v62 = vpop.xlane.xlu0 %3117 }
 0xa66   : > { %v5808_v47 = vpop.eup %5807  ;;  %5817 = vrcp.f32 %v3118_v62 }
 0xa67   : > { %4462 = vst [vmem:[%s7550_s10 + $0x1e0] sm:$0xff] %v2260_v5  ;;  %v2261_v32 = vmul.f32 %v5808_v47, %v7857_v39  ;;  %v3120_v59 = vpop.xlane.xlu1 %3119 }
 0xa68   : > { %v5810_v63 = vpop.eup %5809  ;;  %5819 = vrcp.f32 %v3120_v59 }
 0xa69   : > { %4463 = vst [vmem:[%s7550_s10 + $0x1f0] sm:$0xff] %v2261_v32  ;;  %v3286_v41 = vmul.f32 %v5810_v63, %v7372_v28  ;;  %v3122_v52 = vpop.xlane.xlu0 %3121 }
 0xa6a   : > { %v5812_v1 = vpop.eup %5811  ;;  %5821 = vrcp.f32 %v3122_v52 }
 0xa6b   : > { %3302 = vst [vmem:[%s7550_s10 + $0x8] sm:$0xff] %v3286_v41  ;;  %v3287_v61 = vmul.f32 %v5812_v1, %v7376_v2  ;;  %v3124_v51 = vpop.xlane.xlu1 %3123 }
 0xa6c   : > { %v5814_v10 = vpop.eup %5813  ;;  %5823 = vrcp.f32 %v3124_v51 }
 0xa6d   : > { %3303 = vst [vmem:[%s7550_s10 + $0x18] sm:$0xff] %v3287_v61  ;;  %v3288_v21 = vmul.f32 %v5814_v10, %v7370_v17  ;;  %v3126_v53 = vpop.xlane.xlu0 %3125 }
 0xa6e   : > { %v5816_v20 = vpop.eup %5815  ;;  %5825 = vrcp.f32 %v3126_v53 }
 0xa6f   : > { %3304 = vst [vmem:[%s7550_s10 + $0x28] sm:$0xff] %v3288_v21  ;;  %v3289_v28 = vmul.f32 %v5816_v20, %v7374_v23  ;;  %v3128_v3 = vpop.xlane.xlu1 %3127 }
 0xa70   : > { %v5818_v14 = vpop.eup %5817  ;;  %5827 = vrcp.f32 %v3128_v3 }
 0xa71   : > { %3305 = vst [vmem:[%s7550_s10 + $0x38] sm:$0xff] %v3289_v28  ;;  %v3290_v2 = vmul.f32 %v5818_v14, %v7380_v56  ;;  %v3130_v58 = vpop.xlane.xlu0 %3129 }
 0xa72   : > { %v5820_v60 = vpop.eup %5819  ;;  %5829 = vrcp.f32 %v3130_v58 }
 0xa73   : > { %3306 = vst [vmem:[%s7550_s10 + $0x48] sm:$0xff] %v3290_v2  ;;  %v3291_v17 = vmul.f32 %v5820_v60, %v7384_v55  ;;  %v3132_v0 = vpop.xlane.xlu1 %3131  ;;  %v7858_v55 = vld [vmem:[#allocation57_spill] sm:$0xff] }
 0xa74   : > { %v5822_v45 = vpop.eup %5821  ;;  %5831 = vrcp.f32 %v3132_v0 }
 0xa75   : > { %3307 = vst [vmem:[%s7550_s10 + $0x58] sm:$0xff] %v3291_v17  ;;  %v3292_v23 = vmul.f32 %v5822_v45, %v7378_v15  ;;  %v3134_v12 = vpop.xlane.xlu0 %3133  ;;  %v7859_v15 = vld [vmem:[#allocation59_spill] sm:$0xff] }
 0xa76   : > { %v5824_v22 = vpop.eup %5823  ;;  %5833 = vrcp.f32 %v3134_v12 }
 0xa77   : > { %3308 = vst [vmem:[%s7550_s10 + $0x68] sm:$0xff] %v3292_v23  ;;  %v3293_v56 = vmul.f32 %v5824_v22, %v7382_v7  ;;  %v3136_v42 = vpop.xlane.xlu1 %3135  ;;  %v7860_v7 = vld [vmem:[#allocation56_spill] sm:$0xff] }
 0xa78   : > { %v5826_v8 = vpop.eup %5825  ;;  %5835 = vrcp.f32 %v3136_v42 }
 0xa79   : > { %3309 = vst [vmem:[%s7550_s10 + $0x78] sm:$0xff] %v3293_v56  ;;  %v3294_v25 = vmul.f32 %v5826_v8, %v7858_v55  ;;  %v3138_v54 = vpop.xlane.xlu0 %3137 }
 0xa7a   : > { %v5828_v18 = vpop.eup %5827  ;;  %5837 = vrcp.f32 %v3138_v54 }
 0xa7b   : > { %3310 = vst [vmem:[%s7550_s10 + $0x88] sm:$0xff] %v3294_v25  ;;  %v3295_v13 = vmul.f32 %v5828_v18, %v7859_v15  ;;  %v3140_v26 = vpop.xlane.xlu1 %3139 }
 0xa7c   : > { %v5830_v24 = vpop.eup %5829  ;;  %5839 = vrcp.f32 %v3140_v26 }
 0xa7d   : > { %3311 = vst [vmem:[%s7550_s10 + $0x98] sm:$0xff] %v3295_v13  ;;  %v3296_v40 = vmul.f32 %v5830_v24, %v7860_v7 }
 0xa7e   : > { %v5832_v6 = vpop.eup %5831 }
 0xa7f   : > { %3312 = vst [vmem:[%s7550_s10 + $0xa8] sm:$0xff] %v3296_v40  ;;  %v3297_v11 = vmul.f32 %v5832_v6, %v7861_v4 }
 0xa80   : > { %v5834_v9 = vpop.eup %5833 }
 0xa81   : > { %3313 = vst [vmem:[%s7550_s10 + $0xb8] sm:$0xff] %v3297_v11  ;;  %v3298_v16 = vmul.f32 %v5834_v9, %v7862_v37 }
 0xa82   : > { %v5836_v44 = vpop.eup %5835 }
 0xa83   : > { %3314 = vst [vmem:[%s7550_s10 + $0xc8] sm:$0xff] %v3298_v16  ;;  %v3299_v46 = vmul.f32 %v5836_v44, %v7863_v31 }
 0xa84   : > { %v5838_v34 = vpop.eup %5837 }
 0xa85   : > { %3315 = vst [vmem:[%s7550_s10 + $0xd8] sm:$0xff] %v3299_v46  ;;  %v3300_v43 = vmul.f32 %v5838_v34, %v7864_v27 }
 0xa86   : > { %v5840_v33 = vpop.eup %5839 }
 0xa87   : > { %3316 = vst [vmem:[%s7550_s10 + $0xe8] sm:$0xff] %v3300_v43  ;;  %v3301_v35 = vmul.f32 %v5840_v33, %v7865_v19 }
 0xa89   : > { %3317 = vst [vmem:[%s7550_s10 + $0xf8] sm:$0xff] %v3301_v35 }
 0xa9e   : > { %v4023_v38 = vpop.xlane.xlu0 %4022 }
 0xa9f   : > { %5841 = vrcp.f32 %v4023_v38 }
 0xaa0   : > { %v4025_v30 = vpop.xlane.xlu1 %4024 }
 0xaa2   : > { %v4019_v36 = vpop.xlane.xlu0 %4018 }
 0xaa3   : > { %5843 = vrcp.f32 %v4019_v36 }
 0xaa4   : > { %v4021_v48 = vpop.xlane.xlu1 %4020  ;;  %5845 = vrcp.f32 %v4025_v30 }
 0xaa5   : > { %5847 = vrcp.f32 %v4021_v48 }
 0xaa6   : > { %v4031_v50 = vpop.xlane.xlu0 %4030 }
 0xaa7   : > { %5849 = vrcp.f32 %v4031_v50 }
 0xaa8   : > { %v4033_v49 = vpop.xlane.xlu1 %4032 }
 0xaa9   : > { %v5842_v39 = vpop.eup %5841 }
 0xaaa   : > { %v4027_v29 = vpop.xlane.xlu0 %4026 }
 0xaab   : > { %5851 = vrcp.f32 %v4027_v29 }
 0xaac   : > { %v4029_v57 = vpop.xlane.xlu1 %4028  ;;  %5853 = vrcp.f32 %v4033_v49 }
 0xaad   : > { %v5844_v59 = vpop.eup %5843  ;;  %5855 = vrcp.f32 %v4029_v57 }
 0xaae   : > { %v4039_v5 = vpop.xlane.xlu0 %4038  ;;  %v5846_v1 = vpop.eup %5845 }
 0xaaf   : > { %v5848_v10 = vpop.eup %5847  ;;  %5857 = vrcp.f32 %v4039_v5 }
 0xab0   : > { %v4041_v62 = vpop.xlane.xlu1 %4040 }
 0xab1   : > { %v5850_v14 = vpop.eup %5849 }
 0xab2   : > { %v4035_v47 = vpop.xlane.xlu0 %4034 }
 0xab3   : > { %5859 = vrcp.f32 %v4035_v47 }
 0xab4   : > { %v4037_v63 = vpop.xlane.xlu1 %4036  ;;  %5861 = vrcp.f32 %v4041_v62 }
 0xab5   : > { %v5852_v58 = vpop.eup %5851  ;;  %5863 = vrcp.f32 %v4037_v63 }
 0xab6   : > { %v4043_v28 = vpop.xlane.xlu0 %4042  ;;  %v5854_v0 = vpop.eup %5853 }
 0xab7   : > { %v5856_v12 = vpop.eup %5855 }
 0xab8   : > { %v4045_v3 = vpop.xlane.xlu1 %4044 }
 0xab9   : > { %v5858_v25 = vpop.eup %5857 }
 0xaba   : > { %v4047_v22 = vpop.xlane.xlu0 %4046 }
 0xabb   : > { %5865 = vrcp.f32 %v4047_v22 }
 0xabc   : > { %v4049_v55 = vpop.xlane.xlu1 %4048  ;;  %5867 = vrcp.f32 %v4043_v28 }
 0xabd   : > { %5869 = vrcp.f32 %v4049_v55  ;;  %v5860_v18 = vpop.eup %5859 }
 0xabe   : > { %5871 = vrcp.f32 %v4045_v3  ;;  %v5862_v26 = vpop.eup %5861 }
 0xabf   : > { %v5864_v40 = vpop.eup %5863 }
 0xac5   : > { %v5866_v9 = vpop.eup %5865 }
 0xac6   : > { %v5868_v16 = vpop.eup %5867 }
 0xac7   : > { %v5870_v46 = vpop.eup %5869 }
 0xac8   : > { %v5872_v43 = vpop.eup %5871 }
 0xae8   : > { %v5530_v32 = vpop.f32.mrb[176].mxu0 }
 0xae9   : > { %v4197_v41 = vmul.f32 %v5842_v39, %v5530_v32  ;;  %v4100_v52 = vpop.f32.mrb[177].mxu0 }
 0xaea   : > { %v4195_v61 = vmul.f32 %v5844_v59, %v4100_v52  ;;  %v5531_v51 = vpop.f32.mrb[178].mxu0 }
 0xaeb   : > { %4622 = vst [vmem:[%s7550_s10 + $0x128] sm:$0xff] %v4197_v41  ;;  %v4198_v21 = vmul.f32 %v5846_v1, %v5531_v51  ;;  %v4103_v53 = vpop.f32.mrb[179].mxu0 }
 0xaec   : > { %4620 = vst [vmem:[%s7550_s10 + $0x108] sm:$0xff] %v4195_v61  ;;  %v4196_v20 = vmul.f32 %v5848_v10, %v4103_v53 }
 0xaed   : > { %4623 = vst [vmem:[%s7550_s10 + $0x138] sm:$0xff] %v4198_v21 }
 0xaee   : > { %4621 = vst [vmem:[%s7550_s10 + $0x118] sm:$0xff] %v4196_v20 }
 0xaf0   : > { %v5534_v2 = vpop.f32.mrb[180].mxu0 }
 0xaf1   : > { %v4201_v60 = vmul.f32 %v5850_v14, %v5534_v2  ;;  %v4116_v17 = vpop.f32.mrb[181].mxu0 }
 0xaf2   : > { %v4199_v45 = vmul.f32 %v5852_v58, %v4116_v17  ;;  %v5535_v23 = vpop.f32.mrb[182].mxu0 }
 0xaf3   : > { %4626 = vst [vmem:[%s7550_s10 + $0x168] sm:$0xff] %v4201_v60  ;;  %v4202_v56 = vmul.f32 %v5854_v0, %v5535_v23  ;;  %v4119_v42 = vpop.f32.mrb[183].mxu0 }
 0xaf4   : > { %4624 = vst [vmem:[%s7550_s10 + $0x148] sm:$0xff] %v4199_v45  ;;  %v4200_v8 = vmul.f32 %v5856_v12, %v4119_v42 }
 0xaf5   : > { %4627 = vst [vmem:[%s7550_s10 + $0x178] sm:$0xff] %v4202_v56 }
 0xaf6   : > { %4625 = vst [vmem:[%s7550_s10 + $0x158] sm:$0xff] %v4200_v8 }
 0xaf8   : > { %v5538_v54 = vpop.f32.mrb[184].mxu0 }
 0xaf9   : > { %v4205_v15 = vmul.f32 %v5858_v25, %v5538_v54  ;;  %v4132_v13 = vpop.f32.mrb[185].mxu0 }
 0xafa   : > { %v4203_v24 = vmul.f32 %v5860_v18, %v4132_v13  ;;  %v5539_v7 = vpop.f32.mrb[186].mxu0 }
 0xafb   : > { %4630 = vst [vmem:[%s7550_s10 + $0x1a8] sm:$0xff] %v4205_v15  ;;  %v4206_v6 = vmul.f32 %v5862_v26, %v5539_v7  ;;  %v4135_v4 = vpop.f32.mrb[187].mxu0 }
 0xafc   : > { %4628 = vst [vmem:[%s7550_s10 + $0x188] sm:$0xff] %v4203_v24  ;;  %v4204_v11 = vmul.f32 %v5864_v40, %v4135_v4 }
 0xafd   : > { %4631 = vst [vmem:[%s7550_s10 + $0x1b8] sm:$0xff] %v4206_v6 }
 0xafe   : > { %4629 = vst [vmem:[%s7550_s10 + $0x198] sm:$0xff] %v4204_v11 }
 0xb00   : > { %v5542_v37 = vpop.f32.mrb[188].mxu0 }
 0xb01   : > { %v4209_v44 = vmul.f32 %v5866_v9, %v5542_v37  ;;  %v4148_v31 = vpop.f32.mrb[189].mxu0 }
 0xb02   : > { %v4207_v34 = vmul.f32 %v5868_v16, %v4148_v31  ;;  %v5543_v27 = vpop.f32.mrb[190].mxu0 }
 0xb03   : > { %4634 = vst [vmem:[%s7550_s10 + $0x1e8] sm:$0xff] %v4209_v44  ;;  %v4210_v33 = vmul.f32 %v5870_v46, %v5543_v27  ;;  %v4151_v19 = vpop.f32.mrb[191].mxu0 }
 0xb04   : > { %4632 = vst [vmem:[%s7550_s10 + $0x1c8] sm:$0xff] %v4207_v34  ;;  %v4208_v35 = vmul.f32 %v5872_v43, %v4151_v19 }
 0xb05   : > { %4635 = vst [vmem:[%s7550_s10 + $0x1f8] sm:$0xff] %v4210_v33 }
 0xb06   : > { %4633 = vst [vmem:[%s7550_s10 + $0x1d8] sm:$0xff] %v4208_v35 }
 0xb07   : > { %5902 = shalt.err (!%p5899_p3)
}
 0xb08   : > { %s5903_s23 = scalar_lea.hbm %s7665_s12, 8192  ;;  %s5907_s10 = scalar_lea.hbm %s7723_s8, 16384 }
 0xb09   : > { %p5904_p4 = scmp.ne.s32.totalorder %s7665_s12, %s5903_s23  ;;  %p5908_p9 = scmp.lt.u32.totalorder %s7665_s12, %s7723_s8 }
 0xb0a   : > { %p5909_p10 = scmp.lt.u32.totalorder %s5907_s10, %s5903_s23  ;;  %p5911_p12 = scmp.lt.u32.totalorder %s5903_s23, %s7665_s12 }
 0xb0b   : > { %p5905_p7 = pnand %p5904_p4, %p6039_p5 }
 0xb0c   : > { %p5910_p11 = por %p5909_p10, %p5908_p9 }
 0xb0d   : > { %p5906_p8 = pneg %p5905_p7 }
 0xb0e   : > { %p5912_p13 = por %p5911_p12, %p5910_p11 }
 0xb10   : > { %p5913_p0 = pnand %p5912_p13, %p5906_p8 }
 0xb12   : > { %5916 = shalt.err (!%p5913_p0)
}
 0xb13   : > { %s5954_s19 = smov 256   ;;  %s5955_s20 = smov 16  }
 0xb14   : > { %5576 = dma.vmem_to_hbm [thread:$0]  (%p6039_p5), %s7667_s17, 8192, %s7665_s12, %s7674_s9, %s5954_s19, %s5954_s19, %s5955_s20  }
 0xb15 PF: > { %p5582_p1 = scmp.ge.s32.totalorder %s5951_s30, 2  ;;  %s4256_s25 = sand.u32 1, %s5939_s27  }
 0xb16   : > { %s4257_s21 = scalar_lea.sflag [#allocation3], %s4256_s25 }
 0xb17   : > { %p5579_p2 = pnand %p5582_p1, %p6043_p6 }
 0xb19   : > { %5934 = dma.done.wait (!%p5579_p2), %s4257_s21, 8192  }
 0xb1a   : > { %5936 = vsyncadd (!%p5579_p2), %s4257_s21, 4294959104  ;;  %p18_p3 = scmp.ge.s32.totalorder %s6026_s11, 4   ;;  %s7866_s27 = smov %s5943_s28 }
 0xb1b   : > { %s7867_s28 = smov %s5947_s29  ;;  %s7868_s29 = smov %s6037_s14 }
 0xb1c   : > { %s7869_s30 = smov %s6026_s11  ;;  %20 = sbr.rel (!%p18_p3) target bundleno = 3 (0x3), region = 99 }
 0xb23   :  { %4262 = vsyncpa [#allocation3], 1 }
 0xb24   :  { %4264 = vsyncpa [#allocation3 + $0x1], 1 }

</bundles_post_ra>
